<compile_context>
chip_gen: v7x
topology: tpu7x:2x2x1
jax: 0.10.0
libtpu: 0.0.40
codegen_flags: <defaults>
</compile_context>

<pallas_src>
import functools
import numpy as np
import jax
import jax.numpy as jnp
from jax.experimental import pallas as pl
from jax.experimental.pallas import tpu as pltpu

BN_EPS = 1e-5
LANE = 128
MAX_TILE_N = 2048                      # f32 [2048,1024] conv3 temp = 8 MiB
POOL_VMEM_BYTES = 32 * 1024 * 1024     # explicit scoped VMEM (v7x-safe)


def _ceil_to(a, m):
    return -(-a // m) * m


# ------------------------------ Pallas kernels ------------------------------

def _rows_to_sublane_max(h):
    """[R, C] -> [8, C] pairwise max over 8-row groups.

    Pure VPU (vreg-vs-vreg max of sublane-aligned static slices); the single
    8 -> 1 cross-sublane (XLU) reduce is deferred to the last point tile.
    """
    m = h[0:8]
    for r in range(8, h.shape[0], 8):
        m = jnp.maximum(m, h[r:r + 8])
    return m


def _pointmlp_pool_kernel(*refs, relu_last, with_trans):
    """Fused point-wise MLP (conv1->conv2->conv3, BN folded) + max-over-points.

    grid = (B, psplit, num_point_tiles).  The point-tile axis is the reduction
    axis ("arbitrary", last): an [8, C_out] VMEM scratch holds the running RAW
    conv3 max, and the conv3 per-channel shift (+ optional ReLU) is applied
    once on the pooled row in the last-tile epilogue.  Equivalence relies on
    the shift being per-channel and ReLU being monotone, so both commute with
    the max over points - do not add per-point biases/activations here.
    """
    if with_trans:
        (x_ref, t_ref, w1_ref, s1_ref, w2_ref, s2_ref, w3_ref, s3_ref,
         o_ref, acc_ref) = refs
    else:
        (x_ref, w1_ref, s1_ref, w2_ref, s2_ref, w3_ref, s3_ref,
         o_ref, acc_ref) = refs
    step = pl.program_id(2)

    x = x_ref[0]                                           # [tile_n, 8] bf16
    w1 = w1_ref[...]                                       # [8, 64] bf16
    if with_trans:
        # Fold the STN 3x3 transform into conv1: (x @ T) @ W1 == x @ (T @ W1).
        # Zero-padded rows/cols of T and W1 keep the padded channels inert.
        w1 = jnp.dot(t_ref[0], w1,
                     preferred_element_type=jnp.float32).astype(jnp.bfloat16)
    h = jnp.dot(x, w1, preferred_element_type=jnp.float32) + s1_ref[...]
    h = jnp.maximum(h, 0.0)
    h = jnp.dot(h.astype(jnp.bfloat16), w2_ref[...],
                preferred_element_type=jnp.float32) + s2_ref[...]
    h = jnp.maximum(h, 0.0)
    # Raw conv3 (shift/ReLU deferred past the max-pool).
    h = jnp.dot(h.astype(jnp.bfloat16), w3_ref[...],
                preferred_element_type=jnp.float32)        # [tile_n, C_out] f32
    m8 = _rows_to_sublane_max(h)                           # [8, C_out]

    @pl.when(step == 0)
    def _():
        acc_ref[...] = m8

    @pl.when(step != 0)
    def _():
        acc_ref[...] = jnp.maximum(acc_ref[...], m8)

    @pl.when(step == pl.num_programs(2) - 1)
    def _():
        # Deferred conv3 epilogue on the pooled [1, C_out] row; the output
        # block is written exactly once.
        m = jnp.max(acc_ref[...], axis=0, keepdims=True) + s3_ref[...]
        if relu_last:
            m = jnp.maximum(m, 0.0)
        o_ref[0] = m


def pointmlp_pool(x_pad, w1, s1, w2, s2, w3, s3, *, relu_last, tile_n,
                  psplit=1, tmat=None):
    b, n_pad, cin = x_pad.shape
    assert n_pad % (tile_n * psplit) == 0
    c_out = w3.shape[-1]
    nt = n_pad // (tile_n * psplit)          # point tiles per split
    with_trans = tmat is not None

    in_specs = [pl.BlockSpec((1, tile_n, cin),
                             lambda bi, p, t: (bi, p * nt + t, 0))]
    args = [x_pad]
    if with_trans:
        in_specs.append(pl.BlockSpec((1,) + tmat.shape[1:],
                                     lambda bi, p, t: (bi, 0, 0)))
        args.append(tmat)
    for w in (w1, s1, w2, s2, w3, s3):
        in_specs.append(pl.BlockSpec(w.shape, lambda bi, p, t: (0, 0)))
        args.append(w)

    out = pl.pallas_call(
        functools.partial(_pointmlp_pool_kernel, relu_last=relu_last,
                          with_trans=with_trans),
        out_shape=jax.ShapeDtypeStruct((b * psplit, 1, c_out), jnp.float32),
        grid=(b, psplit, nt),
        in_specs=in_specs,
        out_specs=pl.BlockSpec((1, 1, c_out),
                               lambda bi, p, t: (bi * psplit + p, 0, 0)),
        scratch_shapes=[pltpu.VMEM((8, c_out), jnp.float32)],
        compiler_params=pltpu.CompilerParams(
            dimension_semantics=("parallel", "parallel", "arbitrary"),
            vmem_limit_bytes=POOL_VMEM_BYTES),
    )(*args)
    g = out.reshape(b, psplit, c_out)
    # Per-split pooled rows already carry the (monotone) epilogue, so a plain
    # max combines splits correctly; psplit > 1 only when B == 1 (v7x 2-TC).
    return jnp.max(g, axis=1) if psplit > 1 else g[:, 0]


def _fc_chain_kernel(g_ref, w1_ref, s1_ref, w2_ref, s2_ref, w3_ref, s3_ref,
                     o_ref, *, log_softmax):
    """Fused fc1 -> fc2 -> fc3 (+ optional log_softmax) on [bt, 1024] rows;
    weights and intermediates stay in VMEM, epilogues stay f32."""
    h = jnp.dot(g_ref[...].astype(jnp.bfloat16), w1_ref[...],
                preferred_element_type=jnp.float32) + s1_ref[...]
    h = jnp.maximum(h, 0.0)
    h = jnp.dot(h.astype(jnp.bfloat16), w2_ref[...],
                preferred_element_type=jnp.float32) + s2_ref[...]
    h = jnp.maximum(h, 0.0)
    y = jnp.dot(h.astype(jnp.bfloat16), w3_ref[...],
                preferred_element_type=jnp.float32) + s3_ref[...]
    if log_softmax:
        m = jnp.max(y, axis=1, keepdims=True)
        s = y - m
        lse = jnp.log(jnp.sum(jnp.exp(s), axis=1, keepdims=True))
        y = s - lse
    o_ref[...] = y.astype(o_ref.dtype)


def fc_chain(g, w1, s1, w2, s2, w3, s3, *, log_softmax, block_b=128):
    b, d = g.shape
    n_out = w3.shape[-1]
    bt = b if b <= block_b else block_b      # batch-blocked for large B
    nb = pl.cdiv(b, bt)
    in_specs = [pl.BlockSpec((bt, d), lambda i: (i, 0))]
    args = [g]
    for w in (w1, s1, w2, s2, w3, s3):
        in_specs.append(pl.BlockSpec(w.shape, lambda i: (0, 0)))
        args.append(w)
    return pl.pallas_call(
        functools.partial(_fc_chain_kernel, log_softmax=log_softmax),
        out_shape=jax.ShapeDtypeStruct((b, n_out), jnp.float32),
        grid=(nb,),
        in_specs=in_specs,
        out_specs=pl.BlockSpec((bt, n_out), lambda i: (i, 0)),
        compiler_params=pltpu.CompilerParams(
            dimension_semantics=("parallel",),
            vmem_limit_bytes=32 * 1024 * 1024),
    )(*args)


# -------------------------- deterministic parameters ------------------------

def _init_layer(key, in_c, out_c, with_bn=True):
    kw, kb, kg, kbeta, km, kv = jax.random.split(key, 6)
    w = jax.random.normal(kw, (in_c, out_c), jnp.float32) / np.sqrt(in_c)
    b = 0.01 * jax.random.normal(kb, (out_c,), jnp.float32)
    if with_bn:
        gamma = 1.0 + 0.01 * jax.random.normal(kg, (out_c,), jnp.float32)
        beta = 0.01 * jax.random.normal(kbeta, (out_c,), jnp.float32)
        mean = 0.01 * jax.random.normal(km, (out_c,), jnp.float32)
        var = jnp.abs(1.0 + 0.01 * jax.random.normal(kv, (out_c,), jnp.float32))
        scale = gamma / jnp.sqrt(var + BN_EPS)
        shift = (b - mean) * scale + beta
    else:
        scale = jnp.ones((out_c,), jnp.float32)
        shift = b
    return (w, scale, shift)


def init_params(key, in_c=3, num_classes=10):
    specs = [
        # STN3d: conv 3->64->128->1024, fc 1024->512->256->9
        ("stn_conv1", in_c, 64, True),
        ("stn_conv2", 64, 128, True),
        ("stn_conv3", 128, 1024, True),
        ("stn_fc1", 1024, 512, True),
        ("stn_fc2", 512, 256, True),
        ("stn_fc3", 256, 9, False),
        # PointNetEncoder: conv 3->64->128->1024
        ("conv1", in_c, 64, True),
        ("conv2", 64, 128, True),
        ("conv3", 128, 1024, True),
        # classifier head: fc_channels = [1024, 512, 256, num_classes]
        ("fc1", 1024, 512, True),
        ("fc2", 512, 256, True),
        ("fc3", 256, num_classes, False),
    ]
    keys = jax.random.split(key, len(specs))
    return {name: _init_layer(k, ci, co, bn)
            for k, (name, ci, co, bn) in zip(keys, specs)}


def prepare_params(raw, num_classes):
    """Fold BN/bias scale into W (W' = W*scale), cast weights bf16, keep the
    per-channel shift in f32, and pad narrow dims for MXU/lane alignment."""
    def folded(name):
        w, scale, shift = raw[name]
        return w * scale[None, :], shift

    def pack(name, pad_k_to=None):
        w, shift = folded(name)
        if pad_k_to is not None and w.shape[0] < pad_k_to:
            w = jnp.pad(w, ((0, pad_k_to - w.shape[0]), (0, 0)))
        return (w.astype(jnp.bfloat16),
                shift.reshape(1, -1).astype(jnp.float32))

    def pack_padded_out(name, pad_bias):
        # pad narrow outputs (9 / num_classes) to 128 lanes for dense vst;
        # pad_bias=-1e9 makes padded logits vanish under (f32) log_softmax.
        w, shift = folded(name)
        npad = max(LANE, _ceil_to(w.shape[1], LANE)) - w.shape[1]
        w = jnp.pad(w, ((0, 0), (0, npad)))
        shift = jnp.concatenate(
            [shift, jnp.full((npad,), pad_bias, jnp.float32)])
        return (w.astype(jnp.bfloat16),
                shift.reshape(1, -1).astype(jnp.float32))

    prep = {"num_classes": num_classes}
    prep["stn_mlp"] = pack("stn_conv1", pad_k_to=8) + pack("stn_conv2") \
        + pack("stn_conv3")
    prep["stn_fc"] = pack("stn_fc1") + pack("stn_fc2") \
        + pack_padded_out("stn_fc3", 0.0)
    prep["enc_mlp"] = pack("conv1", pad_k_to=8) + pack("conv2") + pack("conv3")
    prep["head_fc"] = pack("fc1") + pack("fc2") + pack_padded_out("fc3", -1e9)
    return prep


# --------------------------------- forward ----------------------------------

def pointnet_cls_forward(x_ncw, prep):
    """x_ncw: [B, in_c, N] (torch NCW).  Returns (log_probs, trans_feat)."""
    num_classes = prep["num_classes"]
    b, c, n = x_ncw.shape
    # TODO(synk): cfg.use_normals=True (in_c=6) would need the STN transform
    # applied to xyz only; this port assumes in_c=3.

    # v7x has 2 TensorCores: keep >=2 "parallel" blocks even at B == 1 by
    # splitting the point axis into 2 partial-max halves.
    psplit = 2 if b == 1 else 1
    # Point tiling: one tile == padded N when it fits the cap, else balanced
    # <=2048-row tiles (amortizes per-step overhead, minimizes edge-pad waste).
    nt_total = _ceil_to(max(psplit, -(-n // MAX_TILE_N)), psplit)
    tile_n = _ceil_to(-(-n // nt_total), 8)
    n_padded = nt_total * tile_n

    # channels-last + edge-pad N (duplicate points never change a max-pool) +
    # zero-pad channels 3 -> 8 + bf16 cast; XLA fuses these into one HBM pass.
    x = jnp.transpose(x_ncw, (0, 2, 1)).astype(jnp.float32)   # [B, N, 3]
    if n_padded > n:
        x = jnp.pad(x, ((0, 0), (0, n_padded - n), (0, 0)), mode="edge")
    x_pad = jnp.pad(x, ((0, 0), (0, 0), (0, 8 - c))).astype(jnp.bfloat16)

    # ---- STN3d: fused conv1..conv3 + max-pool, then fused fc chain ----
    g_stn = pointmlp_pool(x_pad, *prep["stn_mlp"], relu_last=True,
                          tile_n=tile_n, psplit=psplit)
    t_out = fc_chain(g_stn, *prep["stn_fc"], log_softmax=False)
    trans = t_out[:, :9].reshape(b, 3, 3) + jnp.eye(3, dtype=jnp.float32)[None]
    # zero-padded [B, 8, 8] transform, folded into conv1 inside the encoder
    # kernel (no per-batch w1_eff einsum / HBM round trip).
    tmat = jnp.pad(trans, ((0, 0), (0, 5), (0, 5))).astype(jnp.bfloat16)

    # ---- PointNetEncoder: fused (x@T)@conv1 -> conv2 -> conv3 + max-pool ----
    g = pointmlp_pool(x_pad, *prep["enc_mlp"], relu_last=False,
                      tile_n=tile_n, psplit=psplit, tmat=tmat)

    # ---- classifier head: fused fc1 -> fc2 -> fc3 -> log_softmax ----
    out = fc_chain(g, *prep["head_fc"], log_softmax=True)
    log_probs = out[:, :num_classes]
    # TODO(synk): cfg.feature_transform (STNkd(64) -> trans_feat) branch not
    # exercised by this config; returned as None.
    trans_feat = None
    return log_probs, trans_feat


if __name__ == "__main__":
    key = jax.random.PRNGKey(0)
    kx, kp = jax.random.split(key)
    B, IN_C, N_PTS, NUM_CLASSES = 2, 3, 64, 10   # cfg.use_normals=False, 10 classes
    x = jax.random.normal(kx, (B, IN_C, N_PTS), jnp.float32)
    raw = init_params(kp, in_c=IN_C, num_classes=NUM_CLASSES)
    prep = prepare_params(raw, NUM_CLASSES)

    fwd = jax.jit(lambda xx: pointnet_cls_forward(xx, prep))
    log_probs, trans_feat = fwd(x)
    log_probs = jax.block_until_ready(log_probs)
    assert log_probs.shape == (B, NUM_CLASSES)
    # log_softmax rows must (log-)sum to ~1
    assert np.allclose(np.exp(np.asarray(log_probs)).sum(axis=1), 1.0, atol=1e-4)
    print("KERNEL_OK")
</pallas_src>

<mosaic_0001>
module attributes {stable_mosaic.version = 11 : i64} {
  func.func @_pointmlp_pool_kernel(%arg0: i32, %arg1: i32, %arg2: i32, %arg3: memref<1x64x8xbf16, #tpu.memory_space<vmem>>, %arg4: memref<8x64xbf16, #tpu.memory_space<vmem>>, %arg5: memref<1x64xf32, #tpu.memory_space<vmem>>, %arg6: memref<64x128xbf16, #tpu.memory_space<vmem>>, %arg7: memref<1x128xf32, #tpu.memory_space<vmem>>, %arg8: memref<128x1024xbf16, #tpu.memory_space<vmem>>, %arg9: memref<1x1024xf32, #tpu.memory_space<vmem>>, %arg10: memref<1x1x1024xf32, #tpu.memory_space<vmem>>, %arg11: memref<8x1024xf32, #tpu.memory_space<vmem>>) attributes {dimension_semantics = [#tpu.dimension_semantics<parallel>, #tpu.dimension_semantics<parallel>, #tpu.dimension_semantics<arbitrary>], iteration_bounds = array<i64: 2, 1, 1>, scalar_prefetch = 0 : i64, scratch_operands = 1 : i64, tpu.core_type = #tpu.core_type<tc>, window_params = [{transform_indices = @transform_0, window_bounds = array<i64: 1, 64, 8>}, {pipeline_mode = #tpu.pipeline_mode<synchronous>, transform_indices = @transform_1, window_bounds = array<i64: 8, 64>}, {pipeline_mode = #tpu.pipeline_mode<synchronous>, transform_indices = @transform_2, window_bounds = array<i64: 1, 64>}, {pipeline_mode = #tpu.pipeline_mode<synchronous>, transform_indices = @transform_3, window_bounds = array<i64: 64, 128>}, {pipeline_mode = #tpu.pipeline_mode<synchronous>, transform_indices = @transform_4, window_bounds = array<i64: 1, 128>}, {pipeline_mode = #tpu.pipeline_mode<synchronous>, transform_indices = @transform_5, window_bounds = array<i64: 128, 1024>}, {pipeline_mode = #tpu.pipeline_mode<synchronous>, transform_indices = @transform_6, window_bounds = array<i64: 1, 1024>}, {transform_indices = @transform_7, window_bounds = array<i64: 1, 1, 1024>}]} {
    %c0 = arith.constant 0 : index
    %c0_0 = arith.constant 0 : index
    %c0_1 = arith.constant 0 : index
    %0 = vector.load %arg3[%c0, %c0_0, %c0_1] : memref<1x64x8xbf16, #tpu.memory_space<vmem>>, vector<1x64x8xbf16>
    %1 = vector.shape_cast %0 : vector<1x64x8xbf16> to vector<64x8xbf16>
    %c0_2 = arith.constant 0 : index
    %c0_3 = arith.constant 0 : index
    %2 = vector.load %arg4[%c0_2, %c0_3] : memref<8x64xbf16, #tpu.memory_space<vmem>>, vector<8x64xbf16>
    %cst = arith.constant dense<0.000000e+00> : vector<64x64xf32>
    %3 = tpu.matmul %1, %2, %cst {dimension_numbers = #tpu.dot_dimension_numbers<[1], [0], [0], [1], [0, 0, 1, 1], [], []>} : vector<64x8xbf16>, vector<8x64xbf16>, vector<64x64xf32> -> vector<64x64xf32>
    %c0_4 = arith.constant 0 : index
    %c0_5 = arith.constant 0 : index
    %4 = vector.load %arg5[%c0_4, %c0_5] : memref<1x64xf32, #tpu.memory_space<vmem>>, vector<1x64xf32>
    %5 = vector.broadcast %4 : vector<1x64xf32> to vector<64x64xf32>
    %6 = arith.addf %3, %5 : vector<64x64xf32>
    %cst_6 = arith.constant 0.000000e+00 : f32
    %7 = vector.broadcast %cst_6 : f32 to vector<64x64xf32>
    %8 = arith.maximumf %6, %7 : vector<64x64xf32>
    %9 = arith.truncf %8 : vector<64x64xf32> to vector<64x64xbf16>
    %c0_7 = arith.constant 0 : index
    %c0_8 = arith.constant 0 : index
    %10 = vector.load %arg6[%c0_7, %c0_8] : memref<64x128xbf16, #tpu.memory_space<vmem>>, vector<64x128xbf16>
    %cst_9 = arith.constant dense<0.000000e+00> : vector<64x128xf32>
    %11 = tpu.matmul %9, %10, %cst_9 {dimension_numbers = #tpu.dot_dimension_numbers<[1], [0], [0], [1], [0, 0, 1, 1], [], []>} : vector<64x64xbf16>, vector<64x128xbf16>, vector<64x128xf32> -> vector<64x128xf32>
    %c0_10 = arith.constant 0 : index
    %c0_11 = arith.constant 0 : index
    %12 = vector.load %arg7[%c0_10, %c0_11] : memref<1x128xf32, #tpu.memory_space<vmem>>, vector<1x128xf32>
    %13 = vector.broadcast %12 : vector<1x128xf32> to vector<64x128xf32>
    %14 = arith.addf %11, %13 : vector<64x128xf32>
    %cst_12 = arith.constant 0.000000e+00 : f32
    %15 = vector.broadcast %cst_12 : f32 to vector<64x128xf32>
    %16 = arith.maximumf %14, %15 : vector<64x128xf32>
    %17 = arith.truncf %16 : vector<64x128xf32> to vector<64x128xbf16>
    %c0_13 = arith.constant 0 : index
    %c0_14 = arith.constant 0 : index
    %18 = vector.load %arg8[%c0_13, %c0_14] : memref<128x1024xbf16, #tpu.memory_space<vmem>>, vector<128x1024xbf16>
    %cst_15 = arith.constant dense<0.000000e+00> : vector<64x1024xf32>
    %19 = tpu.matmul %17, %18, %cst_15 {dimension_numbers = #tpu.dot_dimension_numbers<[1], [0], [0], [1], [0, 0, 1, 1], [], []>} : vector<64x128xbf16>, vector<128x1024xbf16>, vector<64x1024xf32> -> vector<64x1024xf32>
    %20 = vector.extract_strided_slice %19 {offsets = [0, 0], sizes = [8, 1024], strides = [1, 1]} : vector<64x1024xf32> to vector<8x1024xf32>
    %21 = vector.extract_strided_slice %19 {offsets = [8, 0], sizes = [8, 1024], strides = [1, 1]} : vector<64x1024xf32> to vector<8x1024xf32>
    %22 = arith.maximumf %20, %21 : vector<8x1024xf32>
    %23 = vector.extract_strided_slice %19 {offsets = [16, 0], sizes = [8, 1024], strides = [1, 1]} : vector<64x1024xf32> to vector<8x1024xf32>
    %24 = arith.maximumf %22, %23 : vector<8x1024xf32>
    %25 = vector.extract_strided_slice %19 {offsets = [24, 0], sizes = [8, 1024], strides = [1, 1]} : vector<64x1024xf32> to vector<8x1024xf32>
    %26 = arith.maximumf %24, %25 : vector<8x1024xf32>
    %27 = vector.extract_strided_slice %19 {offsets = [32, 0], sizes = [8, 1024], strides = [1, 1]} : vector<64x1024xf32> to vector<8x1024xf32>
    %28 = arith.maximumf %26, %27 : vector<8x1024xf32>
    %29 = vector.extract_strided_slice %19 {offsets = [40, 0], sizes = [8, 1024], strides = [1, 1]} : vector<64x1024xf32> to vector<8x1024xf32>
    %30 = arith.maximumf %28, %29 : vector<8x1024xf32>
    %31 = vector.extract_strided_slice %19 {offsets = [48, 0], sizes = [8, 1024], strides = [1, 1]} : vector<64x1024xf32> to vector<8x1024xf32>
    %32 = arith.maximumf %30, %31 : vector<8x1024xf32>
    %33 = vector.extract_strided_slice %19 {offsets = [56, 0], sizes = [8, 1024], strides = [1, 1]} : vector<64x1024xf32> to vector<8x1024xf32>
    %34 = arith.maximumf %32, %33 : vector<8x1024xf32>
    %c0_i32 = arith.constant 0 : i32
    %35 = arith.cmpi eq, %arg2, %c0_i32 : i32
    %36 = arith.extui %35 : i1 to i32
    %c0_i32_16 = arith.constant 0 : i32
    %37 = arith.cmpi ne, %36, %c0_i32_16 : i32
    scf.if %37 {
      %c0_21 = arith.constant 0 : index
      %c0_22 = arith.constant 0 : index
      %44 = vector.load %arg11[%c0_21, %c0_22] : memref<8x1024xf32, #tpu.memory_space<vmem>>, vector<8x1024xf32>
      tpu.vector_store %arg11[%c0_21, %c0_22], %34 {strides = array<i32>} : memref<8x1024xf32, #tpu.memory_space<vmem>>, vector<8x1024xf32>,
    } else {
    }
    %c0_i32_17 = arith.constant 0 : i32
    %38 = arith.cmpi ne, %arg2, %c0_i32_17 : i32
    %39 = arith.extui %38 : i1 to i32
    %c0_i32_18 = arith.constant 0 : i32
    %40 = arith.cmpi ne, %39, %c0_i32_18 : i32
    scf.if %40 {
      %c0_21 = arith.constant 0 : index
      %c0_22 = arith.constant 0 : index
      %44 = vector.load %arg11[%c0_21, %c0_22] : memref<8x1024xf32, #tpu.memory_space<vmem>>, vector<8x1024xf32>
      %45 = arith.maximumf %44, %34 : vector<8x1024xf32>
      %c0_23 = arith.constant 0 : index
      %c0_24 = arith.constant 0 : index
      %46 = vector.load %arg11[%c0_23, %c0_24] : memref<8x1024xf32, #tpu.memory_space<vmem>>, vector<8x1024xf32>
      tpu.vector_store %arg11[%c0_23, %c0_24], %45 {strides = array<i32>} : memref<8x1024xf32, #tpu.memory_space<vmem>>, vector<8x1024xf32>,
    } else {
    }
    %c0_i32_19 = arith.constant 0 : i32
    %41 = arith.cmpi eq, %arg2, %c0_i32_19 : i32
    %42 = arith.extui %41 : i1 to i32
    %c0_i32_20 = arith.constant 0 : i32
    %43 = arith.cmpi ne, %42, %c0_i32_20 : i32
    scf.if %43 {
      %c0_21 = arith.constant 0 : index
      %c0_22 = arith.constant 0 : index
      %44 = vector.load %arg11[%c0_21, %c0_22] : memref<8x1024xf32, #tpu.memory_space<vmem>>, vector<8x1024xf32>
      %cst_23 = arith.constant dense<0xFF800000> : vector<1024xf32>
      %45 = vector.multi_reduction <maximumf>, %44, %cst_23 [0] : vector<8x1024xf32> to vector<1024xf32>
      %46 = vector.shape_cast %45 : vector<1024xf32> to vector<1x1024xf32>
      %c0_24 = arith.constant 0 : index
      %c0_25 = arith.constant 0 : index
      %47 = vector.load %arg9[%c0_24, %c0_25] : memref<1x1024xf32, #tpu.memory_space<vmem>>, vector<1x1024xf32>
      %48 = arith.addf %46, %47 : vector<1x1024xf32>
      %cst_26 = arith.constant 0.000000e+00 : f32
      %49 = vector.broadcast %cst_26 : f32 to vector<1x1024xf32>
      %50 = arith.maximumf %48, %49 : vector<1x1024xf32>
      %c0_27 = arith.constant 0 : index
      %c0_28 = arith.constant 0 : index
      %c0_29 = arith.constant 0 : index
      %51 = vector.load %arg10[%c0_27, %c0_28, %c0_29] : memref<1x1x1024xf32, #tpu.memory_space<vmem>>, vector<1x1x1024xf32>
      %52 = vector.shape_cast %51 : vector<1x1x1024xf32> to vector<1x1024xf32>
      %53 = vector.shape_cast %50 : vector<1x1024xf32> to vector<1x1x1024xf32>
      tpu.vector_store %arg10[%c0_27, %c0_28, %c0_29], %53 {strides = array<i32>} : memref<1x1x1024xf32, #tpu.memory_space<vmem>>, vector<1x1x1024xf32>,
    } else {
    }
    return
  }
  func.func @transform_0(%arg0: i32, %arg1: i32, %arg2: i32) -> (i32, i32, i32) {
    %c1_i32 = arith.constant 1 : i32
    %0 = arith.muli %arg1, %c1_i32 : i32
    %1 = arith.addi %0, %arg2 : i32
    %c0_i32 = arith.constant 0 : i32
    %c0_i32_0 = arith.constant 0 : i32
    return %arg0, %1, %c0_i32 : i32, i32, i32
  }
  func.func @transform_1(%arg0: i32, %arg1: i32, %arg2: i32) -> (i32, i32) {
    %c0_i32 = arith.constant 0 : i32
    %c0_i32_0 = arith.constant 0 : i32
    %c0_i32_1 = arith.constant 0 : i32
    return %c0_i32, %c0_i32_0 : i32, i32
  }
  func.func @transform_2(%arg0: i32, %arg1: i32, %arg2: i32) -> (i32, i32) {
    %c0_i32 = arith.constant 0 : i32
    %c0_i32_0 = arith.constant 0 : i32
    %c0_i32_1 = arith.constant 0 : i32
    return %c0_i32, %c0_i32_0 : i32, i32
  }
  func.func @transform_3(%arg0: i32, %arg1: i32, %arg2: i32) -> (i32, i32) {
    %c0_i32 = arith.constant 0 : i32
    %c0_i32_0 = arith.constant 0 : i32
    %c0_i32_1 = arith.constant 0 : i32
    return %c0_i32, %c0_i32_0 : i32, i32
  }
  func.func @transform_4(%arg0: i32, %arg1: i32, %arg2: i32) -> (i32, i32) {
    %c0_i32 = arith.constant 0 : i32
    %c0_i32_0 = arith.constant 0 : i32
    %c0_i32_1 = arith.constant 0 : i32
    return %c0_i32, %c0_i32_0 : i32, i32
  }
  func.func @transform_5(%arg0: i32, %arg1: i32, %arg2: i32) -> (i32, i32) {
    %c0_i32 = arith.constant 0 : i32
    %c0_i32_0 = arith.constant 0 : i32
    %c0_i32_1 = arith.constant 0 : i32
    return %c0_i32, %c0_i32_0 : i32, i32
  }
  func.func @transform_6(%arg0: i32, %arg1: i32, %arg2: i32) -> (i32, i32) {
    %c0_i32 = arith.constant 0 : i32
    %c0_i32_0 = arith.constant 0 : i32
    %c0_i32_1 = arith.constant 0 : i32
    return %c0_i32, %c0_i32_0 : i32, i32
  }
  func.func @transform_7(%arg0: i32, %arg1: i32, %arg2: i32) -> (i32, i32, i32) {
    %c1_i32 = arith.constant 1 : i32
    %0 = arith.muli %arg0, %c1_i32 : i32
    %1 = arith.addi %0, %arg1 : i32
    %c0_i32 = arith.constant 0 : i32
    %c0_i32_0 = arith.constant 0 : i32
    %c0_i32_1 = arith.constant 0 : i32
    return %1, %c0_i32, %c0_i32_0 : i32, i32, i32
  }
}

module attributes {stable_mosaic.version = 11 : i64} {
  func.func @_fc_chain_kernel(%arg0: i32, %arg1: memref<2x1024xf32, #tpu.memory_space<vmem>>, %arg2: memref<1024x512xbf16, #tpu.memory_space<vmem>>, %arg3: memref<1x512xf32, #tpu.memory_space<vmem>>, %arg4: memref<512x256xbf16, #tpu.memory_space<vmem>>, %arg5: memref<1x256xf32, #tpu.memory_space<vmem>>, %arg6: memref<256x128xbf16, #tpu.memory_space<vmem>>, %arg7: memref<1x128xf32, #tpu.memory_space<vmem>>, %arg8: memref<2x128xf32, #tpu.memory_space<vmem>>) attributes {dimension_semantics = [#tpu.dimension_semantics<parallel>], iteration_bounds = array<i64: 1>, scalar_prefetch = 0 : i64, scratch_operands = 0 : i64, tpu.core_type = #tpu.core_type<tc>, window_params = [{transform_indices = @transform_0, window_bounds = array<i64: 2, 1024>}, {pipeline_mode = #tpu.pipeline_mode<synchronous>, transform_indices = @transform_1, window_bounds = array<i64: 1024, 512>}, {pipeline_mode = #tpu.pipeline_mode<synchronous>, transform_indices = @transform_2, window_bounds = array<i64: 1, 512>}, {pipeline_mode = #tpu.pipeline_mode<synchronous>, transform_indices = @transform_3, window_bounds = array<i64: 512, 256>}, {pipeline_mode = #tpu.pipeline_mode<synchronous>, transform_indices = @transform_4, window_bounds = array<i64: 1, 256>}, {pipeline_mode = #tpu.pipeline_mode<synchronous>, transform_indices = @transform_5, window_bounds = array<i64: 256, 128>}, {pipeline_mode = #tpu.pipeline_mode<synchronous>, transform_indices = @transform_6, window_bounds = array<i64: 1, 128>}, {transform_indices = @transform_7, window_bounds = array<i64: 2, 128>}]} {
    %c0 = arith.constant 0 : index
    %c0_0 = arith.constant 0 : index
    %0 = vector.load %arg1[%c0, %c0_0] : memref<2x1024xf32, #tpu.memory_space<vmem>>, vector<2x1024xf32>
    %1 = arith.truncf %0 : vector<2x1024xf32> to vector<2x1024xbf16>
    %c0_1 = arith.constant 0 : index
    %c0_2 = arith.constant 0 : index
    %2 = vector.load %arg2[%c0_1, %c0_2] : memref<1024x512xbf16, #tpu.memory_space<vmem>>, vector<1024x512xbf16>
    %cst = arith.constant dense<0.000000e+00> : vector<2x512xf32>
    %3 = tpu.matmul %1, %2, %cst {dimension_numbers = #tpu.dot_dimension_numbers<[1], [0], [0], [1], [0, 0, 1, 1], [], []>} : vector<2x1024xbf16>, vector<1024x512xbf16>, vector<2x512xf32> -> vector<2x512xf32>
    %c0_3 = arith.constant 0 : index
    %c0_4 = arith.constant 0 : index
    %4 = vector.load %arg3[%c0_3, %c0_4] : memref<1x512xf32, #tpu.memory_space<vmem>>, vector<1x512xf32>
    %5 = vector.broadcast %4 : vector<1x512xf32> to vector<2x512xf32>
    %6 = arith.addf %3, %5 : vector<2x512xf32>
    %cst_5 = arith.constant 0.000000e+00 : f32
    %7 = vector.broadcast %cst_5 : f32 to vector<2x512xf32>
    %8 = arith.maximumf %6, %7 : vector<2x512xf32>
    %9 = arith.truncf %8 : vector<2x512xf32> to vector<2x512xbf16>
    %c0_6 = arith.constant 0 : index
    %c0_7 = arith.constant 0 : index
    %10 = vector.load %arg4[%c0_6, %c0_7] : memref<512x256xbf16, #tpu.memory_space<vmem>>, vector<512x256xbf16>
    %cst_8 = arith.constant dense<0.000000e+00> : vector<2x256xf32>
    %11 = tpu.matmul %9, %10, %cst_8 {dimension_numbers = #tpu.dot_dimension_numbers<[1], [0], [0], [1], [0, 0, 1, 1], [], []>} : vector<2x512xbf16>, vector<512x256xbf16>, vector<2x256xf32> -> vector<2x256xf32>
    %c0_9 = arith.constant 0 : index
    %c0_10 = arith.constant 0 : index
    %12 = vector.load %arg5[%c0_9, %c0_10] : memref<1x256xf32, #tpu.memory_space<vmem>>, vector<1x256xf32>
    %13 = vector.broadcast %12 : vector<1x256xf32> to vector<2x256xf32>
    %14 = arith.addf %11, %13 : vector<2x256xf32>
    %cst_11 = arith.constant 0.000000e+00 : f32
    %15 = vector.broadcast %cst_11 : f32 to vector<2x256xf32>
    %16 = arith.maximumf %14, %15 : vector<2x256xf32>
    %17 = arith.truncf %16 : vector<2x256xf32> to vector<2x256xbf16>
    %c0_12 = arith.constant 0 : index
    %c0_13 = arith.constant 0 : index
    %18 = vector.load %arg6[%c0_12, %c0_13] : memref<256x128xbf16, #tpu.memory_space<vmem>>, vector<256x128xbf16>
    %cst_14 = arith.constant dense<0.000000e+00> : vector<2x128xf32>
    %19 = tpu.matmul %17, %18, %cst_14 {dimension_numbers = #tpu.dot_dimension_numbers<[1], [0], [0], [1], [0, 0, 1, 1], [], []>} : vector<2x256xbf16>, vector<256x128xbf16>, vector<2x128xf32> -> vector<2x128xf32>
    %c0_15 = arith.constant 0 : index
    %c0_16 = arith.constant 0 : index
    %20 = vector.load %arg7[%c0_15, %c0_16] : memref<1x128xf32, #tpu.memory_space<vmem>>, vector<1x128xf32>
    %21 = vector.broadcast %20 : vector<1x128xf32> to vector<2x128xf32>
    %22 = arith.addf %19, %21 : vector<2x128xf32>
    %c0_17 = arith.constant 0 : index
    %c0_18 = arith.constant 0 : index
    %23 = vector.load %arg8[%c0_17, %c0_18] : memref<2x128xf32, #tpu.memory_space<vmem>>, vector<2x128xf32>
    tpu.vector_store %arg8[%c0_17, %c0_18], %22 {strides = array<i32>} : memref<2x128xf32, #tpu.memory_space<vmem>>, vector<2x128xf32>,
    return
  }
  func.func @transform_0(%arg0: i32) -> (i32, i32) {
    %c0_i32 = arith.constant 0 : i32
    %c0_i32_0 = arith.constant 0 : i32
    return %arg0, %c0_i32 : i32, i32
  }
  func.func @transform_1(%arg0: i32) -> (i32, i32) {
    %c0_i32 = arith.constant 0 : i32
    %c0_i32_0 = arith.constant 0 : i32
    %c0_i32_1 = arith.constant 0 : i32
    return %c0_i32, %c0_i32_0 : i32, i32
  }
  func.func @transform_2(%arg0: i32) -> (i32, i32) {
    %c0_i32 = arith.constant 0 : i32
    %c0_i32_0 = arith.constant 0 : i32
    %c0_i32_1 = arith.constant 0 : i32
    return %c0_i32, %c0_i32_0 : i32, i32
  }
  func.func @transform_3(%arg0: i32) -> (i32, i32) {
    %c0_i32 = arith.constant 0 : i32
    %c0_i32_0 = arith.constant 0 : i32
    %c0_i32_1 = arith.constant 0 : i32
    return %c0_i32, %c0_i32_0 : i32, i32
  }
  func.func @transform_4(%arg0: i32) -> (i32, i32) {
    %c0_i32 = arith.constant 0 : i32
    %c0_i32_0 = arith.constant 0 : i32
    %c0_i32_1 = arith.constant 0 : i32
    return %c0_i32, %c0_i32_0 : i32, i32
  }
  func.func @transform_5(%arg0: i32) -> (i32, i32) {
    %c0_i32 = arith.constant 0 : i32
    %c0_i32_0 = arith.constant 0 : i32
    %c0_i32_1 = arith.constant 0 : i32
    return %c0_i32, %c0_i32_0 : i32, i32
  }
  func.func @transform_6(%arg0: i32) -> (i32, i32) {
    %c0_i32 = arith.constant 0 : i32
    %c0_i32_0 = arith.constant 0 : i32
    %c0_i32_1 = arith.constant 0 : i32
    return %c0_i32, %c0_i32_0 : i32, i32
  }
  func.func @transform_7(%arg0: i32) -> (i32, i32) {
    %c0_i32 = arith.constant 0 : i32
    %c0_i32_0 = arith.constant 0 : i32
    return %arg0, %c0_i32 : i32, i32
  }
}

module attributes {stable_mosaic.version = 11 : i64} {
  func.func @_pointmlp_pool_kernel(%arg0: i32, %arg1: i32, %arg2: i32, %arg3: memref<1x64x8xbf16, #tpu.memory_space<vmem>>, %arg4: memref<1x8x8xbf16, #tpu.memory_space<vmem>>, %arg5: memref<8x64xbf16, #tpu.memory_space<vmem>>, %arg6: memref<1x64xf32, #tpu.memory_space<vmem>>, %arg7: memref<64x128xbf16, #tpu.memory_space<vmem>>, %arg8: memref<1x128xf32, #tpu.memory_space<vmem>>, %arg9: memref<128x1024xbf16, #tpu.memory_space<vmem>>, %arg10: memref<1x1024xf32, #tpu.memory_space<vmem>>, %arg11: memref<1x1x1024xf32, #tpu.memory_space<vmem>>, %arg12: memref<8x1024xf32, #tpu.memory_space<vmem>>) attributes {dimension_semantics = [#tpu.dimension_semantics<parallel>, #tpu.dimension_semantics<parallel>, #tpu.dimension_semantics<arbitrary>], iteration_bounds = array<i64: 2, 1, 1>, scalar_prefetch = 0 : i64, scratch_operands = 1 : i64, tpu.core_type = #tpu.core_type<tc>, window_params = [{transform_indices = @transform_0, window_bounds = array<i64: 1, 64, 8>}, {transform_indices = @transform_1, window_bounds = array<i64: 1, 8, 8>}, {pipeline_mode = #tpu.pipeline_mode<synchronous>, transform_indices = @transform_2, window_bounds = array<i64: 8, 64>}, {pipeline_mode = #tpu.pipeline_mode<synchronous>, transform_indices = @transform_3, window_bounds = array<i64: 1, 64>}, {pipeline_mode = #tpu.pipeline_mode<synchronous>, transform_indices = @transform_4, window_bounds = array<i64: 64, 128>}, {pipeline_mode = #tpu.pipeline_mode<synchronous>, transform_indices = @transform_5, window_bounds = array<i64: 1, 128>}, {pipeline_mode = #tpu.pipeline_mode<synchronous>, transform_indices = @transform_6, window_bounds = array<i64: 128, 1024>}, {pipeline_mode = #tpu.pipeline_mode<synchronous>, transform_indices = @transform_7, window_bounds = array<i64: 1, 1024>}, {transform_indices = @transform_8, window_bounds = array<i64: 1, 1, 1024>}]} {
    %c0 = arith.constant 0 : index
    %c0_0 = arith.constant 0 : index
    %c0_1 = arith.constant 0 : index
    %0 = vector.load %arg3[%c0, %c0_0, %c0_1] : memref<1x64x8xbf16, #tpu.memory_space<vmem>>, vector<1x64x8xbf16>
    %1 = vector.shape_cast %0 : vector<1x64x8xbf16> to vector<64x8xbf16>
    %c0_2 = arith.constant 0 : index
    %c0_3 = arith.constant 0 : index
    %2 = vector.load %arg5[%c0_2, %c0_3] : memref<8x64xbf16, #tpu.memory_space<vmem>>, vector<8x64xbf16>
    %c0_4 = arith.constant 0 : index
    %c0_5 = arith.constant 0 : index
    %c0_6 = arith.constant 0 : index
    %3 = vector.load %arg4[%c0_4, %c0_5, %c0_6] : memref<1x8x8xbf16, #tpu.memory_space<vmem>>, vector<1x8x8xbf16>
    %4 = vector.shape_cast %3 : vector<1x8x8xbf16> to vector<8x8xbf16>
    %cst = arith.constant dense<0.000000e+00> : vector<8x64xf32>
    %5 = tpu.matmul %4, %2, %cst {dimension_numbers = #tpu.dot_dimension_numbers<[1], [0], [0], [1], [0, 0, 1, 1], [], []>} : vector<8x8xbf16>, vector<8x64xbf16>, vector<8x64xf32> -> vector<8x64xf32>
    %6 = arith.truncf %5 : vector<8x64xf32> to vector<8x64xbf16>
    %cst_7 = arith.constant dense<0.000000e+00> : vector<64x64xf32>
    %7 = tpu.matmul %1, %6, %cst_7 {dimension_numbers = #tpu.dot_dimension_numbers<[1], [0], [0], [1], [0, 0, 1, 1], [], []>} : vector<64x8xbf16>, vector<8x64xbf16>, vector<64x64xf32> -> vector<64x64xf32>
    %c0_8 = arith.constant 0 : index
    %c0_9 = arith.constant 0 : index
    %8 = vector.load %arg6[%c0_8, %c0_9] : memref<1x64xf32, #tpu.memory_space<vmem>>, vector<1x64xf32>
    %9 = vector.broadcast %8 : vector<1x64xf32> to vector<64x64xf32>
    %10 = arith.addf %7, %9 : vector<64x64xf32>
    %cst_10 = arith.constant 0.000000e+00 : f32
    %11 = vector.broadcast %cst_10 : f32 to vector<64x64xf32>
    %12 = arith.maximumf %10, %11 : vector<64x64xf32>
    %13 = arith.truncf %12 : vector<64x64xf32> to vector<64x64xbf16>
    %c0_11 = arith.constant 0 : index
    %c0_12 = arith.constant 0 : index
    %14 = vector.load %arg7[%c0_11, %c0_12] : memref<64x128xbf16, #tpu.memory_space<vmem>>, vector<64x128xbf16>
    %cst_13 = arith.constant dense<0.000000e+00> : vector<64x128xf32>
    %15 = tpu.matmul %13, %14, %cst_13 {dimension_numbers = #tpu.dot_dimension_numbers<[1], [0], [0], [1], [0, 0, 1, 1], [], []>} : vector<64x64xbf16>, vector<64x128xbf16>, vector<64x128xf32> -> vector<64x128xf32>
    %c0_14 = arith.constant 0 : index
    %c0_15 = arith.constant 0 : index
    %16 = vector.load %arg8[%c0_14, %c0_15] : memref<1x128xf32, #tpu.memory_space<vmem>>, vector<1x128xf32>
    %17 = vector.broadcast %16 : vector<1x128xf32> to vector<64x128xf32>
    %18 = arith.addf %15, %17 : vector<64x128xf32>
    %cst_16 = arith.constant 0.000000e+00 : f32
    %19 = vector.broadcast %cst_16 : f32 to vector<64x128xf32>
    %20 = arith.maximumf %18, %19 : vector<64x128xf32>
    %21 = arith.truncf %20 : vector<64x128xf32> to vector<64x128xbf16>
    %c0_17 = arith.constant 0 : index
    %c0_18 = arith.constant 0 : index
    %22 = vector.load %arg9[%c0_17, %c0_18] : memref<128x1024xbf16, #tpu.memory_space<vmem>>, vector<128x1024xbf16>
    %cst_19 = arith.constant dense<0.000000e+00> : vector<64x1024xf32>
    %23 = tpu.matmul %21, %22, %cst_19 {dimension_numbers = #tpu.dot_dimension_numbers<[1], [0], [0], [1], [0, 0, 1, 1], [], []>} : vector<64x128xbf16>, vector<128x1024xbf16>, vector<64x1024xf32> -> vector<64x1024xf32>
    %24 = vector.extract_strided_slice %23 {offsets = [0, 0], sizes = [8, 1024], strides = [1, 1]} : vector<64x1024xf32> to vector<8x1024xf32>
    %25 = vector.extract_strided_slice %23 {offsets = [8, 0], sizes = [8, 1024], strides = [1, 1]} : vector<64x1024xf32> to vector<8x1024xf32>
    %26 = arith.maximumf %24, %25 : vector<8x1024xf32>
    %27 = vector.extract_strided_slice %23 {offsets = [16, 0], sizes = [8, 1024], strides = [1, 1]} : vector<64x1024xf32> to vector<8x1024xf32>
    %28 = arith.maximumf %26, %27 : vector<8x1024xf32>
    %29 = vector.extract_strided_slice %23 {offsets = [24, 0], sizes = [8, 1024], strides = [1, 1]} : vector<64x1024xf32> to vector<8x1024xf32>
    %30 = arith.maximumf %28, %29 : vector<8x1024xf32>
    %31 = vector.extract_strided_slice %23 {offsets = [32, 0], sizes = [8, 1024], strides = [1, 1]} : vector<64x1024xf32> to vector<8x1024xf32>
    %32 = arith.maximumf %30, %31 : vector<8x1024xf32>
    %33 = vector.extract_strided_slice %23 {offsets = [40, 0], sizes = [8, 1024], strides = [1, 1]} : vector<64x1024xf32> to vector<8x1024xf32>
    %34 = arith.maximumf %32, %33 : vector<8x1024xf32>
    %35 = vector.extract_strided_slice %23 {offsets = [48, 0], sizes = [8, 1024], strides = [1, 1]} : vector<64x1024xf32> to vector<8x1024xf32>
    %36 = arith.maximumf %34, %35 : vector<8x1024xf32>
    %37 = vector.extract_strided_slice %23 {offsets = [56, 0], sizes = [8, 1024], strides = [1, 1]} : vector<64x1024xf32> to vector<8x1024xf32>
    %38 = arith.maximumf %36, %37 : vector<8x1024xf32>
    %c0_i32 = arith.constant 0 : i32
    %39 = arith.cmpi eq, %arg2, %c0_i32 : i32
    %40 = arith.extui %39 : i1 to i32
    %c0_i32_20 = arith.constant 0 : i32
    %41 = arith.cmpi ne, %40, %c0_i32_20 : i32
    scf.if %41 {
      %c0_25 = arith.constant 0 : index
      %c0_26 = arith.constant 0 : index
      %48 = vector.load %arg12[%c0_25, %c0_26] : memref<8x1024xf32, #tpu.memory_space<vmem>>, vector<8x1024xf32>
      tpu.vector_store %arg12[%c0_25, %c0_26], %38 {strides = array<i32>} : memref<8x1024xf32, #tpu.memory_space<vmem>>, vector<8x1024xf32>,
    } else {
    }
    %c0_i32_21 = arith.constant 0 : i32
    %42 = arith.cmpi ne, %arg2, %c0_i32_21 : i32
    %43 = arith.extui %42 : i1 to i32
    %c0_i32_22 = arith.constant 0 : i32
    %44 = arith.cmpi ne, %43, %c0_i32_22 : i32
    scf.if %44 {
      %c0_25 = arith.constant 0 : index
      %c0_26 = arith.constant 0 : index
      %48 = vector.load %arg12[%c0_25, %c0_26] : memref<8x1024xf32, #tpu.memory_space<vmem>>, vector<8x1024xf32>
      %49 = arith.maximumf %48, %38 : vector<8x1024xf32>
      %c0_27 = arith.constant 0 : index
      %c0_28 = arith.constant 0 : index
      %50 = vector.load %arg12[%c0_27, %c0_28] : memref<8x1024xf32, #tpu.memory_space<vmem>>, vector<8x1024xf32>
      tpu.vector_store %arg12[%c0_27, %c0_28], %49 {strides = array<i32>} : memref<8x1024xf32, #tpu.memory_space<vmem>>, vector<8x1024xf32>,
    } else {
    }
    %c0_i32_23 = arith.constant 0 : i32
    %45 = arith.cmpi eq, %arg2, %c0_i32_23 : i32
    %46 = arith.extui %45 : i1 to i32
    %c0_i32_24 = arith.constant 0 : i32
    %47 = arith.cmpi ne, %46, %c0_i32_24 : i32
    scf.if %47 {
      %c0_25 = arith.constant 0 : index
      %c0_26 = arith.constant 0 : index
      %48 = vector.load %arg12[%c0_25, %c0_26] : memref<8x1024xf32, #tpu.memory_space<vmem>>, vector<8x1024xf32>
      %cst_27 = arith.constant dense<0xFF800000> : vector<1024xf32>
      %49 = vector.multi_reduction <maximumf>, %48, %cst_27 [0] : vector<8x1024xf32> to vector<1024xf32>
      %50 = vector.shape_cast %49 : vector<1024xf32> to vector<1x1024xf32>
      %c0_28 = arith.constant 0 : index
      %c0_29 = arith.constant 0 : index
      %51 = vector.load %arg10[%c0_28, %c0_29] : memref<1x1024xf32, #tpu.memory_space<vmem>>, vector<1x1024xf32>
      %52 = arith.addf %50, %51 : vector<1x1024xf32>
      %c0_30 = arith.constant 0 : index
      %c0_31 = arith.constant 0 : index
      %c0_32 = arith.constant 0 : index
      %53 = vector.load %arg11[%c0_30, %c0_31, %c0_32] : memref<1x1x1024xf32, #tpu.memory_space<vmem>>, vector<1x1x1024xf32>
      %54 = vector.shape_cast %53 : vector<1x1x1024xf32> to vector<1x1024xf32>
      %55 = vector.shape_cast %52 : vector<1x1024xf32> to vector<1x1x1024xf32>
      tpu.vector_store %arg11[%c0_30, %c0_31, %c0_32], %55 {strides = array<i32>} : memref<1x1x1024xf32, #tpu.memory_space<vmem>>, vector<1x1x1024xf32>,
    } else {
    }
    return
  }
  func.func @transform_0(%arg0: i32, %arg1: i32, %arg2: i32) -> (i32, i32, i32) {
    %c1_i32 = arith.constant 1 : i32
    %0 = arith.muli %arg1, %c1_i32 : i32
    %1 = arith.addi %0, %arg2 : i32
    %c0_i32 = arith.constant 0 : i32
    %c0_i32_0 = arith.constant 0 : i32
    return %arg0, %1, %c0_i32 : i32, i32, i32
  }
  func.func @transform_1(%arg0: i32, %arg1: i32, %arg2: i32) -> (i32, i32, i32) {
    %c0_i32 = arith.constant 0 : i32
    %c0_i32_0 = arith.constant 0 : i32
    %c0_i32_1 = arith.constant 0 : i32
    return %arg0, %c0_i32, %c0_i32_0 : i32, i32, i32
  }
  func.func @transform_2(%arg0: i32, %arg1: i32, %arg2: i32) -> (i32, i32) {
    %c0_i32 = arith.constant 0 : i32
    %c0_i32_0 = arith.constant 0 : i32
    %c0_i32_1 = arith.constant 0 : i32
    return %c0_i32, %c0_i32_0 : i32, i32
  }
  func.func @transform_3(%arg0: i32, %arg1: i32, %arg2: i32) -> (i32, i32) {
    %c0_i32 = arith.constant 0 : i32
    %c0_i32_0 = arith.constant 0 : i32
    %c0_i32_1 = arith.constant 0 : i32
    return %c0_i32, %c0_i32_0 : i32, i32
  }
  func.func @transform_4(%arg0: i32, %arg1: i32, %arg2: i32) -> (i32, i32) {
    %c0_i32 = arith.constant 0 : i32
    %c0_i32_0 = arith.constant 0 : i32
    %c0_i32_1 = arith.constant 0 : i32
    return %c0_i32, %c0_i32_0 : i32, i32
  }
  func.func @transform_5(%arg0: i32, %arg1: i32, %arg2: i32) -> (i32, i32) {
    %c0_i32 = arith.constant 0 : i32
    %c0_i32_0 = arith.constant 0 : i32
    %c0_i32_1 = arith.constant 0 : i32
    return %c0_i32, %c0_i32_0 : i32, i32
  }
  func.func @transform_6(%arg0: i32, %arg1: i32, %arg2: i32) -> (i32, i32) {
    %c0_i32 = arith.constant 0 : i32
    %c0_i32_0 = arith.constant 0 : i32
    %c0_i32_1 = arith.constant 0 : i32
    return %c0_i32, %c0_i32_0 : i32, i32
  }
  func.func @transform_7(%arg0: i32, %arg1: i32, %arg2: i32) -> (i32, i32) {
    %c0_i32 = arith.constant 0 : i32
    %c0_i32_0 = arith.constant 0 : i32
    %c0_i32_1 = arith.constant 0 : i32
    return %c0_i32, %c0_i32_0 : i32, i32
  }
  func.func @transform_8(%arg0: i32, %arg1: i32, %arg2: i32) -> (i32, i32, i32) {
    %c1_i32 = arith.constant 1 : i32
    %0 = arith.muli %arg0, %c1_i32 : i32
    %1 = arith.addi %0, %arg1 : i32
    %c0_i32 = arith.constant 0 : i32
    %c0_i32_0 = arith.constant 0 : i32
    %c0_i32_1 = arith.constant 0 : i32
    return %1, %c0_i32, %c0_i32_0 : i32, i32, i32
  }
}

module attributes {stable_mosaic.version = 11 : i64} {
  func.func @_fc_chain_kernel(%arg0: i32, %arg1: memref<2x1024xf32, #tpu.memory_space<vmem>>, %arg2: memref<1024x512xbf16, #tpu.memory_space<vmem>>, %arg3: memref<1x512xf32, #tpu.memory_space<vmem>>, %arg4: memref<512x256xbf16, #tpu.memory_space<vmem>>, %arg5: memref<1x256xf32, #tpu.memory_space<vmem>>, %arg6: memref<256x128xbf16, #tpu.memory_space<vmem>>, %arg7: memref<1x128xf32, #tpu.memory_space<vmem>>, %arg8: memref<2x128xf32, #tpu.memory_space<vmem>>) attributes {dimension_semantics = [#tpu.dimension_semantics<parallel>], iteration_bounds = array<i64: 1>, scalar_prefetch = 0 : i64, scratch_operands = 0 : i64, tpu.core_type = #tpu.core_type<tc>, window_params = [{transform_indices = @transform_0, window_bounds = array<i64: 2, 1024>}, {pipeline_mode = #tpu.pipeline_mode<synchronous>, transform_indices = @transform_1, window_bounds = array<i64: 1024, 512>}, {pipeline_mode = #tpu.pipeline_mode<synchronous>, transform_indices = @transform_2, window_bounds = array<i64: 1, 512>}, {pipeline_mode = #tpu.pipeline_mode<synchronous>, transform_indices = @transform_3, window_bounds = array<i64: 512, 256>}, {pipeline_mode = #tpu.pipeline_mode<synchronous>, transform_indices = @transform_4, window_bounds = array<i64: 1, 256>}, {pipeline_mode = #tpu.pipeline_mode<synchronous>, transform_indices = @transform_5, window_bounds = array<i64: 256, 128>}, {pipeline_mode = #tpu.pipeline_mode<synchronous>, transform_indices = @transform_6, window_bounds = array<i64: 1, 128>}, {transform_indices = @transform_7, window_bounds = array<i64: 2, 128>}]} {
    %c0 = arith.constant 0 : index
    %c0_0 = arith.constant 0 : index
    %0 = vector.load %arg1[%c0, %c0_0] : memref<2x1024xf32, #tpu.memory_space<vmem>>, vector<2x1024xf32>
    %1 = arith.truncf %0 : vector<2x1024xf32> to vector<2x1024xbf16>
    %c0_1 = arith.constant 0 : index
    %c0_2 = arith.constant 0 : index
    %2 = vector.load %arg2[%c0_1, %c0_2] : memref<1024x512xbf16, #tpu.memory_space<vmem>>, vector<1024x512xbf16>
    %cst = arith.constant dense<0.000000e+00> : vector<2x512xf32>
    %3 = tpu.matmul %1, %2, %cst {dimension_numbers = #tpu.dot_dimension_numbers<[1], [0], [0], [1], [0, 0, 1, 1], [], []>} : vector<2x1024xbf16>, vector<1024x512xbf16>, vector<2x512xf32> -> vector<2x512xf32>
    %c0_3 = arith.constant 0 : index
    %c0_4 = arith.constant 0 : index
    %4 = vector.load %arg3[%c0_3, %c0_4] : memref<1x512xf32, #tpu.memory_space<vmem>>, vector<1x512xf32>
    %5 = vector.broadcast %4 : vector<1x512xf32> to vector<2x512xf32>
    %6 = arith.addf %3, %5 : vector<2x512xf32>
    %cst_5 = arith.constant 0.000000e+00 : f32
    %7 = vector.broadcast %cst_5 : f32 to vector<2x512xf32>
    %8 = arith.maximumf %6, %7 : vector<2x512xf32>
    %9 = arith.truncf %8 : vector<2x512xf32> to vector<2x512xbf16>
    %c0_6 = arith.constant 0 : index
    %c0_7 = arith.constant 0 : index
    %10 = vector.load %arg4[%c0_6, %c0_7] : memref<512x256xbf16, #tpu.memory_space<vmem>>, vector<512x256xbf16>
    %cst_8 = arith.constant dense<0.000000e+00> : vector<2x256xf32>
    %11 = tpu.matmul %9, %10, %cst_8 {dimension_numbers = #tpu.dot_dimension_numbers<[1], [0], [0], [1], [0, 0, 1, 1], [], []>} : vector<2x512xbf16>, vector<512x256xbf16>, vector<2x256xf32> -> vector<2x256xf32>
    %c0_9 = arith.constant 0 : index
    %c0_10 = arith.constant 0 : index
    %12 = vector.load %arg5[%c0_9, %c0_10] : memref<1x256xf32, #tpu.memory_space<vmem>>, vector<1x256xf32>
    %13 = vector.broadcast %12 : vector<1x256xf32> to vector<2x256xf32>
    %14 = arith.addf %11, %13 : vector<2x256xf32>
    %cst_11 = arith.constant 0.000000e+00 : f32
    %15 = vector.broadcast %cst_11 : f32 to vector<2x256xf32>
    %16 = arith.maximumf %14, %15 : vector<2x256xf32>
    %17 = arith.truncf %16 : vector<2x256xf32> to vector<2x256xbf16>
    %c0_12 = arith.constant 0 : index
    %c0_13 = arith.constant 0 : index
    %18 = vector.load %arg6[%c0_12, %c0_13] : memref<256x128xbf16, #tpu.memory_space<vmem>>, vector<256x128xbf16>
    %cst_14 = arith.constant dense<0.000000e+00> : vector<2x128xf32>
    %19 = tpu.matmul %17, %18, %cst_14 {dimension_numbers = #tpu.dot_dimension_numbers<[1], [0], [0], [1], [0, 0, 1, 1], [], []>} : vector<2x256xbf16>, vector<256x128xbf16>, vector<2x128xf32> -> vector<2x128xf32>
    %c0_15 = arith.constant 0 : index
    %c0_16 = arith.constant 0 : index
    %20 = vector.load %arg7[%c0_15, %c0_16] : memref<1x128xf32, #tpu.memory_space<vmem>>, vector<1x128xf32>
    %21 = vector.broadcast %20 : vector<1x128xf32> to vector<2x128xf32>
    %22 = arith.addf %19, %21 : vector<2x128xf32>
    %cst_17 = arith.constant dense<0xFF800000> : vector<2xf32>
    %23 = vector.multi_reduction <maximumf>, %22, %cst_17 [1] : vector<2x128xf32> to vector<2xf32>
    %24 = vector.shape_cast %23 : vector<2xf32> to vector<2x1xf32>
    %25 = vector.broadcast %24 : vector<2x1xf32> to vector<2x128xf32>
    %26 = arith.subf %22, %25 : vector<2x128xf32>
    %27 = math.exp %26 : vector<2x128xf32>
    %cst_18 = arith.constant dense<0.000000e+00> : vector<2xf32>
    %28 = vector.multi_reduction <add>, %27, %cst_18 [1] : vector<2x128xf32> to vector<2xf32>
    %29 = vector.shape_cast %28 : vector<2xf32> to vector<2x1xf32>
    %30 = math.log %29 : vector<2x1xf32>
    %31 = vector.broadcast %30 : vector<2x1xf32> to vector<2x128xf32>
    %32 = arith.subf %26, %31 : vector<2x128xf32>
    %c0_19 = arith.constant 0 : index
    %c0_20 = arith.constant 0 : index
    %33 = vector.load %arg8[%c0_19, %c0_20] : memref<2x128xf32, #tpu.memory_space<vmem>>, vector<2x128xf32>
    tpu.vector_store %arg8[%c0_19, %c0_20], %32 {strides = array<i32>} : memref<2x128xf32, #tpu.memory_space<vmem>>, vector<2x128xf32>,
    return
  }
  func.func @transform_0(%arg0: i32) -> (i32, i32) {
    %c0_i32 = arith.constant 0 : i32
    %c0_i32_0 = arith.constant 0 : i32
    return %arg0, %c0_i32 : i32, i32
  }
  func.func @transform_1(%arg0: i32) -> (i32, i32) {
    %c0_i32 = arith.constant 0 : i32
    %c0_i32_0 = arith.constant 0 : i32
    %c0_i32_1 = arith.constant 0 : i32
    return %c0_i32, %c0_i32_0 : i32, i32
  }
  func.func @transform_2(%arg0: i32) -> (i32, i32) {
    %c0_i32 = arith.constant 0 : i32
    %c0_i32_0 = arith.constant 0 : i32
    %c0_i32_1 = arith.constant 0 : i32
    return %c0_i32, %c0_i32_0 : i32, i32
  }
  func.func @transform_3(%arg0: i32) -> (i32, i32) {
    %c0_i32 = arith.constant 0 : i32
    %c0_i32_0 = arith.constant 0 : i32
    %c0_i32_1 = arith.constant 0 : i32
    return %c0_i32, %c0_i32_0 : i32, i32
  }
  func.func @transform_4(%arg0: i32) -> (i32, i32) {
    %c0_i32 = arith.constant 0 : i32
    %c0_i32_0 = arith.constant 0 : i32
    %c0_i32_1 = arith.constant 0 : i32
    return %c0_i32, %c0_i32_0 : i32, i32
  }
  func.func @transform_5(%arg0: i32) -> (i32, i32) {
    %c0_i32 = arith.constant 0 : i32
    %c0_i32_0 = arith.constant 0 : i32
    %c0_i32_1 = arith.constant 0 : i32
    return %c0_i32, %c0_i32_0 : i32, i32
  }
  func.func @transform_6(%arg0: i32) -> (i32, i32) {
    %c0_i32 = arith.constant 0 : i32
    %c0_i32_0 = arith.constant 0 : i32
    %c0_i32_1 = arith.constant 0 : i32
    return %c0_i32, %c0_i32_0 : i32, i32
  }
  func.func @transform_7(%arg0: i32) -> (i32, i32) {
    %c0_i32 = arith.constant 0 : i32
    %c0_i32_0 = arith.constant 0 : i32
    return %arg0, %c0_i32 : i32, i32
  }
}

</mosaic_0001>

<bundles_post_ra>
// kernel: _lambda_.4
= control target key start
LH: loop header
LB: loop body
LE: loop exit
PB: predicated region body
PF: predicated region fallthrough
CT: control target
= control target key end

     0   :  { %s1839_s24 = smov 0   ;;  %s1841_s25 = smov 0   ;;  %s2179_s0 = inlined_call_operand.vmem [shape: bf16[2,64,8], index: 0, kind: input, shape index: {}]   ;;  %s2180_s1 = inlined_call_operand.vmem [shape: bf16[8,64], index: 1, kind: input, shape index: {}]   ;;  %s2181_s2 = inlined_call_operand.vmem [shape: f32[1,64], index: 2, kind: input, shape index: {}]   ;;  %s2182_s3 = inlined_call_operand.vmem [shape: bf16[64,128], index: 3, kind: input, shape index: {}]   ;;  %s2183_s4 = inlined_call_operand.vmem [shape: f32[1,128], index: 4, kind: input, shape index: {}]   ;;  %s2184_s5 = inlined_call_operand.vmem [shape: bf16[128,1024], index: 5, kind: input, shape index: {}]   ;;  %s2185_s6 = inlined_call_operand.vmem [shape: f32[1,1024], index: 6, kind: input, shape index: {}]   ;;  %s2186_s7 = inlined_call_operand.vmem [shape: f32[2,1,1024], index: 7, kind: output, shape index: {}]  }
   0x1   :  { %s1843_s26 = smov 0  }
   0x2 LB: > { %s36_s27 = sadd.s32 1, %s1791_s25  ;;  %p1610_p0 = scmp.ge.s32.totalorder %s1795_s26, 1  ;;  %s1795_s26 = sphi %s1843_s26, %s17_s26   ;;  %s1791_s25 = sphi %s1841_s25, %s2188_s25   ;;  %s1787_s24 = sphi %s1839_s24, %s2187_s24  }
   0x3   : > { %p38_p1 = scmp.ge.s32.totalorder %s36_s27, 2  ;;  %p269_p2 = scmp.lt.s32.totalorder %s1795_s26, 3 }
   0x5   : > { %s2190_s27 = smov (%p38_p1, %s36_s27), 0  ;;  %p270_p3 = pnand %p1610_p0, %p269_p2 }
   0x6   : > { %v333_v0 = vld [vmem:[%s2180_s1] sm:$0xf] (!%p270_p3)  ;;  %vm374_vm0 = vcmask (!%p270_p3), 1043456   ;;  %p308_p4 = scmp.lt.s32.totalorder (!%p270_p3), %s1787_s24, 1  ;;  %v1770_v3 = vld [vmem:[%s2182_s3 + $0x8] sm:$0xff] (!%p270_p3)   ;;  %vm361_vm1 = vcmask (!%p270_p3), 64512  }
   0x7   : > { %273 = sbr.rel (%p270_p3) target bundleno = 762 (0x2fa), region = 48  ;;  %v1769_v1 = vld [vmem:[%s2182_s3] sm:$0xff] (!%p270_p3)   ;;  %1738 = vmatprep.subr.msk.bf16.mxu0 (!%p270_p3), %vm374_vm0, %v333_v0  ;;  %v376_v2 = vsel (!%p270_p3), %vm374_vm0, %v333_v0, 0  ;;  %v1771_v8 = vld [vmem:[%s2182_s3 + $0x10] sm:$0xff] (!%p270_p3)   ;;  %v1772_v9 = vld [vmem:[%s2182_s3 + $0x18] sm:$0xff] (!%p270_p3)   ;;  %vm494_vm2 = vcmask (!%p270_p3), 523264  }
   0x8   : > { %1713 = vmatpush3.bf16.msra.mxu0 (!%p270_p3), %v376_v2  ;;  %1722 = vmatprep.subr.bf16.mxu1 (!%p270_p3), %v1769_v1  ;;  %v584_v10 = vld [vmem:[%s2184_s5] sm:$0xff] (!%p270_p3)  ;;  %v1887_v12 = vld [vmem:[%s2184_s5 + $0x8] sm:$0xff] (!%p270_p3) }
   0x9   : > { %1723 = vmatpush3.bf16.msra.mxu1 (!%p270_p3), %v1769_v1  ;;  %v588_v11 = vld [vmem:[%s2184_s5 + $0x20] sm:$0xff] (!%p270_p3)  ;;  %v1892_v15 = vld [vmem:[%s2184_s5 + $0x28] sm:$0xff] (!%p270_p3) }
   0xa   : > { %1724 = vmatprep.subr.bf16.mxu1 (!%p270_p3), %v1770_v3  ;;  %v1632_v13 = vcombine.low (!%p270_p3), %v584_v10, %v588_v11  ;;  %v1633_v14 = vcombine.high (!%p270_p3), %v584_v10, %v588_v11  ;;  %v592_v16 = vld [vmem:[%s2184_s5 + $0x40] sm:$0xff] (!%p270_p3)  ;;  %v1634_v18 = vcombine.low (!%p270_p3), %v1887_v12, %v1892_v15  ;;  %v1635_v19 = vcombine.high (!%p270_p3), %v1887_v12, %v1892_v15  ;;  %v593_v51 = vld [vmem:[%s2184_s5 + $0x48] sm:$0xff] (!%p270_p3) }
   0xb   : > { %v596_v17 = vld [vmem:[%s2184_s5 + $0x60] sm:$0xff] (!%p270_p3)  ;;  %v597_v52 = vld [vmem:[%s2184_s5 + $0x68] sm:$0xff] (!%p270_p3) }
   0xc   : > { %v1641_v20 = vcombine.high (!%p270_p3), %v592_v16, %v596_v17  ;;  %v600_v21 = vld [vmem:[%s2184_s5 + $0x80] sm:$0xff] (!%p270_p3)  ;;  %968 = vmatprep.subr.bf16.mxu0 (!%p270_p3), %v1633_v14  ;;  %v1640_v23 = vcombine.low (!%p270_p3), %v592_v16, %v596_v17  ;;  %v1643_v58 = vcombine.high (!%p270_p3), %v593_v51, %v597_v52  ;;  %v601_v61 = vld [vmem:[%s2184_s5 + $0x88] sm:$0xff] (!%p270_p3) }
   0xd   : > { %1725 = vmatpush3.bf16.msra.mxu1 (!%p270_p3), %v1770_v3  ;;  %v604_v22 = vld [vmem:[%s2184_s5 + $0xa0] sm:$0xff] (!%p270_p3)  ;;  %v605_v62 = vld [vmem:[%s2184_s5 + $0xa8] sm:$0xff] (!%p270_p3) }
   0xe   : > { %s2192_s24 = smov (!%p308_p4, %s1787_s24), 1  ;;  %1726 = vmatprep.subr.bf16.mxu1 %v1771_v8  ;;  %v1649_v24 = vcombine.high %v600_v21, %v604_v22  ;;  %v608_v25 = vld [vmem:[%s2184_s5 + $0xc0] sm:$0xff]  ;;  %v1648_v27 = vcombine.low %v600_v21, %v604_v22  ;;  %v617_v14 = vld [vmem:[%s2184_s5 + $0x108] sm:$0xff] }
   0xf   : > { %s1698_s11 = sshll.u32 %s2192_s24, 5  ;;  %v612_v26 = vld [vmem:[%s2184_s5 + $0xe0] sm:$0xff]  ;;  %v621_v15 = vld [vmem:[%s2184_s5 + $0x128] sm:$0xff]  ;;  %s1613_s20 = sshll.u32 %s2192_s24, 3 }
  0x10   : > { %s315_s14 = scalar_lea.vmem %s2179_s0, %s1698_s11  ;;  %v1657_v28 = vcombine.high %v608_v25, %v612_v26  ;;  %v616_v29 = vld [vmem:[%s2184_s5 + $0x100] sm:$0xff]  ;;  %v1656_v31 = vcombine.low %v608_v25, %v612_v26  ;;  %v1667_v17 = vcombine.high %v617_v14, %v621_v15  ;;  %v633_v25 = vld [vmem:[%s2184_s5 + $0x188] sm:$0xff]  ;;  %s322_s23 = scalar_lea.vmem %s2186_s7, %s1613_s20 }
  0x11   : > { %v1765_v4 = vld [vmem:[%s315_s14] sm:$0xff]   ;;  %v1766_v5 = vld [vmem:[%s315_s14 + $0x8] sm:$0xff]   ;;  %v1767_v6 = vld [vmem:[%s315_s14 + $0x10] sm:$0xff]   ;;  %1727 = vmatpush3.bf16.msra.mxu1 %v1771_v8 }
  0x12   : > { %1714 = vmatprep.mubr.msk.bf16.mxu0 %vm361_vm1, %v1765_v4  ;;  %v1768_v7 = vld [vmem:[%s315_s14 + $0x18] sm:$0xff]   ;;  %1728 = vmatprep.subr.bf16.mxu1 %v1772_v9  ;;  %v620_v30 = vld [vmem:[%s2184_s5 + $0x120] sm:$0xff]  ;;  %v1642_v4 = vcombine.low %v593_v51, %v597_v52  ;;  %v609_v8 = vld [vmem:[%s2184_s5 + $0xc8] sm:$0xff] }
  0x13   : > { %1715 = vmatmul.mubr.msk.bf16.vlgmr.msra.gmra.mrb[0].mxu0 %vm361_vm1, %v1766_v5  ;;  %v1665_v32 = vcombine.high %v616_v29, %v620_v30  ;;  %v624_v33 = vld [vmem:[%s2184_s5 + $0x140] sm:$0xff]  ;;  %v1664_v35 = vcombine.low %v616_v29, %v620_v30 }
  0x14   : > { %1718 = vmatprep.mubr.msk.bf16.mxu0 %vm361_vm1, %v1767_v6  ;;  %969 = vmatpush1.bf16.msra.mxu0 %v1632_v13  ;;  %v628_v34 = vld [vmem:[%s2184_s5 + $0x160] sm:$0xff]  ;;  %v1651_v6 = vcombine.high %v601_v61, %v605_v62  ;;  %v1650_v13 = vcombine.low %v601_v61, %v605_v62  ;;  %v595_v61 = vld [vmem:[%s2184_s5 + $0x58] sm:$0xff] }
  0x15   : > { %1729 = vmatpush3.bf16.msra.mxu1 %v1772_v9  ;;  %970 = vmatprep.subr.bf16.mxu0 %v1641_v20  ;;  %v1673_v36 = vcombine.high %v624_v33, %v628_v34  ;;  %v1672_v37 = vcombine.low %v624_v33, %v628_v34  ;;  %v1614_v38 = vld [vmem:[%s2181_s2] ss:$0 sm:$0xff]  ;;  %v613_v9 = vld [vmem:[%s2184_s5 + $0xe8] sm:$0xff]  ;;  %v1666_v20 = vcombine.low %v617_v14, %v621_v15  ;;  %v599_v62 = vld [vmem:[%s2184_s5 + $0x78] sm:$0xff] }
  0x16   : > { %1041 = vmatprep.subr.bf16.mxu1 %v1635_v19  ;;  %v1659_v12 = vcombine.high %v609_v8, %v613_v9  ;;  %v1658_v16 = vcombine.low %v609_v8, %v613_v9  ;;  %v629_v19 = vld [vmem:[%s2184_s5 + $0x168] sm:$0xff]  ;;  %v606_v9 = vld [vmem:[%s2184_s5 + $0xb0] sm:$0xff] }
  0x17   : > { %v641_v33 = vld [vmem:[%s2184_s5 + $0x1c8] sm:$0xff] }
  0x18   : > { %971 = vmatpush1.bf16.msra.mxu0 %v1640_v23  ;;  %v632_v23 = vld [vmem:[%s2184_s5 + $0x180] sm:$0xff] }
  0x19   : > { %972 = vmatprep.subr.bf16.mxu0 %v1649_v24  ;;  %v636_v24 = vld [vmem:[%s2184_s5 + $0x1a0] sm:$0xff] }
  0x1a   : > { %v1681_v26 = vcombine.high %v632_v23, %v636_v24 }
  0x1b   : > { %1719 = vmatmul.mubr.msk.bf16.gmra.mrb[4].mxu0 %vm361_vm1, %v1768_v7 }
  0x1c   : > { %973 = vmatpush1.bf16.msra.mxu0 %v1648_v27  ;;  %v637_v27 = vld [vmem:[%s2184_s5 + $0x1a8] sm:$0xff] }
  0x1d   : > { %974 = vmatprep.subr.bf16.mxu0 %v1657_v28  ;;  %v1680_v28 = vcombine.low %v632_v23, %v636_v24  ;;  %v1682_v29 = vcombine.low %v633_v25, %v637_v27  ;;  %v1683_v30 = vcombine.high %v633_v25, %v637_v27  ;;  %v610_v23 = vld [vmem:[%s2184_s5 + $0xd0] sm:$0xff]  ;;  %v615_v27 = vld [vmem:[%s2184_s5 + $0xf8] sm:$0xff] }
  0x1e   : > { %v614_v25 = vld [vmem:[%s2184_s5 + $0xf0] sm:$0xff] }
  0x20   : > { %975 = vmatpush1.bf16.msra.mxu0 %v1656_v31  ;;  %v640_v31 = vld [vmem:[%s2184_s5 + $0x1c0] sm:$0xff] }
  0x21   : > { %976 = vmatprep.subr.bf16.mxu0 %v1665_v32  ;;  %v644_v32 = vld [vmem:[%s2184_s5 + $0x1e0] sm:$0xff] }
  0x22   : > { %v1689_v34 = vcombine.high %v640_v31, %v644_v32 }
  0x24   : > { %977 = vmatpush1.bf16.msra.mxu0 %v1664_v35  ;;  %v645_v35 = vld [vmem:[%s2184_s5 + $0x1e8] sm:$0xff] }
  0x25   : > { %978 = vmatprep.subr.bf16.mxu0 %v1673_v36  ;;  %v1688_v36 = vcombine.low %v640_v31, %v644_v32 }
  0x28   : > { %979 = vmatpush1.bf16.msra.mxu0 %v1672_v37  ;;  %v1690_v37 = vcombine.low %v641_v33, %v645_v35 }
  0x29   : > { %980 = vmatprep.subr.bf16.mxu0 %v1681_v26  ;;  %v611_v26 = vld [vmem:[%s2184_s5 + $0xd8] sm:$0xff] }
  0x2c   : > { %981 = vmatpush1.bf16.msra.mxu0 %v1680_v28 }
  0x2d   : > { %982 = vmatprep.subr.bf16.mxu0 %v1689_v34  ;;  %v1663_v34 = vcombine.high %v611_v26, %v615_v27 }
  0x30   : > { %983 = vmatpush1.bf16.msra.mxu0 %v1688_v36  ;;  %v622_v36 = vld [vmem:[%s2184_s5 + $0x130] sm:$0xff] }
  0xe6   : > { %v1716_v39 = vpop.f32.mrb[0].mxu0 }
  0xe7   : > { %v421_v40 = vadd.f32 %v1716_v39, %v1614_v38  ;;  %v412_v41 = vpop.f32.mrb[1].mxu0  ;;  %v586_v39 = vld [vmem:[%s2184_s5 + $0x10] sm:$0xff] }
  0xe8   : > { %v413_v42 = vadd.f32 %v1614_v38, %v412_v41  ;;  %v1717_v43 = vpop.f32.mrb[2].mxu0  ;;  %v587_v41 = vld [vmem:[%s2184_s5 + $0x18] sm:$0xff] }
  0xe9   : > { %v424_v44 = vadd.f32 %v1717_v43, %v1614_v38  ;;  %v415_v45 = vpop.f32.mrb[3].mxu0  ;;  %v445_v47 = vmax.f32 %v421_v40, 0.0  ;;  %v590_v40 = vld [vmem:[%s2184_s5 + $0x30] sm:$0xff]  ;;  %v591_v43 = vld [vmem:[%s2184_s5 + $0x38] sm:$0xff] }
  0xea   : > { %v416_v46 = vadd.f32 %v1614_v38, %v415_v45  ;;  %v443_v49 = vmax.f32 %v413_v42, 0.0  ;;  %v1637_v42 = vcombine.high %v586_v39, %v590_v40  ;;  %v1636_v45 = vcombine.low %v586_v39, %v590_v40 }
  0xeb   : > { %v446_v48 = vmax.f32 %v424_v44, 0.0  ;;  %v1797_v44 = vmov 0   ;;  %v1660_v39 = vcombine.low %v610_v23, %v614_v25  ;;  %v1662_v40 = vcombine.low %v611_v26, %v615_v27 }
  0xec   : > { %v444_v50 = vmax.f32 %v416_v46, 0.0  ;;  %1000 = vmatprep.mubr.bf16.mxu0 %v1797_v44  ;;  %v1638_v46 = vcombine.low %v587_v41, %v591_v43  ;;  %1114 = vmatprep.subr.bf16.mxu0 %v1637_v42 }
  0xed   : > { %v452_v53 = vpack.c.bf16 %v446_v48, %v445_v47  ;;  %v1639_v47 = vcombine.high %v587_v41, %v591_v43  ;;  %v1623_v48 = vld [vmem:[%s2183_s4] ss:$0 sm:$0xff]  ;;  %v626_v43 = vld [vmem:[%s2184_s5 + $0x150] sm:$0xff] }
  0xee   : > { %v1720_v54 = vpop.f32.mrb[4].mxu0  ;;  %v451_v55 = vpack.c.bf16 %v444_v50, %v443_v49 }
  0xef   : > { %v437_v56 = vadd.f32 %v1720_v54, %v1614_v38  ;;  %v428_v57 = vpop.f32.mrb[5].mxu0 }
  0xf0   : > { %v429_v59 = vadd.f32 %v1614_v38, %v428_v57  ;;  %1730 = vmatprep.mubr.msk.bf16.mxu1 %vm494_vm2, %v451_v55  ;;  %v1721_v60 = vpop.f32.mrb[6].mxu0  ;;  %v594_v57 = vld [vmem:[%s2184_s5 + $0x50] sm:$0xff] }
  0xf1   : > { %v449_v63 = vmax.f32 %v437_v56, 0.0  ;;  %v440_v0 = vadd.f32 %v1721_v60, %v1614_v38  ;;  %1731 = vmatmul.mubr.msk.bf16.vlgmr.msra.gmra.mrb[0].mxu1 %vm494_vm2, %v452_v53  ;;  %v431_v1 = vpop.f32.mrb[7].mxu0  ;;  %v598_v60 = vld [vmem:[%s2184_s5 + $0x70] sm:$0xff] }
  0xf2   : > { %v447_v2 = vmax.f32 %v429_v59, 0.0  ;;  %v432_v3 = vadd.f32 %v1614_v38, %v431_v1  ;;  %1042 = vmatpush1.bf16.msra.mxu1 %v1634_v18  ;;  %v625_v18 = vld [vmem:[%s2184_s5 + $0x148] sm:$0xff]  ;;  %v1691_v38 = vcombine.high %v641_v33, %v645_v35  ;;  %v1661_v33 = vcombine.high %v610_v23, %v614_v25  ;;  %v618_v35 = vld [vmem:[%s2184_s5 + $0x110] sm:$0xff] }
  0xf3   : > { %v450_v5 = vmax.f32 %v440_v0, 0.0  ;;  %1043 = vmatprep.subr.bf16.mxu1 %v1643_v58  ;;  %v1675_v21 = vcombine.high %v625_v18, %v629_v19  ;;  %v1674_v22 = vcombine.low %v625_v18, %v629_v19  ;;  %v1646_v18 = vcombine.low %v595_v61, %v599_v62 }
  0xf4   : > { %v448_v7 = vmax.f32 %v432_v3, 0.0  ;;  %v1669_v41 = vcombine.high %v618_v35, %v622_v36 }
  0xf5   : > { %v454_v10 = vpack.c.bf16 %v450_v5, %v449_v63  ;;  %v1647_v5 = vcombine.high %v595_v61, %v599_v62  ;;  %v646_v61 = vld [vmem:[%s2184_s5 + $0x1f0] sm:$0xff]  ;;  %v643_v62 = vld [vmem:[%s2184_s5 + $0x1d8] sm:$0xff] }
  0xf6   : > { %v453_v11 = vpack.c.bf16 %v448_v7, %v447_v2  ;;  %1044 = vmatpush1.bf16.msra.mxu1 %v1642_v4  ;;  %v1645_v4 = vcombine.high %v594_v57, %v598_v60 }
  0xf7   : > { %1045 = vmatprep.subr.bf16.mxu1 %v1651_v6  ;;  %v602_v6 = vld [vmem:[%s2184_s5 + $0x90] sm:$0xff] }
  0xf8   : > { %1734 = vmatprep.mubr.msk.bf16.mxu1 %vm494_vm2, %v453_v11  ;;  %v607_v11 = vld [vmem:[%s2184_s5 + $0xb8] sm:$0xff] }
  0xf9   : > { %1735 = vmatmul.mubr.msk.bf16.gmra.mrb[4].mxu1 %vm494_vm2, %v454_v10  ;;  %v603_v10 = vld [vmem:[%s2184_s5 + $0x98] sm:$0xff] }
  0xfa   : > { %1046 = vmatpush1.bf16.msra.mxu1 %v1650_v13  ;;  %1073 = vmatprep.mubr.bf16.mxu1 %v1797_v44  ;;  %v1654_v31 = vcombine.low %v603_v10, %v607_v11 }
  0xfb   : > { %1047 = vmatprep.subr.bf16.mxu1 %v1659_v12 }
  0xfe   : > { %1048 = vmatpush1.bf16.msra.mxu1 %v1658_v16 }
  0xff   : > { %1049 = vmatprep.subr.bf16.mxu1 %v1667_v17  ;;  %v1644_v17 = vcombine.low %v594_v57, %v598_v60  ;;  %v642_v60 = vld [vmem:[%s2184_s5 + $0x1d0] sm:$0xff] }
 0x102   : > { %1050 = vmatpush1.bf16.msra.mxu1 %v1666_v20 }
 0x103   : > { %1051 = vmatprep.subr.bf16.mxu1 %v1675_v21  ;;  %v1653_v21 = vcombine.high %v602_v6, %v606_v9 }
 0x106   : > { %1052 = vmatpush1.bf16.msra.mxu1 %v1674_v22  ;;  %v1655_v22 = vcombine.high %v603_v10, %v607_v11 }
 0x107   : > { %1053 = vmatprep.subr.bf16.mxu1 %v1683_v30  ;;  %v1652_v30 = vcombine.low %v602_v6, %v606_v9  ;;  %v1692_v6 = vcombine.low %v642_v60, %v646_v61 }
 0x10a   : > { %1054 = vmatpush1.bf16.msra.mxu1 %v1682_v29 }
 0x10b   : > { %1055 = vmatprep.subr.bf16.mxu1 %v1691_v38  ;;  %v623_v38 = vld [vmem:[%s2184_s5 + $0x138] sm:$0xff] }
 0x10e   : > { %1056 = vmatpush1.bf16.msra.mxu1 %v1690_v37  ;;  %v619_v37 = vld [vmem:[%s2184_s5 + $0x118] sm:$0xff] }
 0x10f   : > { %1187 = vmatprep.subr.bf16.mxu1 %v1639_v47  ;;  %v1671_v42 = vcombine.high %v619_v37, %v623_v38  ;;  %v631_v47 = vld [vmem:[%s2184_s5 + $0x178] sm:$0xff] }
 0x1c4   : > { %v1732_v49 = vpop.f32.mrb[0].mxu1 }
 0x1c5   : > { %v550_v50 = vadd.f32 %v1732_v49, %v1623_v48  ;;  %v541_v51 = vpop.f32.mrb[1].mxu1  ;;  %v1670_v49 = vcombine.low %v619_v37, %v623_v38 }
 0x1c6   : > { %v542_v52 = vadd.f32 %v1623_v48, %v541_v51  ;;  %v1733_v53 = vpop.f32.mrb[2].mxu1 }
 0x1c7   : > { %v553_v54 = vadd.f32 %v1733_v53, %v1623_v48  ;;  %v544_v55 = vpop.f32.mrb[3].mxu1  ;;  %v574_v58 = vmax.f32 %v550_v50, 0.0  ;;  %v638_v53 = vld [vmem:[%s2184_s5 + $0x1b0] sm:$0xff] }
 0x1c8   : > { %v545_v56 = vadd.f32 %v1623_v48, %v544_v55  ;;  %v572_v63 = vmax.f32 %v542_v52, 0.0  ;;  %v634_v52 = vld [vmem:[%s2184_s5 + $0x190] sm:$0xff]  ;;  %v639_v55 = vld [vmem:[%s2184_s5 + $0x1b8] sm:$0xff] }
 0x1c9   : > { %v575_v59 = vmax.f32 %v553_v54, 0.0  ;;  %v635_v54 = vld [vmem:[%s2184_s5 + $0x198] sm:$0xff] }
 0x1ca   : > { %v573_v0 = vmax.f32 %v545_v56, 0.0 }
 0x1cb   : > { %v2021_v1 = vpack.c.bf16 %v575_v59, %v574_v58  ;;  %v1685_v58 = vcombine.high %v634_v52, %v638_v53  ;;  %v1687_v59 = vcombine.high %v635_v54, %v639_v55 }
 0x1cc   : > { %v2023_v2 = vpack.c.bf16 %v573_v0, %v572_v63  ;;  %v1736_v3 = vpop.f32.mrb[4].mxu1  ;;  %v647_v63 = vld [vmem:[%s2184_s5 + $0x1f8] sm:$0xff]  ;;  %v1684_v0 = vcombine.low %v634_v52, %v638_v53  ;;  %v1417_v52 = vlaneseq }
 0x1cd   : > { %v566_v7 = vadd.f32 %v1736_v3, %v1623_v48  ;;  %v557_v8 = vpop.f32.mrb[5].mxu1  ;;  %v1686_v3 = vcombine.low %v635_v54, %v639_v55 }
 0x1ce   : > { %v558_v13 = vadd.f32 %v1623_v48, %v557_v8  ;;  %1001 = vmatmul.mubr.bf16.vlgmr.msra.gmra.mrb[8].mxu0 %v2023_v2  ;;  %1074 = vmatmul.mubr.bf16.vlgmr.msra.gmra.mrb[8].mxu1 %v2023_v2  ;;  %v1737_v12 = vpop.f32.mrb[6].mxu1 }
 0x1cf   : > { %v578_v14 = vmax.f32 %v566_v7, 0.0  ;;  %1115 = vmatpush1.bf16.msra.mxu0 %v1636_v45  ;;  %1188 = vmatpush1.bf16.msra.mxu1 %v1638_v46  ;;  %v569_v15 = vadd.f32 %v1737_v12, %v1623_v48  ;;  %v560_v16 = vpop.f32.mrb[7].mxu1  ;;  %v630_v45 = vld [vmem:[%s2184_s5 + $0x170] sm:$0xff]  ;;  %v627_v46 = vld [vmem:[%s2184_s5 + $0x158] sm:$0xff]  ;;  %v1694_v7 = vcombine.low %v643_v62, %v647_v63 }
 0x1d0   : > { %v576_v19 = vmax.f32 %v558_v13, 0.0  ;;  %v561_v20 = vadd.f32 %v1623_v48, %v560_v16  ;;  %1116 = vmatprep.subr.bf16.mxu0 %v1645_v4  ;;  %1189 = vmatprep.subr.bf16.mxu1 %v1647_v5  ;;  %v1668_v48 = vcombine.low %v618_v35, %v622_v36  ;;  %v1677_v50 = vcombine.high %v626_v43, %v630_v45 }
 0x1d1   : > { %v579_v24 = vmax.f32 %v569_v15, 0.0  ;;  %1010 = vmatprep.mubr.bf16.mxu0 %v1797_v44  ;;  %1083 = vmatprep.mubr.bf16.mxu1 %v1797_v44  ;;  %v1679_v51 = vcombine.high %v627_v46, %v631_v47  ;;  %v1676_v56 = vcombine.low %v626_v43, %v630_v45  ;;  %v1678_v57 = vcombine.low %v627_v46, %v631_v47 }
 0x1d2   : > { %v577_v28 = vmax.f32 %v561_v20, 0.0  ;;  %v1693_v4 = vcombine.high %v642_v60, %v646_v61  ;;  %v1695_v5 = vcombine.high %v643_v62, %v647_v63 }
 0x1d3   : > { %v2053_v29 = vpack.c.bf16 %v579_v24, %v578_v14  ;;  %1117 = vmatpush1.bf16.msra.mxu0 %v1644_v17  ;;  %1190 = vmatpush1.bf16.msra.mxu1 %v1646_v18 }
 0x1d4   : > { %v2055_v32 = vpack.c.bf16 %v577_v28, %v576_v19  ;;  %1118 = vmatprep.subr.bf16.mxu0 %v1653_v21  ;;  %1191 = vmatprep.subr.bf16.mxu1 %v1655_v22 }
 0x1d6   : > { %1011 = vmatmul.mubr.bf16.gmra.mrb[12].mxu0 %v2021_v1  ;;  %1084 = vmatmul.mubr.bf16.gmra.mrb[12].mxu1 %v2021_v1 }
 0x1d7   : > { %1119 = vmatpush1.bf16.msra.mxu0 %v1652_v30  ;;  %1192 = vmatpush1.bf16.msra.mxu1 %v1654_v31 }
 0x1d8   : > { %1120 = vmatprep.subr.bf16.mxu0 %v1661_v33  ;;  %1193 = vmatprep.subr.bf16.mxu1 %v1663_v34 }
 0x1d9   : > { %1020 = vmatprep.mubr.bf16.mxu0 %v1797_v44  ;;  %1093 = vmatprep.mubr.bf16.mxu1 %v1797_v44 }
 0x1db   : > { %1121 = vmatpush1.bf16.msra.mxu0 %v1660_v39  ;;  %1194 = vmatpush1.bf16.msra.mxu1 %v1662_v40 }
 0x1dc   : > { %1122 = vmatprep.subr.bf16.mxu0 %v1669_v41  ;;  %1195 = vmatprep.subr.bf16.mxu1 %v1671_v42 }
 0x1de   : > { %1021 = vmatmul.mubr.bf16.gmra.mrb[16].mxu0 %v2055_v32  ;;  %1094 = vmatmul.mubr.bf16.gmra.mrb[16].mxu1 %v2055_v32 }
 0x1df   : > { %1123 = vmatpush1.bf16.msra.mxu0 %v1668_v48  ;;  %1196 = vmatpush1.bf16.msra.mxu1 %v1670_v49 }
 0x1e0   : > { %1124 = vmatprep.subr.bf16.mxu0 %v1677_v50  ;;  %1197 = vmatprep.subr.bf16.mxu1 %v1679_v51 }
 0x1e1   : > { %1030 = vmatprep.mubr.bf16.mxu0 %v1797_v44  ;;  %1103 = vmatprep.mubr.bf16.mxu1 %v1797_v44 }
 0x1e3   : > { %1125 = vmatpush1.bf16.msra.mxu0 %v1676_v56  ;;  %1198 = vmatpush1.bf16.msra.mxu1 %v1678_v57 }
 0x1e4   : > { %1126 = vmatprep.subr.bf16.mxu0 %v1685_v58  ;;  %1199 = vmatprep.subr.bf16.mxu1 %v1687_v59 }
 0x1e6   : > { %1031 = vmatmul.mubr.bf16.gmra.mrb[20].mxu0 %v2053_v29  ;;  %1104 = vmatmul.mubr.bf16.gmra.mrb[20].mxu1 %v2053_v29 }
 0x1e7   : > { %1127 = vmatpush1.bf16.msra.mxu0 %v1684_v0  ;;  %1200 = vmatpush1.bf16.msra.mxu1 %v1686_v3  ;;  %v2131_v3 = vshrl.u32 %v1417_v52, 7 }
 0x1e8   : > { %1128 = vmatprep.subr.bf16.mxu0 %v1693_v4  ;;  %1201 = vmatprep.subr.bf16.mxu1 %v1695_v5 }
 0x1e9   : > { %1146 = vmatprep.mubr.bf16.mxu0 %v1797_v44  ;;  %1219 = vmatprep.mubr.bf16.mxu1 %v1797_v44 }
 0x1eb   : > { %1129 = vmatpush1.bf16.msra.mxu0 %v1692_v6  ;;  %1202 = vmatpush1.bf16.msra.mxu1 %v1694_v7 }
 0x1ee   : > { %1147 = vmatmul.mubr.bf16.vlgmr.msra.gmra.mrb[24].mxu0 %v2023_v2  ;;  %1220 = vmatmul.mubr.bf16.vlgmr.msra.gmra.mrb[24].mxu1 %v2023_v2 }
 0x1ef   : > { %1156 = vmatprep.mubr.bf16.mxu0 %v1797_v44  ;;  %1229 = vmatprep.mubr.bf16.mxu1 %v1797_v44 }
 0x1f6   : > { %1157 = vmatmul.mubr.bf16.gmra.mrb[28].mxu0 %v2021_v1  ;;  %1230 = vmatmul.mubr.bf16.gmra.mrb[28].mxu1 %v2021_v1 }
 0x1f7   : > { %1166 = vmatprep.mubr.bf16.mxu0 %v1797_v44  ;;  %1239 = vmatprep.mubr.bf16.mxu1 %v1797_v44 }
 0x1fe   : > { %1167 = vmatmul.mubr.bf16.gmra.mrb[32].mxu0 %v2055_v32  ;;  %1240 = vmatmul.mubr.bf16.gmra.mrb[32].mxu1 %v2055_v32 }
 0x1ff   : > { %1176 = vmatprep.mubr.bf16.mxu0 %v1797_v44  ;;  %1249 = vmatprep.mubr.bf16.mxu1 %v1797_v44 }
 0x206   : > { %1177 = vmatmul.mubr.bf16.gmra.mrb[36].mxu0 %v2053_v29  ;;  %1250 = vmatmul.mubr.bf16.gmra.mrb[36].mxu1 %v2053_v29 }
 0x2a1   : > { %v1002_v2 = vpop.f32.mrb[8].mxu0  ;;  %v1075_v8 = vpop.f32.mrb[8].mxu1 }
 0x2a2   : > { %v1004_v9 = vpop.f32.mrb[9].mxu0  ;;  %v1077_v1 = vpop.f32.mrb[9].mxu1 }
 0x2a3   : > { %v1006_v10 = vpop.f32.mrb[10].mxu0  ;;  %v1079_v11 = vpop.f32.mrb[10].mxu1 }
 0x2a4   : > { %v1260_v13 = vmax.f32 %v1002_v2, %v1006_v10  ;;  %v1262_v12 = vmax.f32 %v1075_v8, %v1079_v11  ;;  %v1008_v14 = vpop.f32.mrb[11].mxu0  ;;  %v1081_v15 = vpop.f32.mrb[11].mxu1  ;;  %v1798_v8 = vmov 1966171168  }
 0x2a5   : > { %v1261_v16 = vmax.f32 %v1004_v9, %v1008_v14  ;;  %v1263_v17 = vmax.f32 %v1077_v1, %v1081_v15  ;;  %v1486_v9 = vunpack.c.l.s4 %v1798_v8 }
 0x2a9   : > { %v1012_v18 = vpop.f32.mrb[12].mxu0  ;;  %v1085_v19 = vpop.f32.mrb[12].mxu1 }
 0x2aa   : > { %v1268_v20 = vmax.f32 %v1260_v13, %v1012_v18  ;;  %v1270_v44 = vmax.f32 %v1262_v12, %v1085_v19  ;;  %v1014_v21 = vpop.f32.mrb[13].mxu0  ;;  %v1087_v22 = vpop.f32.mrb[13].mxu1  ;;  %v1419_v13 = vsub.s32 0, %v2131_v3  ;;  %v1427_v19 = vsub.s32 2, %v2131_v3 }
 0x2ab   : > { %v1269_v23 = vmax.f32 %v1261_v16, %v1014_v21  ;;  %v1271_v24 = vmax.f32 %v1263_v17, %v1087_v22  ;;  %v1016_v25 = vpop.f32.mrb[14].mxu0  ;;  %v1089_v26 = vpop.f32.mrb[14].mxu1  ;;  %v2139_v22 = vld [vmem:[%s2185_s6] sm:$0xff] }
 0x2ac   : > { %v1276_v27 = vmax.f32 %v1268_v20, %v1016_v25  ;;  %v1278_v28 = vmax.f32 %v1270_v44, %v1089_v26  ;;  %v1018_v29 = vpop.f32.mrb[15].mxu0  ;;  %v1091_v30 = vpop.f32.mrb[15].mxu1  ;;  %v1423_v20 = vsub.s32 1, %v2131_v3  ;;  %v1431_v26 = vsub.s32 3, %v2131_v3 }
 0x2ad   : > { %v1277_v31 = vmax.f32 %v1269_v23, %v1018_v29  ;;  %v1279_v32 = vmax.f32 %v1271_v24, %v1091_v30  ;;  %v1487_v24 = vunpack.c.0.s8 %v1486_v9 }
 0x2b1   : > { %v1022_v33 = vpop.f32.mrb[16].mxu0  ;;  %v1095_v34 = vpop.f32.mrb[16].mxu1 }
 0x2b2   : > { %v1284_v35 = vmax.f32 %v1276_v27, %v1022_v33  ;;  %v1286_v36 = vmax.f32 %v1278_v28, %v1095_v34  ;;  %v1024_v37 = vpop.f32.mrb[17].mxu0  ;;  %v1097_v38 = vpop.f32.mrb[17].mxu1 }
 0x2b3   : > { %v1285_v39 = vmax.f32 %v1277_v31, %v1024_v37  ;;  %v1287_v40 = vmax.f32 %v1279_v32, %v1097_v38  ;;  %v1026_v41 = vpop.f32.mrb[18].mxu0  ;;  %v1099_v42 = vpop.f32.mrb[18].mxu1 }
 0x2b4   : > { %v1292_v43 = vmax.f32 %v1284_v35, %v1026_v41  ;;  %v1294_v45 = vmax.f32 %v1286_v36, %v1099_v42  ;;  %v1028_v46 = vpop.f32.mrb[19].mxu0  ;;  %v1101_v47 = vpop.f32.mrb[19].mxu1  ;;  %v1428_v42 = vrot.slane %v2139_v22, %v1427_v19 }
 0x2b5   : > { %v1293_v48 = vmax.f32 %v1285_v39, %v1028_v46  ;;  %v1295_v49 = vmax.f32 %v1287_v40, %v1101_v47  ;;  %v1420_v40 = vrot.slane %v2139_v22, %v1419_v13  ;;  %v1432_v47 = vrot.slane %v2139_v22, %v1431_v26 }
 0x2b9   : > { %v1032_v50 = vpop.f32.mrb[20].mxu0  ;;  %v1105_v51 = vpop.f32.mrb[20].mxu1 }
 0x2ba   : > { %v1300_v53 = vmax.f32 %v1292_v43, %v1032_v50  ;;  %v1302_v54 = vmax.f32 %v1294_v45, %v1105_v51  ;;  %v1034_v55 = vpop.f32.mrb[21].mxu0  ;;  %v1107_v56 = vpop.f32.mrb[21].mxu1  ;;  %v1424_v45 = vrot.slane %v2139_v22, %v1423_v20  ;;  %v2147_v51 = vsub.s32 %v1487_v24, %v2131_v3 }
 0x2bb   : > { %v1301_v57 = vmax.f32 %v1293_v48, %v1034_v55  ;;  %v1303_v58 = vmax.f32 %v1295_v49, %v1107_v56  ;;  %v1036_v59 = vpop.f32.mrb[22].mxu0  ;;  %v1109_v60 = vpop.f32.mrb[22].mxu1 }
 0x2bc   : > { %v1308_v61 = vmax.f32 %v1300_v53, %v1036_v59  ;;  %v1310_v62 = vmax.f32 %v1302_v54, %v1109_v60  ;;  %v1038_v63 = vpop.f32.mrb[23].mxu0  ;;  %v1111_v0 = vpop.f32.mrb[23].mxu1 }
 0x2bd   : > { %v1309_v4 = vmax.f32 %v1301_v57, %v1038_v63  ;;  %v1311_v5 = vmax.f32 %v1303_v58, %v1111_v0 }
 0x2be   : > { %v1367_v6 = vrot.slane %v1308_v61, 4  ;;  %v1379_v7 = vrot.slane %v1310_v62, 4 }
 0x2bf   : > { %v1373_v2 = vrot.slane %v1309_v4, 4  ;;  %v1385_v1 = vrot.slane %v1311_v5, 4 }
 0x2c0   : > { %v1368_v10 = vmax.f32 %v1308_v61, %v1367_v6  ;;  %v1380_v11 = vmax.f32 %v1310_v62, %v1379_v7 }
 0x2c1   : > { %v1374_v12 = vmax.f32 %v1309_v4, %v1373_v2  ;;  %v1386_v14 = vmax.f32 %v1311_v5, %v1385_v1  ;;  %v1148_v15 = vpop.f32.mrb[24].mxu0  ;;  %v1221_v16 = vpop.f32.mrb[24].mxu1 }
 0x2c2   : > { %v1369_v17 = vrot.slane %v1368_v10, 2  ;;  %v1381_v18 = vrot.slane %v1380_v11, 2  ;;  %v1150_v44 = vpop.f32.mrb[25].mxu0  ;;  %v1223_v21 = vpop.f32.mrb[25].mxu1 }
 0x2c3   : > { %v1375_v23 = vrot.slane %v1374_v12, 2  ;;  %v1387_v25 = vrot.slane %v1386_v14, 2  ;;  %v1152_v27 = vpop.f32.mrb[26].mxu0  ;;  %v1225_v28 = vpop.f32.mrb[26].mxu1 }
 0x2c4   : > { %v1370_v29 = vmax.f32 %v1368_v10, %v1369_v17  ;;  %v1382_v30 = vmax.f32 %v1380_v11, %v1381_v18  ;;  %v1264_v31 = vmax.f32 %v1148_v15, %v1152_v27  ;;  %v1266_v32 = vmax.f32 %v1221_v16, %v1225_v28  ;;  %v1154_v33 = vpop.f32.mrb[27].mxu0  ;;  %v1227_v34 = vpop.f32.mrb[27].mxu1 }
 0x2c5   : > { %v1376_v35 = vmax.f32 %v1374_v12, %v1375_v23  ;;  %v1388_v36 = vmax.f32 %v1386_v14, %v1387_v25  ;;  %v1265_v37 = vmax.f32 %v1150_v44, %v1154_v33  ;;  %v1267_v38 = vmax.f32 %v1223_v21, %v1227_v34 }
 0x2c6   : > { %v1371_v39 = vrot.slane %v1370_v29, 1  ;;  %v1383_v41 = vrot.slane %v1382_v30, 1 }
 0x2c7   : > { %v1377_v43 = vrot.slane %v1376_v35, 1  ;;  %v1389_v46 = vrot.slane %v1388_v36, 1 }
 0x2c8   : > { %v1372_v48 = vmax.f32 %v1370_v29, %v1371_v39  ;;  %v1384_v49 = vmax.f32 %v1382_v30, %v1383_v41 }
 0x2c9   : > { %v1378_v50 = vmax.f32 %v1376_v35, %v1377_v43  ;;  %v1390_v52 = vmax.f32 %v1388_v36, %v1389_v46  ;;  %v1158_v53 = vpop.f32.mrb[28].mxu0  ;;  %v1231_v54 = vpop.f32.mrb[28].mxu1 }
 0x2ca   : > { %v1457_v55 = vadd.f32 %v1420_v40, %v1372_v48  ;;  %v1459_v56 = vadd.f32 %v1428_v42, %v1384_v49  ;;  %v1272_v57 = vmax.f32 %v1264_v31, %v1158_v53  ;;  %v1274_v58 = vmax.f32 %v1266_v32, %v1231_v54  ;;  %v1160_v59 = vpop.f32.mrb[29].mxu0  ;;  %v1233_v60 = vpop.f32.mrb[29].mxu1 }
 0x2cb   : > { %v1458_v61 = vadd.f32 %v1424_v45, %v1378_v50  ;;  %v1460_v62 = vadd.f32 %v1432_v47, %v1390_v52  ;;  %v1273_v63 = vmax.f32 %v1265_v37, %v1160_v59  ;;  %v1275_v0 = vmax.f32 %v1267_v38, %v1233_v60  ;;  %v1162_v4 = vpop.f32.mrb[30].mxu0  ;;  %v1235_v5 = vpop.f32.mrb[30].mxu1 }
 0x2cc   : > { %v1465_v6 = vmax.f32 %v1457_v55, 0.0  ;;  %v1467_v7 = vmax.f32 %v1459_v56, 0.0  ;;  %v1280_v2 = vmax.f32 %v1272_v57, %v1162_v4  ;;  %v1282_v8 = vmax.f32 %v1274_v58, %v1235_v5  ;;  %v1164_v9 = vpop.f32.mrb[31].mxu0  ;;  %v1237_v1 = vpop.f32.mrb[31].mxu1 }
 0x2cd   : > { %v1466_v10 = vmax.f32 %v1458_v61, 0.0  ;;  %v1468_v11 = vmax.f32 %v1460_v62, 0.0  ;;  %v1281_v13 = vmax.f32 %v1273_v63, %v1164_v9  ;;  %v1283_v12 = vmax.f32 %v1275_v0, %v1237_v1 }
 0x2ce   : > { %v1435_v62 = vsub.s32 4, %v2131_v3  ;;  %v1443_v0 = vsub.s32 6, %v2131_v3  ;;  %v1439_v5 = vsub.s32 5, %v2131_v3 }
 0x2cf   : > { %v1481_v14 = vcombine.low %v1465_v6, %v1466_v10  ;;  %v1482_v15 = vcombine.low %v1467_v7, %v1468_v11  ;;  %v1447_v7 = vsub.s32 7, %v2131_v3 }
 0x2d0   : > { %v1436_v11 = vrot.slane %v2139_v22, %v1435_v62 }
 0x2d1   : > { %v1491_v16 = vrot.slane %v1481_v14, %v2147_v51  ;;  %v1498_v17 = vrot.slane %v1482_v15, %v2147_v51  ;;  %v1168_v18 = vpop.f32.mrb[32].mxu0  ;;  %v1241_v19 = vpop.f32.mrb[32].mxu1  ;;  %v1440_v15 = vrot.slane %v2139_v22, %v1439_v5 }
 0x2d2   : > { %v1288_v20 = vmax.f32 %v1280_v2, %v1168_v18  ;;  %v1290_v44 = vmax.f32 %v1282_v8, %v1241_v19  ;;  %v1170_v21 = vpop.f32.mrb[33].mxu0  ;;  %v1243_v23 = vpop.f32.mrb[33].mxu1 }
 0x2d3   : > { %v2151_v24 = vcombine.low %v1491_v16, %v1498_v17  ;;  %v1289_v25 = vmax.f32 %v1281_v13, %v1170_v21  ;;  %v1291_v26 = vmax.f32 %v1283_v12, %v1243_v23  ;;  %v1172_v27 = vpop.f32.mrb[34].mxu0  ;;  %v1245_v28 = vpop.f32.mrb[34].mxu1  ;;  %v1444_v12 = vrot.slane %v2139_v22, %v1443_v0 }
 0x2d4   : > { %v1296_v29 = vmax.f32 %v1288_v20, %v1172_v27  ;;  %v1298_v30 = vmax.f32 %v1290_v44, %v1245_v28  ;;  %v1174_v31 = vpop.f32.mrb[35].mxu0  ;;  %v1247_v32 = vpop.f32.mrb[35].mxu1  ;;  %v1448_v17 = vrot.slane %v2139_v22, %v1447_v7 }
 0x2d5   : > { %v1297_v33 = vmax.f32 %v1289_v25, %v1174_v31  ;;  %v1299_v34 = vmax.f32 %v1291_v26, %v1247_v32 }
 0x2d9   : > { %v1178_v35 = vpop.f32.mrb[36].mxu0  ;;  %v1251_v36 = vpop.f32.mrb[36].mxu1 }
 0x2da   : > { %v1304_v37 = vmax.f32 %v1296_v29, %v1178_v35  ;;  %v1306_v38 = vmax.f32 %v1298_v30, %v1251_v36  ;;  %v1180_v39 = vpop.f32.mrb[37].mxu0  ;;  %v1253_v40 = vpop.f32.mrb[37].mxu1 }
 0x2db   : > { %v1305_v41 = vmax.f32 %v1297_v33, %v1180_v39  ;;  %v1307_v42 = vmax.f32 %v1299_v34, %v1253_v40  ;;  %v1182_v43 = vpop.f32.mrb[38].mxu0  ;;  %v1255_v45 = vpop.f32.mrb[38].mxu1  ;;  %v1521_v34 = vrot.slane %v2151_v24, %v2147_v51 }
 0x2dc   : > { %v1312_v46 = vmax.f32 %v1304_v37, %v1182_v43  ;;  %v1314_v47 = vmax.f32 %v1306_v38, %v1255_v45  ;;  %v1184_v48 = vpop.f32.mrb[39].mxu0  ;;  %v1257_v49 = vpop.f32.mrb[39].mxu1 }
 0x2dd   : > { %v1313_v50 = vmax.f32 %v1305_v41, %v1184_v48  ;;  %v1315_v52 = vmax.f32 %v1307_v42, %v1257_v49 }
 0x2de   : > { %v1391_v53 = vrot.slane %v1312_v46, 4  ;;  %v1403_v54 = vrot.slane %v1314_v47, 4 }
 0x2df   : > { %v1397_v55 = vrot.slane %v1313_v50, 4  ;;  %v1409_v56 = vrot.slane %v1315_v52, 4 }
 0x2e0   : > { %v1392_v57 = vmax.f32 %v1312_v46, %v1391_v53  ;;  %v1404_v58 = vmax.f32 %v1314_v47, %v1403_v54 }
 0x2e1   : > { %v1398_v59 = vmax.f32 %v1313_v50, %v1397_v55  ;;  %v1410_v60 = vmax.f32 %v1315_v52, %v1409_v56 }
 0x2e2   : > { %v1393_v61 = vrot.slane %v1392_v57, 2  ;;  %v1405_v63 = vrot.slane %v1404_v58, 2 }
 0x2e3   : > { %v1399_v4 = vrot.slane %v1398_v59, 2  ;;  %v1411_v6 = vrot.slane %v1410_v60, 2 }
 0x2e4   : > { %v1394_v2 = vmax.f32 %v1392_v57, %v1393_v61  ;;  %v1406_v8 = vmax.f32 %v1404_v58, %v1405_v63 }
 0x2e5   : > { %v1400_v9 = vmax.f32 %v1398_v59, %v1399_v4  ;;  %v1412_v1 = vmax.f32 %v1410_v60, %v1411_v6 }
 0x2e6   : > { %v1395_v10 = vrot.slane %v1394_v2, 1  ;;  %v1407_v13 = vrot.slane %v1406_v8, 1 }
 0x2e7   : > { %v1401_v14 = vrot.slane %v1400_v9, 1  ;;  %v1413_v16 = vrot.slane %v1412_v1, 1 }
 0x2e8   : > { %v1396_v18 = vmax.f32 %v1394_v2, %v1395_v10  ;;  %v1408_v19 = vmax.f32 %v1406_v8, %v1407_v13 }
 0x2e9   : > { %v1402_v3 = vmax.f32 %v1400_v9, %v1401_v14  ;;  %v1414_v20 = vmax.f32 %v1412_v1, %v1413_v16 }
 0x2ea   : > { %v1461_v44 = vadd.f32 %v1436_v11, %v1396_v18  ;;  %v1463_v21 = vadd.f32 %v1444_v12, %v1408_v19 }
 0x2eb   : > { %v1462_v23 = vadd.f32 %v1440_v15, %v1402_v3  ;;  %v1464_v25 = vadd.f32 %v1448_v17, %v1414_v20 }
 0x2ec   : > { %v1469_v26 = vmax.f32 %v1461_v44, 0.0  ;;  %v1471_v27 = vmax.f32 %v1463_v21, 0.0 }
 0x2ed   : > { %v1470_v28 = vmax.f32 %v1462_v23, 0.0  ;;  %v1472_v29 = vmax.f32 %v1464_v25, 0.0 }
 0x2ef   : > { %v1483_v30 = vcombine.low %v1469_v26, %v1470_v28  ;;  %v1484_v31 = vcombine.low %v1471_v27, %v1472_v29 }
 0x2f1   : > { %v1505_v32 = vrot.slane %v1483_v30, %v2147_v51  ;;  %v1512_v33 = vrot.slane %v1484_v31, %v2147_v51 }
 0x2f3   : > { %v1514_v22 = vcombine.low %v1505_v32, %v1512_v33 }
 0x2f5   : > { %v1528_v35 = vrot.slane %v1514_v22, %v2147_v51 }
 0x2f7   : > { %v1529_v36 = vcombine.low %v1521_v34, %v1528_v35 }
 0x2f9   : > { %1531 = vst [vmem:[%s322_s23] sm:$0xff] %v1529_v36 }
 0x2fa PF: > { %s17_s26 = sadd.s32 1, %s1795_s26   ;;  %s2187_s24 = smov %s1791_s25 }
 0x2fb   : > { %p14_p5 = scmp.ge.s32.totalorder %s17_s26, 4   ;;  %s2188_s25 = smov %s2190_s27 }
 0x2fd   :  { %16 = sbr.rel (!%p14_p5) target bundleno = 2 (0x2), region = 90 }

// kernel: _lambda_.6
= control target key start
LH: loop header
LB: loop body
LE: loop exit
PB: predicated region body
PF: predicated region fallthrough
CT: control target
= control target key end

     0   :  { %s1970_s27 = smov 0   ;;  %s1972_s28 = smov 0   ;;  %s2368_s0 = inlined_call_operand.vmem [shape: bf16[2,64,8], index: 0, kind: input, shape index: {}]   ;;  %s2369_s1 = inlined_call_operand.vmem [shape: bf16[2,8,8], index: 1, kind: input, shape index: {}]   ;;  %s2370_s2 = inlined_call_operand.vmem [shape: bf16[8,64], index: 2, kind: input, shape index: {}]   ;;  %s2371_s3 = inlined_call_operand.vmem [shape: f32[1,64], index: 3, kind: input, shape index: {}]   ;;  %s2372_s4 = inlined_call_operand.vmem [shape: bf16[64,128], index: 4, kind: input, shape index: {}]   ;;  %s2373_s5 = inlined_call_operand.vmem [shape: f32[1,128], index: 5, kind: input, shape index: {}]   ;;  %s2374_s6 = inlined_call_operand.vmem [shape: bf16[128,1024], index: 6, kind: input, shape index: {}]   ;;  %s2375_s7 = inlined_call_operand.vmem [shape: f32[1,1024], index: 7, kind: input, shape index: {}]   ;;  %s2376_s8 = inlined_call_operand.vmem [shape: f32[2,1,1024], index: 8, kind: output, shape index: {}]  }
   0x1   :  { %s1974_s29 = smov 0  }
   0x2 LB: > { %s37_s30 = sadd.s32 1, %s1915_s28  ;;  %p1706_p0 = scmp.ge.s32.totalorder %s1919_s29, 1  ;;  %s1919_s29 = sphi %s1974_s29, %s18_s29   ;;  %s1915_s28 = sphi %s1972_s28, %s2378_s28   ;;  %s1911_s27 = sphi %s1970_s27, %s2377_s27  }
   0x3   : > { %p39_p1 = scmp.ge.s32.totalorder %s37_s30, 2  ;;  %p303_p2 = scmp.lt.s32.totalorder %s1919_s29, 3 }
   0x5   : > { %s2380_s30 = smov (%p39_p1, %s37_s30), 0  ;;  %p304_p3 = pnand %p1706_p0, %p303_p2 }
   0x6   : > { %v377_v0 = vld [vmem:[%s2370_s2] sm:$0xf] (!%p304_p3)  ;;  %vm383_vm0 = vcmask (!%p304_p3), 1043456   ;;  %p348_p4 = scmp.lt.s32.totalorder (!%p304_p3), %s1911_s27, 1  ;;  %v1921_v1 = vmov (!%p304_p3), 0.0   ;;  %vm1922_vm1 = vmmov (!%p304_p3), 0  }
   0x7   : > { %307 = sbr.rel (%p304_p3) target bundleno = 985 (0x3d9), region = 52  ;;  %1812 = vmatprep.subr.bf16.mxu0 (!%p304_p3), %v1921_v1  ;;  %v385_v2 = vsel (!%p304_p3), %vm383_vm0, %v377_v0, 0  ;;  %1814 = vmatprep.mubr.msk.bf16.mxu0 (!%p304_p3), %vm1922_vm1, %v1921_v1  ;;  %vm379_vm2 = vcmask (!%p304_p3), 64512   ;;  %v1893_v5 = vld [vmem:[%s2372_s4] sm:$0xff] (!%p304_p3)   ;;  %v1894_v6 = vld [vmem:[%s2372_s4 + $0x8] sm:$0xff] (!%p304_p3)   ;;  %v1895_v16 = vld [vmem:[%s2372_s4 + $0x10] sm:$0xff] (!%p304_p3)  }
   0x8   : > { %1813 = vmatpush3.bf16.msra.mxu0 (!%p304_p3), %v385_v2  ;;  %v1896_v17 = vld [vmem:[%s2372_s4 + $0x18] sm:$0xff] (!%p304_p3)   ;;  %v676_v18 = vld [vmem:[%s2374_s6] sm:$0xff] (!%p304_p3)  ;;  %v2030_v20 = vld [vmem:[%s2374_s6 + $0x8] sm:$0xff] (!%p304_p3)  ;;  %vm586_vm3 = vcmask (!%p304_p3), 523264  }
   0x9   : > { %1828 = vmatprep.subr.bf16.mxu0 (!%p304_p3), %v1893_v5  ;;  %v680_v19 = vld [vmem:[%s2374_s6 + $0x20] sm:$0xff] (!%p304_p3)  ;;  %v2035_v23 = vld [vmem:[%s2374_s6 + $0x28] sm:$0xff] (!%p304_p3) }
   0xa   : > { %v1730_v21 = vcombine.low (!%p304_p3), %v676_v18, %v680_v19  ;;  %v1731_v22 = vcombine.high (!%p304_p3), %v676_v18, %v680_v19  ;;  %v684_v24 = vld [vmem:[%s2374_s6 + $0x40] sm:$0xff] (!%p304_p3)  ;;  %v1732_v26 = vcombine.low (!%p304_p3), %v2030_v20, %v2035_v23  ;;  %v1733_v27 = vcombine.high (!%p304_p3), %v2030_v20, %v2035_v23  ;;  %v685_v59 = vld [vmem:[%s2374_s6 + $0x48] sm:$0xff] (!%p304_p3) }
   0xb   : > { %v688_v25 = vld [vmem:[%s2374_s6 + $0x60] sm:$0xff] (!%p304_p3)  ;;  %v689_v60 = vld [vmem:[%s2374_s6 + $0x68] sm:$0xff] (!%p304_p3) }
   0xc   : > { %v1739_v28 = vcombine.high (!%p304_p3), %v684_v24, %v688_v25  ;;  %v692_v29 = vld [vmem:[%s2374_s6 + $0x80] sm:$0xff] (!%p304_p3)  ;;  %v1738_v31 = vcombine.low (!%p304_p3), %v684_v24, %v688_v25  ;;  %v1741_v2 = vcombine.high (!%p304_p3), %v685_v59, %v689_v60  ;;  %v713_v23 = vld [vmem:[%s2374_s6 + $0x128] sm:$0xff] (!%p304_p3) }
   0xd   : > { %v696_v30 = vld [vmem:[%s2374_s6 + $0xa0] sm:$0xff] (!%p304_p3) }
   0xe   : > { %s2382_s27 = smov (!%p348_p4, %s1911_s27), 1  ;;  %v1747_v32 = vcombine.high %v692_v29, %v696_v30  ;;  %v700_v33 = vld [vmem:[%s2374_s6 + $0xc0] sm:$0xff]  ;;  %v1746_v35 = vcombine.low %v692_v29, %v696_v30 }
   0xf   : > { %s1796_s11 = sshll.u32 %s2382_s27, 5  ;;  %s1709_s12 = sshll.u32 %s2382_s27, 2  ;;  %v704_v34 = vld [vmem:[%s2374_s6 + $0xe0] sm:$0xff] }
  0x10   : > { %s355_s15 = scalar_lea.vmem %s2368_s0, %s1796_s11  ;;  %s361_s18 = scalar_lea.vmem %s2369_s1, %s1709_s12  ;;  %v1755_v36 = vcombine.high %v700_v33, %v704_v34  ;;  %v708_v37 = vld [vmem:[%s2374_s6 + $0x100] sm:$0xff]  ;;  %v1754_v39 = vcombine.low %v700_v33, %v704_v34  ;;  %v725_v33 = vld [vmem:[%s2374_s6 + $0x188] sm:$0xff] }
  0x11   : > { %v378_v3 = vld [vmem:[%s361_s18] sm:$0xf]  ;;  %v1890_v13 = vld [vmem:[%s355_s15 + $0x8] sm:$0xff]   ;;  %v1891_v14 = vld [vmem:[%s355_s15 + $0x10] sm:$0xff]   ;;  %s1710_s17 = sshll.u32 %s2382_s27, 3 }
  0x12   : > { %1815 = vmatmul.mubr.msk.bf16.vlgmr.msra.gmra.mrb[0].mxu0 %vm379_vm2, %v378_v3  ;;  %v1889_v4 = vld [vmem:[%s355_s15] sm:$0xff]   ;;  %v1892_v15 = vld [vmem:[%s355_s15 + $0x18] sm:$0xff]   ;;  %s366_s20 = scalar_lea.vmem %s2376_s8, %s1710_s17 }
  0x13   : > { %1820 = vmatprep.mubr.msk.bf16.mxu1 %vm379_vm2, %v1889_v4  ;;  %1829 = vmatpush3.bf16.msra.mxu0 %v1893_v5  ;;  %v712_v38 = vld [vmem:[%s2374_s6 + $0x120] sm:$0xff]  ;;  %v693_v5 = vld [vmem:[%s2374_s6 + $0x88] sm:$0xff] }
  0x14   : > { %1830 = vmatprep.subr.bf16.mxu0 %v1894_v6  ;;  %v1763_v40 = vcombine.high %v708_v37, %v712_v38  ;;  %v716_v41 = vld [vmem:[%s2374_s6 + $0x140] sm:$0xff]  ;;  %v1762_v43 = vcombine.low %v708_v37, %v712_v38 }
  0x15   : > { %v720_v42 = vld [vmem:[%s2374_s6 + $0x160] sm:$0xff] }
  0x16   : > { %v1771_v44 = vcombine.high %v716_v41, %v720_v42  ;;  %v1770_v45 = vcombine.low %v716_v41, %v720_v42  ;;  %v1712_v46 = vld [vmem:[%s2371_s3] ss:$0 sm:$0xff]  ;;  %v733_v41 = vld [vmem:[%s2374_s6 + $0x1c8] sm:$0xff] }
  0x17   : > { %1831 = vmatpush3.bf16.msra.mxu0 %v1894_v6  ;;  %v697_v6 = vld [vmem:[%s2374_s6 + $0xa8] sm:$0xff] }
  0x18   : > { %1832 = vmatprep.subr.bf16.mxu0 %v1895_v16 }
  0x1b   : > { %1833 = vmatpush3.bf16.msra.mxu0 %v1895_v16  ;;  %v701_v16 = vld [vmem:[%s2374_s6 + $0xc8] sm:$0xff] }
  0x1c   : > { %1834 = vmatprep.subr.bf16.mxu0 %v1896_v17 }
  0x1f   : > { %1835 = vmatpush3.bf16.msra.mxu0 %v1896_v17  ;;  %v705_v17 = vld [vmem:[%s2374_s6 + $0xe8] sm:$0xff] }
  0x20   : > { %1133 = vmatprep.subr.bf16.mxu0 %v1733_v27  ;;  %v1757_v20 = vcombine.high %v701_v16, %v705_v17  ;;  %v1756_v24 = vcombine.low %v701_v16, %v705_v17  ;;  %v721_v27 = vld [vmem:[%s2374_s6 + $0x168] sm:$0xff]  ;;  %v698_v17 = vld [vmem:[%s2374_s6 + $0xb0] sm:$0xff] }
  0xe5   : > { %v421_v7 = vpop.f32.mrb[0].mxu0 }
  0xe6   : > { %v427_v8 = vpack.c.bf16 %v421_v7, %v421_v7  ;;  %v1816_v9 = vpop.f32.mrb[1].mxu0 }
  0xe7   : > { %v424_v10 = vpop.f32.mrb[2].mxu0 }
  0xe8   : > { %v1817_v11 = vpop.f32.mrb[3].mxu0  ;;  %1860 = vmatprep.subr.msk.bf16.mxu1 %vm383_vm0, %v427_v8  ;;  %v468_v12 = vsel %vm383_vm0, %v427_v8, 0 }
  0xe9   : > { %1819 = vmatpush3.bf16.msra.mxu1 %v468_v12  ;;  %v1740_v12 = vcombine.low %v685_v59, %v689_v60 }
  0xea   : > { %1060 = vmatprep.subr.bf16.mxu1 %v1731_v22  ;;  %v709_v22 = vld [vmem:[%s2374_s6 + $0x108] sm:$0xff] }
  0xeb   : > { %v1765_v25 = vcombine.high %v709_v22, %v713_v23 }
  0xec   : > { %1821 = vmatmul.mubr.msk.bf16.vlgmr.msra.gmra.mrb[0].mxu1 %vm379_vm2, %v1890_v13 }
  0xed   : > { %1824 = vmatprep.mubr.msk.bf16.mxu1 %vm379_vm2, %v1891_v14  ;;  %1061 = vmatpush1.bf16.msra.mxu1 %v1730_v21  ;;  %v1749_v14 = vcombine.high %v693_v5, %v697_v6  ;;  %v1748_v21 = vcombine.low %v693_v5, %v697_v6  ;;  %v687_v5 = vld [vmem:[%s2374_s6 + $0x58] sm:$0xff] }
  0xee   : > { %1062 = vmatprep.subr.bf16.mxu1 %v1739_v28  ;;  %v1764_v28 = vcombine.low %v709_v22, %v713_v23  ;;  %v691_v6 = vld [vmem:[%s2374_s6 + $0x78] sm:$0xff] }
  0xf1   : > { %1063 = vmatpush1.bf16.msra.mxu1 %v1738_v31  ;;  %v724_v31 = vld [vmem:[%s2374_s6 + $0x180] sm:$0xff] }
  0xf2   : > { %1064 = vmatprep.subr.bf16.mxu1 %v1747_v32  ;;  %v728_v32 = vld [vmem:[%s2374_s6 + $0x1a0] sm:$0xff] }
  0xf3   : > { %v1779_v34 = vcombine.high %v724_v31, %v728_v32 }
  0xf4   : > { %1825 = vmatmul.mubr.msk.bf16.gmra.mrb[4].mxu1 %vm379_vm2, %v1892_v15 }
  0xf5   : > { %1065 = vmatpush1.bf16.msra.mxu1 %v1746_v35  ;;  %v729_v35 = vld [vmem:[%s2374_s6 + $0x1a8] sm:$0xff] }
  0xf6   : > { %1066 = vmatprep.subr.bf16.mxu1 %v1755_v36  ;;  %v1778_v36 = vcombine.low %v724_v31, %v728_v32  ;;  %v1780_v37 = vcombine.low %v725_v33, %v729_v35  ;;  %v1781_v38 = vcombine.high %v725_v33, %v729_v35  ;;  %v702_v31 = vld [vmem:[%s2374_s6 + $0xd0] sm:$0xff]  ;;  %v707_v35 = vld [vmem:[%s2374_s6 + $0xf8] sm:$0xff] }
  0xf7   : > { %v706_v33 = vld [vmem:[%s2374_s6 + $0xf0] sm:$0xff] }
  0xf9   : > { %1067 = vmatpush1.bf16.msra.mxu1 %v1754_v39  ;;  %v732_v39 = vld [vmem:[%s2374_s6 + $0x1c0] sm:$0xff] }
  0xfa   : > { %1068 = vmatprep.subr.bf16.mxu1 %v1763_v40  ;;  %v736_v40 = vld [vmem:[%s2374_s6 + $0x1e0] sm:$0xff] }
  0xfb   : > { %v1787_v42 = vcombine.high %v732_v39, %v736_v40 }
  0xfd   : > { %1069 = vmatpush1.bf16.msra.mxu1 %v1762_v43  ;;  %v737_v43 = vld [vmem:[%s2374_s6 + $0x1e8] sm:$0xff] }
  0xfe   : > { %1070 = vmatprep.subr.bf16.mxu1 %v1771_v44  ;;  %v1786_v44 = vcombine.low %v732_v39, %v736_v40 }
 0x101   : > { %1071 = vmatpush1.bf16.msra.mxu1 %v1770_v45  ;;  %v1788_v45 = vcombine.low %v733_v41, %v737_v43 }
 0x102   : > { %1072 = vmatprep.subr.bf16.mxu1 %v1779_v34  ;;  %v703_v34 = vld [vmem:[%s2374_s6 + $0xd8] sm:$0xff] }
 0x105   : > { %1073 = vmatpush1.bf16.msra.mxu1 %v1778_v36 }
 0x106   : > { %1074 = vmatprep.subr.bf16.mxu1 %v1787_v42  ;;  %v2217_v42 = vcombine.high %v703_v34, %v707_v35 }
 0x109   : > { %1075 = vmatpush1.bf16.msra.mxu1 %v1786_v44  ;;  %v714_v44 = vld [vmem:[%s2374_s6 + $0x130] sm:$0xff] }
 0x1bf   : > { %v1822_v47 = vpop.f32.mrb[0].mxu1 }
 0x1c0   : > { %v513_v48 = vadd.f32 %v1822_v47, %v1712_v46  ;;  %v504_v49 = vpop.f32.mrb[1].mxu1  ;;  %v678_v47 = vld [vmem:[%s2374_s6 + $0x10] sm:$0xff] }
 0x1c1   : > { %v505_v50 = vadd.f32 %v1712_v46, %v504_v49  ;;  %v1823_v51 = vpop.f32.mrb[2].mxu1  ;;  %v679_v49 = vld [vmem:[%s2374_s6 + $0x18] sm:$0xff] }
 0x1c2   : > { %v516_v52 = vadd.f32 %v1823_v51, %v1712_v46  ;;  %v507_v53 = vpop.f32.mrb[3].mxu1  ;;  %v537_v55 = vmax.f32 %v513_v48, 0.0  ;;  %v682_v48 = vld [vmem:[%s2374_s6 + $0x30] sm:$0xff]  ;;  %v683_v51 = vld [vmem:[%s2374_s6 + $0x38] sm:$0xff] }
 0x1c3   : > { %v508_v54 = vadd.f32 %v1712_v46, %v507_v53  ;;  %v535_v57 = vmax.f32 %v505_v50, 0.0  ;;  %v1735_v50 = vcombine.high %v678_v47, %v682_v48  ;;  %v1734_v53 = vcombine.low %v678_v47, %v682_v48 }
 0x1c4   : > { %v538_v56 = vmax.f32 %v516_v52, 0.0  ;;  %v1923_v52 = vmov 0   ;;  %v1758_v47 = vcombine.low %v702_v31, %v706_v33  ;;  %v2234_v48 = vcombine.low %v703_v34, %v707_v35 }
 0x1c5   : > { %v536_v58 = vmax.f32 %v508_v54, 0.0  ;;  %1092 = vmatprep.mubr.bf16.mxu1 %v1923_v52  ;;  %v2149_v54 = vcombine.low %v679_v49, %v683_v51  ;;  %1206 = vmatprep.subr.bf16.mxu1 %v1735_v50 }
 0x1c6   : > { %v544_v61 = vpack.c.bf16 %v538_v56, %v537_v55  ;;  %v2151_v55 = vcombine.high %v679_v49, %v683_v51  ;;  %v1721_v56 = vld [vmem:[%s2373_s5] ss:$0 sm:$0xff]  ;;  %v718_v51 = vld [vmem:[%s2374_s6 + $0x150] sm:$0xff] }
 0x1c7   : > { %v543_v62 = vpack.c.bf16 %v536_v58, %v535_v57  ;;  %v1826_v63 = vpop.f32.mrb[4].mxu1 }
 0x1c8   : > { %v529_v0 = vadd.f32 %v1826_v63, %v1712_v46  ;;  %v520_v1 = vpop.f32.mrb[5].mxu1 }
 0x1c9   : > { %v521_v3 = vadd.f32 %v1712_v46, %v520_v1  ;;  %1836 = vmatprep.mubr.msk.bf16.mxu0 %vm586_vm3, %v543_v62  ;;  %v1827_v4 = vpop.f32.mrb[6].mxu1  ;;  %v686_v1 = vld [vmem:[%s2374_s6 + $0x50] sm:$0xff] }
 0x1ca   : > { %v541_v7 = vmax.f32 %v529_v0, 0.0  ;;  %v532_v8 = vadd.f32 %v1827_v4, %v1712_v46  ;;  %1837 = vmatmul.mubr.msk.bf16.vlgmr.msra.gmra.mrb[4].mxu0 %vm586_vm3, %v544_v61  ;;  %v523_v9 = vpop.f32.mrb[7].mxu1  ;;  %v690_v4 = vld [vmem:[%s2374_s6 + $0x70] sm:$0xff] }
 0x1cb   : > { %v539_v10 = vmax.f32 %v521_v3, 0.0  ;;  %v524_v11 = vadd.f32 %v1712_v46, %v523_v9  ;;  %1134 = vmatpush1.bf16.msra.mxu0 %v1732_v26  ;;  %v717_v26 = vld [vmem:[%s2374_s6 + $0x148] sm:$0xff]  ;;  %v1789_v46 = vcombine.high %v733_v41, %v737_v43  ;;  %v1759_v41 = vcombine.high %v702_v31, %v706_v33  ;;  %v710_v43 = vld [vmem:[%s2374_s6 + $0x110] sm:$0xff] }
 0x1cc   : > { %v542_v13 = vmax.f32 %v532_v8, 0.0  ;;  %1135 = vmatprep.subr.bf16.mxu0 %v1741_v2  ;;  %v1773_v29 = vcombine.high %v717_v26, %v721_v27  ;;  %v1772_v30 = vcombine.low %v717_v26, %v721_v27  ;;  %v2190_v26 = vcombine.low %v687_v5, %v691_v6 }
 0x1cd   : > { %v540_v15 = vmax.f32 %v524_v11, 0.0  ;;  %v1767_v49 = vcombine.high %v710_v43, %v714_v44 }
 0x1ce   : > { %v546_v18 = vpack.c.bf16 %v542_v13, %v541_v7  ;;  %v2173_v13 = vcombine.high %v687_v5, %v691_v6  ;;  %v734_v6 = vld [vmem:[%s2374_s6 + $0x1d0] sm:$0xff] }
 0x1cf   : > { %v545_v19 = vpack.c.bf16 %v540_v15, %v539_v10  ;;  %1136 = vmatpush1.bf16.msra.mxu0 %v1740_v12  ;;  %v1743_v12 = vcombine.high %v686_v1, %v690_v4 }
 0x1d0   : > { %1137 = vmatprep.subr.bf16.mxu0 %v1749_v14  ;;  %v694_v14 = vld [vmem:[%s2374_s6 + $0x90] sm:$0xff] }
 0x1d1   : > { %1840 = vmatprep.mubr.msk.bf16.mxu0 %vm586_vm3, %v545_v19  ;;  %v699_v19 = vld [vmem:[%s2374_s6 + $0xb8] sm:$0xff] }
 0x1d2   : > { %1841 = vmatmul.mubr.msk.bf16.gmra.mrb[8].mxu0 %vm586_vm3, %v546_v18  ;;  %v695_v18 = vld [vmem:[%s2374_s6 + $0x98] sm:$0xff] }
 0x1d3   : > { %1138 = vmatpush1.bf16.msra.mxu0 %v1748_v21  ;;  %1165 = vmatprep.mubr.bf16.mxu0 %v1923_v52  ;;  %v2212_v39 = vcombine.low %v695_v18, %v699_v19 }
 0x1d4   : > { %1139 = vmatprep.subr.bf16.mxu0 %v1757_v20 }
 0x1d7   : > { %1140 = vmatpush1.bf16.msra.mxu0 %v1756_v24 }
 0x1d8   : > { %1141 = vmatprep.subr.bf16.mxu0 %v1765_v25  ;;  %v1742_v25 = vcombine.low %v686_v1, %v690_v4  ;;  %v731_v1 = vld [vmem:[%s2374_s6 + $0x1b8] sm:$0xff] }
 0x1db   : > { %1142 = vmatpush1.bf16.msra.mxu0 %v1764_v28 }
 0x1dc   : > { %1143 = vmatprep.subr.bf16.mxu0 %v1773_v29  ;;  %v1751_v29 = vcombine.high %v694_v14, %v698_v17 }
 0x1df   : > { %1144 = vmatpush1.bf16.msra.mxu0 %v1772_v30  ;;  %v2193_v30 = vcombine.high %v695_v18, %v699_v19 }
 0x1e0   : > { %1145 = vmatprep.subr.bf16.mxu0 %v1781_v38  ;;  %v1750_v38 = vcombine.low %v694_v14, %v698_v17 }
 0x1e3   : > { %1146 = vmatpush1.bf16.msra.mxu0 %v1780_v37 }
 0x1e4   : > { %1147 = vmatprep.subr.bf16.mxu0 %v1789_v46  ;;  %v715_v46 = vld [vmem:[%s2374_s6 + $0x138] sm:$0xff] }
 0x1e7   : > { %1148 = vmatpush1.bf16.msra.mxu0 %v1788_v45  ;;  %v711_v45 = vld [vmem:[%s2374_s6 + $0x118] sm:$0xff] }
 0x1e8   : > { %1279 = vmatprep.subr.bf16.mxu0 %v2151_v55  ;;  %v2237_v50 = vcombine.high %v711_v45, %v715_v46 }
 0x29d   : > { %v1838_v57 = vpop.f32.mrb[4].mxu0 }
 0x29e   : > { %v642_v58 = vadd.f32 %v1838_v57, %v1721_v56  ;;  %v633_v59 = vpop.f32.mrb[5].mxu0  ;;  %v723_v57 = vld [vmem:[%s2374_s6 + $0x178] sm:$0xff] }
 0x29f   : > { %v634_v60 = vadd.f32 %v1721_v56, %v633_v59  ;;  %v1839_v61 = vpop.f32.mrb[6].mxu0  ;;  %v2254_v59 = vcombine.low %v711_v45, %v715_v46 }
 0x2a0   : > { %v645_v62 = vadd.f32 %v1839_v61, %v1721_v56  ;;  %v636_v63 = vpop.f32.mrb[7].mxu0  ;;  %v666_v2 = vmax.f32 %v642_v58, 0.0  ;;  %v1766_v58 = vcombine.low %v710_v43, %v714_v44 }
 0x2a1   : > { %v637_v0 = vadd.f32 %v1721_v56, %v636_v63  ;;  %v664_v7 = vmax.f32 %v634_v60, 0.0  ;;  %v730_v63 = vld [vmem:[%s2374_s6 + $0x1b0] sm:$0xff] }
 0x2a2   : > { %v667_v3 = vmax.f32 %v645_v62, 0.0  ;;  %v726_v62 = vld [vmem:[%s2374_s6 + $0x190] sm:$0xff] }
 0x2a3   : > { %v665_v8 = vmax.f32 %v637_v0, 0.0  ;;  %v727_v0 = vld [vmem:[%s2374_s6 + $0x198] sm:$0xff]  ;;  %v1783_v4 = vcombine.high %v726_v62, %v730_v63 }
 0x2a4   : > { %v2169_v9 = vpack.c.bf16 %v667_v3, %v666_v2  ;;  %v1785_v5 = vcombine.high %v727_v0, %v731_v1  ;;  %v1784_v14 = vcombine.low %v727_v0, %v731_v1 }
 0x2a5   : > { %v2171_v10 = vpack.c.bf16 %v665_v8, %v664_v7  ;;  %v1842_v11 = vpop.f32.mrb[8].mxu0  ;;  %v738_v7 = vld [vmem:[%s2374_s6 + $0x1f0] sm:$0xff]  ;;  %v735_v8 = vld [vmem:[%s2374_s6 + $0x1d8] sm:$0xff] }
 0x2a6   : > { %v658_v15 = vadd.f32 %v1842_v11, %v1721_v56  ;;  %v649_v16 = vpop.f32.mrb[9].mxu0  ;;  %v739_v11 = vld [vmem:[%s2374_s6 + $0x1f8] sm:$0xff]  ;;  %v1790_v17 = vcombine.low %v734_v6, %v738_v7 }
 0x2a7   : > { %v650_v21 = vadd.f32 %v1721_v56, %v649_v16  ;;  %1093 = vmatmul.mubr.bf16.vlgmr.msra.gmra.mrb[8].mxu1 %v2171_v10  ;;  %1166 = vmatmul.mubr.bf16.vlgmr.msra.gmra.mrb[12].mxu0 %v2171_v10  ;;  %v1843_v20 = vpop.f32.mrb[10].mxu0  ;;  %v1793_v16 = vcombine.high %v735_v8, %v739_v11  ;;  %v1792_v18 = vcombine.low %v735_v8, %v739_v11 }
 0x2a8   : > { %v670_v22 = vmax.f32 %v658_v15, 0.0  ;;  %1207 = vmatpush1.bf16.msra.mxu1 %v1734_v53  ;;  %v661_v23 = vadd.f32 %v1843_v20, %v1721_v56  ;;  %1280 = vmatpush1.bf16.msra.mxu0 %v2149_v54  ;;  %v652_v24 = vpop.f32.mrb[11].mxu0  ;;  %v722_v53 = vld [vmem:[%s2374_s6 + $0x170] sm:$0xff]  ;;  %v1791_v15 = vcombine.high %v734_v6, %v738_v7 }
 0x2a9   : > { %v668_v27 = vmax.f32 %v650_v21, 0.0  ;;  %v653_v28 = vadd.f32 %v1721_v56, %v652_v24  ;;  %1208 = vmatprep.subr.bf16.mxu1 %v1743_v12  ;;  %1281 = vmatprep.subr.bf16.mxu0 %v2173_v13  ;;  %v719_v56 = vld [vmem:[%s2374_s6 + $0x158] sm:$0xff]  ;;  %v1775_v60 = vcombine.high %v718_v51, %v722_v53  ;;  %v1774_v2 = vcombine.low %v718_v51, %v722_v53 }
 0x2aa   : > { %v671_v32 = vmax.f32 %v661_v23, 0.0  ;;  %1102 = vmatprep.mubr.bf16.mxu1 %v1923_v52  ;;  %1175 = vmatprep.mubr.bf16.mxu0 %v1923_v52  ;;  %v1777_v61 = vcombine.high %v719_v56, %v723_v57  ;;  %v1776_v3 = vcombine.low %v719_v56, %v723_v57  ;;  %v1782_v12 = vcombine.low %v726_v62, %v730_v63 }
 0x2ab   : > { %v669_v36 = vmax.f32 %v653_v28, 0.0  ;;  %v1509_v62 = vlaneseq }
 0x2ac   : > { %v2209_v37 = vpack.c.bf16 %v671_v32, %v670_v22  ;;  %1209 = vmatpush1.bf16.msra.mxu1 %v1742_v25  ;;  %1282 = vmatpush1.bf16.msra.mxu0 %v2190_v26 }
 0x2ad   : > { %v2214_v40 = vpack.c.bf16 %v669_v36, %v668_v27  ;;  %1210 = vmatprep.subr.bf16.mxu1 %v1751_v29  ;;  %1283 = vmatprep.subr.bf16.mxu0 %v2193_v30 }
 0x2af   : > { %1103 = vmatmul.mubr.bf16.gmra.mrb[12].mxu1 %v2169_v9  ;;  %1176 = vmatmul.mubr.bf16.gmra.mrb[16].mxu0 %v2169_v9 }
 0x2b0   : > { %1211 = vmatpush1.bf16.msra.mxu1 %v1750_v38  ;;  %1284 = vmatpush1.bf16.msra.mxu0 %v2212_v39 }
 0x2b1   : > { %1212 = vmatprep.subr.bf16.mxu1 %v1759_v41  ;;  %1285 = vmatprep.subr.bf16.mxu0 %v2217_v42 }
 0x2b2   : > { %1112 = vmatprep.mubr.bf16.mxu1 %v1923_v52  ;;  %1185 = vmatprep.mubr.bf16.mxu0 %v1923_v52 }
 0x2b4   : > { %1213 = vmatpush1.bf16.msra.mxu1 %v1758_v47  ;;  %1286 = vmatpush1.bf16.msra.mxu0 %v2234_v48 }
 0x2b5   : > { %1214 = vmatprep.subr.bf16.mxu1 %v1767_v49  ;;  %1287 = vmatprep.subr.bf16.mxu0 %v2237_v50 }
 0x2b7   : > { %1113 = vmatmul.mubr.bf16.gmra.mrb[16].mxu1 %v2214_v40  ;;  %1186 = vmatmul.mubr.bf16.gmra.mrb[20].mxu0 %v2214_v40 }
 0x2b8   : > { %1215 = vmatpush1.bf16.msra.mxu1 %v1766_v58  ;;  %1288 = vmatpush1.bf16.msra.mxu0 %v2254_v59 }
 0x2b9   : > { %1216 = vmatprep.subr.bf16.mxu1 %v1775_v60  ;;  %1289 = vmatprep.subr.bf16.mxu0 %v1777_v61 }
 0x2ba   : > { %1122 = vmatprep.mubr.bf16.mxu1 %v1923_v52  ;;  %1195 = vmatprep.mubr.bf16.mxu0 %v1923_v52 }
 0x2bc   : > { %1217 = vmatpush1.bf16.msra.mxu1 %v1774_v2  ;;  %1290 = vmatpush1.bf16.msra.mxu0 %v1776_v3 }
 0x2bd   : > { %1218 = vmatprep.subr.bf16.mxu1 %v1783_v4  ;;  %1291 = vmatprep.subr.bf16.mxu0 %v1785_v5 }
 0x2bf   : > { %1123 = vmatmul.mubr.bf16.gmra.mrb[20].mxu1 %v2209_v37  ;;  %1196 = vmatmul.mubr.bf16.gmra.mrb[24].mxu0 %v2209_v37 }
 0x2c0   : > { %1219 = vmatpush1.bf16.msra.mxu1 %v1782_v12  ;;  %1292 = vmatpush1.bf16.msra.mxu0 %v1784_v14 }
 0x2c1   : > { %1220 = vmatprep.subr.bf16.mxu1 %v1791_v15  ;;  %1293 = vmatprep.subr.bf16.mxu0 %v1793_v16 }
 0x2c2   : > { %1238 = vmatprep.mubr.bf16.mxu1 %v1923_v52  ;;  %1311 = vmatprep.mubr.bf16.mxu0 %v1923_v52 }
 0x2c4   : > { %1221 = vmatpush1.bf16.msra.mxu1 %v1790_v17  ;;  %1294 = vmatpush1.bf16.msra.mxu0 %v1792_v18 }
 0x2c5   : > { %1844 = vmatprep.subr.bf16.mxu1 %v2151_v55 }
 0x2c7   : > { %1239 = vmatmul.mubr.bf16.vlgmr.msra.gmra.mrb[24].mxu1 %v2171_v10  ;;  %1312 = vmatmul.mubr.bf16.vlgmr.msra.gmra.mrb[28].mxu0 %v2171_v10 }
 0x2c8   : > { %1852 = vmatpush1.bf16.msra.mxu1 %v2149_v54  ;;  %1248 = vmatprep.mubr.bf16.mxu1 %v1923_v52 }
 0x2c9   : > { %1845 = vmatprep.subr.bf16.mxu1 %v2173_v13  ;;  %1321 = vmatprep.mubr.bf16.mxu0 %v1923_v52 }
 0x2cc   : > { %1853 = vmatpush1.bf16.msra.mxu1 %v2190_v26 }
 0x2cd   : > { %1846 = vmatprep.subr.bf16.mxu1 %v2193_v30 }
 0x2cf   : > { %1249 = vmatmul.mubr.bf16.gmra.mrb[28].mxu1 %v2169_v9  ;;  %1322 = vmatmul.mubr.bf16.gmra.mrb[32].mxu0 %v2169_v9 }
 0x2d0   : > { %1854 = vmatpush1.bf16.msra.mxu1 %v2212_v39  ;;  %1258 = vmatprep.mubr.bf16.mxu1 %v1923_v52 }
 0x2d1   : > { %1847 = vmatprep.subr.bf16.mxu1 %v2217_v42  ;;  %1331 = vmatprep.mubr.bf16.mxu0 %v1923_v52 }
 0x2d4   : > { %1855 = vmatpush1.bf16.msra.mxu1 %v2234_v48 }
 0x2d5   : > { %1848 = vmatprep.subr.bf16.mxu1 %v2237_v50 }
 0x2d7   : > { %1259 = vmatmul.mubr.bf16.gmra.mrb[32].mxu1 %v2214_v40  ;;  %1332 = vmatmul.mubr.bf16.gmra.mrb[36].mxu0 %v2214_v40 }
 0x2d8   : > { %1856 = vmatpush1.bf16.msra.mxu1 %v2254_v59  ;;  %1268 = vmatprep.mubr.bf16.mxu1 %v1923_v52 }
 0x2d9   : > { %1849 = vmatprep.subr.bf16.mxu1 %v1777_v61 }
 0x2dc   : > { %1857 = vmatpush1.bf16.msra.mxu1 %v1776_v3 }
 0x2dd   : > { %1850 = vmatprep.subr.bf16.mxu1 %v1785_v5 }
 0x2df   : > { %1269 = vmatmul.mubr.bf16.gmra.mrb[36].mxu1 %v2209_v37 }
 0x2e0   : > { %1858 = vmatpush1.bf16.msra.mxu1 %v1784_v14  ;;  %1341 = vmatprep.mubr.bf16.mxu1 %v1923_v52  ;;  %v2314_v14 = vshrl.u32 %v1509_v62, 7 }
 0x2e1   : > { %1851 = vmatprep.subr.bf16.mxu1 %v1793_v16 }
 0x2e4   : > { %1859 = vmatpush1.bf16.msra.mxu1 %v1792_v18 }
 0x2e7   : > { %1342 = vmatmul.mubr.bf16.vlgmr.msra.gmra.mrb[40].mxu1 %v2209_v37 }
 0x37a   : > { %v1094_v54 = vpop.f32.mrb[8].mxu1  ;;  %v1167_v55 = vpop.f32.mrb[12].mxu0 }
 0x37b   : > { %v1096_v9 = vpop.f32.mrb[9].mxu1  ;;  %v1169_v10 = vpop.f32.mrb[13].mxu0 }
 0x37c   : > { %v1098_v13 = vpop.f32.mrb[10].mxu1  ;;  %v1171_v19 = vpop.f32.mrb[14].mxu0 }
 0x37d   : > { %v1352_v21 = vmax.f32 %v1094_v54, %v1098_v13  ;;  %v1354_v20 = vmax.f32 %v1167_v55, %v1171_v19  ;;  %v1100_v22 = vpop.f32.mrb[11].mxu1  ;;  %v1173_v23 = vpop.f32.mrb[15].mxu0  ;;  %v1924_v55 = vmov 1966171168  }
 0x37e   : > { %v1353_v24 = vmax.f32 %v1096_v9, %v1100_v22  ;;  %v1355_v25 = vmax.f32 %v1169_v10, %v1173_v23  ;;  %v1570_v9 = vunpack.c.l.s4 %v1924_v55 }
 0x382   : > { %v1104_v26 = vpop.f32.mrb[12].mxu1  ;;  %v1177_v27 = vpop.f32.mrb[16].mxu0 }
 0x383   : > { %v1360_v28 = vmax.f32 %v1352_v21, %v1104_v26  ;;  %v1362_v52 = vmax.f32 %v1354_v20, %v1177_v27  ;;  %v1106_v29 = vpop.f32.mrb[13].mxu1  ;;  %v1179_v30 = vpop.f32.mrb[17].mxu0  ;;  %v1511_v21 = vsub.s32 0, %v2314_v14  ;;  %v1519_v27 = vsub.s32 2, %v2314_v14 }
 0x384   : > { %v1361_v31 = vmax.f32 %v1353_v24, %v1106_v29  ;;  %v1363_v32 = vmax.f32 %v1355_v25, %v1179_v30  ;;  %v1108_v33 = vpop.f32.mrb[14].mxu1  ;;  %v1181_v34 = vpop.f32.mrb[18].mxu0  ;;  %v2322_v30 = vld [vmem:[%s2375_s7] sm:$0xff] }
 0x385   : > { %v1368_v35 = vmax.f32 %v1360_v28, %v1108_v33  ;;  %v1370_v36 = vmax.f32 %v1362_v52, %v1181_v34  ;;  %v1110_v37 = vpop.f32.mrb[15].mxu1  ;;  %v1183_v38 = vpop.f32.mrb[19].mxu0  ;;  %v1515_v28 = vsub.s32 1, %v2314_v14  ;;  %v1523_v34 = vsub.s32 3, %v2314_v14 }
 0x386   : > { %v1369_v39 = vmax.f32 %v1361_v31, %v1110_v37  ;;  %v1371_v40 = vmax.f32 %v1363_v32, %v1183_v38  ;;  %v1571_v32 = vunpack.c.0.s8 %v1570_v9 }
 0x38a   : > { %v1114_v41 = vpop.f32.mrb[16].mxu1  ;;  %v1187_v42 = vpop.f32.mrb[20].mxu0 }
 0x38b   : > { %v1376_v43 = vmax.f32 %v1368_v35, %v1114_v41  ;;  %v1378_v44 = vmax.f32 %v1370_v36, %v1187_v42  ;;  %v1116_v45 = vpop.f32.mrb[17].mxu1  ;;  %v1189_v46 = vpop.f32.mrb[21].mxu0 }
 0x38c   : > { %v1377_v47 = vmax.f32 %v1369_v39, %v1116_v45  ;;  %v1379_v48 = vmax.f32 %v1371_v40, %v1189_v46  ;;  %v1118_v49 = vpop.f32.mrb[18].mxu1  ;;  %v1191_v50 = vpop.f32.mrb[22].mxu0 }
 0x38d   : > { %v1384_v51 = vmax.f32 %v1376_v43, %v1118_v49  ;;  %v1386_v53 = vmax.f32 %v1378_v44, %v1191_v50  ;;  %v1120_v56 = vpop.f32.mrb[19].mxu1  ;;  %v1193_v57 = vpop.f32.mrb[23].mxu0  ;;  %v1520_v50 = vrot.slane %v2322_v30, %v1519_v27 }
 0x38e   : > { %v1385_v58 = vmax.f32 %v1377_v47, %v1120_v56  ;;  %v1387_v59 = vmax.f32 %v1379_v48, %v1193_v57  ;;  %v1512_v48 = vrot.slane %v2322_v30, %v1511_v21  ;;  %v1524_v57 = vrot.slane %v2322_v30, %v1523_v34 }
 0x392   : > { %v1124_v60 = vpop.f32.mrb[20].mxu1  ;;  %v1197_v61 = vpop.f32.mrb[24].mxu0 }
 0x393   : > { %v1392_v63 = vmax.f32 %v1384_v51, %v1124_v60  ;;  %v1394_v0 = vmax.f32 %v1386_v53, %v1197_v61  ;;  %v1126_v1 = vpop.f32.mrb[21].mxu1  ;;  %v1199_v2 = vpop.f32.mrb[25].mxu0  ;;  %v1516_v53 = vrot.slane %v2322_v30, %v1515_v28  ;;  %v2330_v61 = vsub.s32 %v1571_v32, %v2314_v14 }
 0x394   : > { %v1393_v3 = vmax.f32 %v1385_v58, %v1126_v1  ;;  %v1395_v4 = vmax.f32 %v1387_v59, %v1199_v2  ;;  %v1128_v5 = vpop.f32.mrb[22].mxu1  ;;  %v1201_v6 = vpop.f32.mrb[26].mxu0 }
 0x395   : > { %v1400_v7 = vmax.f32 %v1392_v63, %v1128_v5  ;;  %v1402_v8 = vmax.f32 %v1394_v0, %v1201_v6  ;;  %v1130_v11 = vpop.f32.mrb[23].mxu1  ;;  %v1203_v12 = vpop.f32.mrb[27].mxu0 }
 0x396   : > { %v1401_v15 = vmax.f32 %v1393_v3, %v1130_v11  ;;  %v1403_v16 = vmax.f32 %v1395_v4, %v1203_v12 }
 0x397   : > { %v1459_v17 = vrot.slane %v1400_v7, 4  ;;  %v1471_v18 = vrot.slane %v1402_v8, 4 }
 0x398   : > { %v1465_v54 = vrot.slane %v1401_v15, 4  ;;  %v1477_v10 = vrot.slane %v1403_v16, 4 }
 0x399   : > { %v1460_v13 = vmax.f32 %v1400_v7, %v1459_v17  ;;  %v1472_v19 = vmax.f32 %v1402_v8, %v1471_v18 }
 0x39a   : > { %v1466_v20 = vmax.f32 %v1401_v15, %v1465_v54  ;;  %v1478_v22 = vmax.f32 %v1403_v16, %v1477_v10  ;;  %v1240_v23 = vpop.f32.mrb[24].mxu1  ;;  %v1313_v24 = vpop.f32.mrb[28].mxu0 }
 0x39b   : > { %v1461_v25 = vrot.slane %v1460_v13, 2  ;;  %v1473_v26 = vrot.slane %v1472_v19, 2  ;;  %v1242_v52 = vpop.f32.mrb[25].mxu1  ;;  %v1315_v29 = vpop.f32.mrb[29].mxu0 }
 0x39c   : > { %v1467_v31 = vrot.slane %v1466_v20, 2  ;;  %v1479_v33 = vrot.slane %v1478_v22, 2  ;;  %v1244_v35 = vpop.f32.mrb[26].mxu1  ;;  %v1317_v36 = vpop.f32.mrb[30].mxu0 }
 0x39d   : > { %v1462_v37 = vmax.f32 %v1460_v13, %v1461_v25  ;;  %v1474_v38 = vmax.f32 %v1472_v19, %v1473_v26  ;;  %v1356_v39 = vmax.f32 %v1240_v23, %v1244_v35  ;;  %v1358_v40 = vmax.f32 %v1313_v24, %v1317_v36  ;;  %v1246_v41 = vpop.f32.mrb[27].mxu1  ;;  %v1319_v42 = vpop.f32.mrb[31].mxu0 }
 0x39e   : > { %v1468_v43 = vmax.f32 %v1466_v20, %v1467_v31  ;;  %v1480_v44 = vmax.f32 %v1478_v22, %v1479_v33  ;;  %v1357_v45 = vmax.f32 %v1242_v52, %v1246_v41  ;;  %v1359_v46 = vmax.f32 %v1315_v29, %v1319_v42 }
 0x39f   : > { %v1463_v47 = vrot.slane %v1462_v37, 1  ;;  %v1475_v49 = vrot.slane %v1474_v38, 1 }
 0x3a0   : > { %v1469_v51 = vrot.slane %v1468_v43, 1  ;;  %v1481_v56 = vrot.slane %v1480_v44, 1 }
 0x3a1   : > { %v1464_v58 = vmax.f32 %v1462_v37, %v1463_v47  ;;  %v1476_v59 = vmax.f32 %v1474_v38, %v1475_v49 }
 0x3a2   : > { %v1470_v60 = vmax.f32 %v1468_v43, %v1469_v51  ;;  %v1482_v62 = vmax.f32 %v1480_v44, %v1481_v56  ;;  %v1250_v63 = vpop.f32.mrb[28].mxu1  ;;  %v1323_v0 = vpop.f32.mrb[32].mxu0  ;;  %v1527_v56 = vsub.s32 4, %v2314_v14 }
 0x3a3   : > { %v1549_v1 = vadd.f32 %v1512_v48, %v1464_v58  ;;  %v1551_v2 = vadd.f32 %v1520_v50, %v1476_v59  ;;  %v1364_v3 = vmax.f32 %v1356_v39, %v1250_v63  ;;  %v1366_v4 = vmax.f32 %v1358_v40, %v1323_v0  ;;  %v1252_v5 = vpop.f32.mrb[29].mxu1  ;;  %v1325_v6 = vpop.f32.mrb[33].mxu0 }
 0x3a4   : > { %v1550_v7 = vadd.f32 %v1516_v53, %v1470_v60  ;;  %v1552_v8 = vadd.f32 %v1524_v57, %v1482_v62  ;;  %v1365_v11 = vmax.f32 %v1357_v45, %v1252_v5  ;;  %v1367_v12 = vmax.f32 %v1359_v46, %v1325_v6  ;;  %v1254_v15 = vpop.f32.mrb[30].mxu1  ;;  %v1327_v16 = vpop.f32.mrb[34].mxu0 }
 0x3a5   : > { %v1372_v17 = vmax.f32 %v1364_v3, %v1254_v15  ;;  %v1374_v18 = vmax.f32 %v1366_v4, %v1327_v16  ;;  %v1256_v54 = vpop.f32.mrb[31].mxu1  ;;  %v1329_v55 = vpop.f32.mrb[35].mxu0  ;;  %v1531_v60 = vsub.s32 5, %v2314_v14  ;;  %v1528_v6 = vrot.slane %v2322_v30, %v1527_v56 }
 0x3a6   : > { %v1565_v9 = vcombine.low %v1549_v1, %v1550_v7  ;;  %v1566_v10 = vcombine.low %v1551_v2, %v1552_v8  ;;  %v1373_v13 = vmax.f32 %v1365_v11, %v1256_v54  ;;  %v1375_v19 = vmax.f32 %v1367_v12, %v1329_v55 }
 0x3a7   : > { %v1532_v11 = vrot.slane %v2322_v30, %v1531_v60 }
 0x3a8   : > { %v2333_v21 = vrot.slane %v1565_v9, %v2330_v61  ;;  %v2336_v20 = vrot.slane %v1566_v10, %v2330_v61  ;;  %v1535_v9 = vsub.s32 6, %v2314_v14 }
 0x3aa   : > { %v1597_v22 = vcombine.low %v2333_v21, %v2336_v20  ;;  %v1260_v23 = vpop.f32.mrb[32].mxu1  ;;  %v1333_v24 = vpop.f32.mrb[36].mxu0 }
 0x3ab   : > { %v1380_v25 = vmax.f32 %v1372_v17, %v1260_v23  ;;  %v1382_v26 = vmax.f32 %v1374_v18, %v1333_v24  ;;  %v1262_v27 = vpop.f32.mrb[33].mxu1  ;;  %v1335_v28 = vpop.f32.mrb[37].mxu0 }
 0x3ac   : > { %v1381_v52 = vmax.f32 %v1373_v13, %v1262_v27  ;;  %v1383_v29 = vmax.f32 %v1375_v19, %v1335_v28  ;;  %v1264_v31 = vpop.f32.mrb[34].mxu1  ;;  %v1337_v32 = vpop.f32.mrb[38].mxu0  ;;  %v1539_v19 = vsub.s32 7, %v2314_v14  ;;  %v1536_v27 = vrot.slane %v2322_v30, %v1535_v9 }
 0x3ad   : > { %v1388_v33 = vmax.f32 %v1380_v25, %v1264_v31  ;;  %v1390_v34 = vmax.f32 %v1382_v26, %v1337_v32  ;;  %v1266_v35 = vpop.f32.mrb[35].mxu1  ;;  %v1339_v36 = vpop.f32.mrb[39].mxu0 }
 0x3ae   : > { %v1389_v37 = vmax.f32 %v1381_v52, %v1266_v35  ;;  %v1391_v38 = vmax.f32 %v1383_v29, %v1339_v36  ;;  %v1540_v52 = vrot.slane %v2322_v30, %v1539_v19 }
 0x3b2   : > { %v1270_v39 = vpop.f32.mrb[36].mxu1 }
 0x3b3   : > { %v1396_v40 = vmax.f32 %v1388_v33, %v1270_v39  ;;  %v1272_v41 = vpop.f32.mrb[37].mxu1 }
 0x3b4   : > { %v1397_v42 = vmax.f32 %v1389_v37, %v1272_v41  ;;  %v1274_v43 = vpop.f32.mrb[38].mxu1  ;;  %v1605_v37 = vrot.slane %v1597_v22, %v2330_v61 }
 0x3b5   : > { %v1404_v44 = vmax.f32 %v1396_v40, %v1274_v43  ;;  %v1276_v45 = vpop.f32.mrb[39].mxu1 }
 0x3b6   : > { %v1405_v46 = vmax.f32 %v1397_v42, %v1276_v45 }
 0x3b7   : > { %v1483_v47 = vrot.slane %v1404_v44, 4 }
 0x3b8   : > { %v1489_v48 = vrot.slane %v1405_v46, 4 }
 0x3b9   : > { %v1484_v49 = vmax.f32 %v1404_v44, %v1483_v47 }
 0x3ba   : > { %v1490_v50 = vmax.f32 %v1405_v46, %v1489_v48  ;;  %v1343_v51 = vpop.f32.mrb[40].mxu1 }
 0x3bb   : > { %v1485_v53 = vrot.slane %v1484_v49, 2  ;;  %v1398_v57 = vmax.f32 %v1390_v34, %v1343_v51  ;;  %v1345_v58 = vpop.f32.mrb[41].mxu1 }
 0x3bc   : > { %v1491_v59 = vrot.slane %v1490_v50, 2  ;;  %v1399_v62 = vmax.f32 %v1391_v38, %v1345_v58  ;;  %v1347_v63 = vpop.f32.mrb[42].mxu1 }
 0x3bd   : > { %v1486_v0 = vmax.f32 %v1484_v49, %v1485_v53  ;;  %v1406_v1 = vmax.f32 %v1398_v57, %v1347_v63  ;;  %v1349_v2 = vpop.f32.mrb[43].mxu1 }
 0x3be   : > { %v1492_v3 = vmax.f32 %v1490_v50, %v1491_v59  ;;  %v1407_v4 = vmax.f32 %v1399_v62, %v1349_v2 }
 0x3bf   : > { %v1487_v5 = vrot.slane %v1486_v0, 1  ;;  %v1495_v7 = vrot.slane %v1406_v1, 4 }
 0x3c0   : > { %v1493_v8 = vrot.slane %v1492_v3, 1  ;;  %v1501_v12 = vrot.slane %v1407_v4, 4 }
 0x3c1   : > { %v1488_v15 = vmax.f32 %v1486_v0, %v1487_v5  ;;  %v1496_v16 = vmax.f32 %v1406_v1, %v1495_v7 }
 0x3c2   : > { %v1494_v17 = vmax.f32 %v1492_v3, %v1493_v8  ;;  %v1502_v18 = vmax.f32 %v1407_v4, %v1501_v12 }
 0x3c3   : > { %v1553_v54 = vadd.f32 %v1528_v6, %v1488_v15  ;;  %v1497_v55 = vrot.slane %v1496_v16, 2 }
 0x3c4   : > { %v1554_v10 = vadd.f32 %v1532_v11, %v1494_v17  ;;  %v1503_v13 = vrot.slane %v1502_v18, 2 }
 0x3c5   : > { %v1498_v23 = vmax.f32 %v1496_v16, %v1497_v55 }
 0x3c6   : > { %v1567_v24 = vcombine.low %v1553_v54, %v1554_v10  ;;  %v1504_v25 = vmax.f32 %v1502_v18, %v1503_v13 }
 0x3c7   : > { %v1499_v26 = vrot.slane %v1498_v23, 1 }
 0x3c8   : > { %v1505_v28 = vrot.slane %v1504_v25, 1  ;;  %v1589_v35 = vrot.slane %v1567_v24, %v2330_v61 }
 0x3c9   : > { %v1500_v29 = vmax.f32 %v1498_v23, %v1499_v26 }
 0x3ca   : > { %v1506_v31 = vmax.f32 %v1504_v25, %v1505_v28 }
 0x3cb   : > { %v1555_v32 = vadd.f32 %v1536_v27, %v1500_v29 }
 0x3cc   : > { %v1556_v33 = vadd.f32 %v1540_v52, %v1506_v31 }
 0x3ce   : > { %v1568_v34 = vcombine.low %v1555_v32, %v1556_v33 }
 0x3d0   : > { %v1596_v36 = vrot.slane %v1568_v34, %v2330_v61 }
 0x3d2   : > { %v1598_v14 = vcombine.low %v1589_v35, %v1596_v36 }
 0x3d4   : > { %v1612_v38 = vrot.slane %v1598_v14, %v2330_v61 }
 0x3d6   : > { %v1613_v30 = vcombine.low %v1605_v37, %v1612_v38 }
 0x3d8   : > { %1615 = vst [vmem:[%s366_s20] sm:$0xff] %v1613_v30 }
 0x3d9 PF: > { %s18_s29 = sadd.s32 1, %s1919_s29   ;;  %s2377_s27 = smov %s1915_s28 }
 0x3da   : > { %p15_p5 = scmp.ge.s32.totalorder %s18_s29, 4   ;;  %s2378_s28 = smov %s2380_s30 }
 0x3dc   :  { %17 = sbr.rel (!%p15_p5) target bundleno = 2 (0x2), region = 97 }

// kernel: _lambda_.5
= control target key start
LH: loop header
LB: loop body
LE: loop exit
PB: predicated region body
PF: predicated region fallthrough
CT: control target
= control target key end

     0   :  { %v3527_v36 = vmov 1983009808   ;;  %v35_v38 = vlaneseq  ;;  %s4666_s1 = inlined_call_operand.vmem [shape: bf16[1024,512], index: 1, kind: input, shape index: {}]   ;;  %s4667_s0 = inlined_call_operand.vmem [shape: f32[2,1024], index: 0, kind: input, shape index: {}]   ;;  %s4668_s3 = inlined_call_operand.vmem [shape: bf16[512,256], index: 3, kind: input, shape index: {}]   ;;  %s4669_s2 = inlined_call_operand.vmem [shape: f32[1,512], index: 2, kind: input, shape index: {}]   ;;  %s4670_s5 = inlined_call_operand.vmem [shape: bf16[256,128], index: 5, kind: input, shape index: {}]   ;;  %s4671_s4 = inlined_call_operand.vmem [shape: f32[1,256], index: 4, kind: input, shape index: {}]   ;;  %s4672_s6 = inlined_call_operand.vmem [shape: f32[1,128], index: 6, kind: input, shape index: {}]   ;;  %s4673_s7 = inlined_call_operand.vmem [shape: f32[2,128], index: 7, kind: output, shape index: {}]  }
   0x1   :  { %v3029_v0 = vld [vmem:[%s4666_s1 + $0x4] ss:$16 sps:$4 sm:$0xff]   ;;  %v3033_v2 = vld [vmem:[%s4666_s1] ss:$16 sps:$4 sm:$0xff]   ;;  %v33_v37 = vunpack.c.l.s4 %v3527_v36 }
   0x2   :  { %v3031_v1 = vld [vmem:[%s4666_s1 + $0x204] ss:$16 sps:$4 sm:$0xff]   ;;  %1639 = vmatprep.subr.bf16.mxu1 %v3029_v0  ;;  %v3034_v3 = vld [vmem:[%s4666_s1 + $0x200] ss:$16 sps:$4 sm:$0xff]   ;;  %v3685_v43 = vshrl.u32 %v35_v38, 7 }
   0x3   :  { %1680 = vmatprep.subr.bf16.mxu0 %v3031_v1  ;;  %v3035_v4 = vld [vmem:[%s4666_s1 + $0x24] ss:$16 sps:$4 sm:$0xff]   ;;  %1640 = vmatpush1.bf16.msra.mxu1 %v3033_v2  ;;  %v3039_v6 = vld [vmem:[%s4666_s1 + $0x20] ss:$16 sps:$4 sm:$0xff]   ;;  %v34_v42 = vunpack.c.0.s8 %v33_v37  ;;  %v3156_v37 = vld [vmem:[%s4666_s1 + $0x8c] ss:$16 sps:$4 sm:$0xff]  }
   0x4   :  { %1681 = vmatpush1.bf16.msra.mxu0 %v3034_v3  ;;  %v3037_v5 = vld [vmem:[%s4666_s1 + $0x224] ss:$16 sps:$4 sm:$0xff]   ;;  %1641 = vmatprep.subr.bf16.mxu1 %v3035_v4  ;;  %v3040_v7 = vld [vmem:[%s4666_s1 + $0x220] ss:$16 sps:$4 sm:$0xff]  }
   0x5   :  { %1682 = vmatprep.subr.bf16.mxu0 %v3037_v5  ;;  %v3041_v8 = vld [vmem:[%s4666_s1 + $0x44] ss:$16 sps:$4 sm:$0xff]   ;;  %v3045_v10 = vld [vmem:[%s4666_s1 + $0x40] ss:$16 sps:$4 sm:$0xff]   ;;  %v3703_v49 = vsub.s32 %v34_v42, %v3685_v43 }
   0x6   :  { %v3043_v9 = vld [vmem:[%s4666_s1 + $0x244] ss:$16 sps:$4 sm:$0xff]   ;;  %v3046_v11 = vld [vmem:[%s4666_s1 + $0x240] ss:$16 sps:$4 sm:$0xff]  }
   0x7   :  { %1642 = vmatpush1.bf16.msra.mxu1 %v3039_v6  ;;  %v3047_v12 = vld [vmem:[%s4666_s1 + $0x64] ss:$16 sps:$4 sm:$0xff]   ;;  %v3051_v14 = vld [vmem:[%s4666_s1 + $0x60] ss:$16 sps:$4 sm:$0xff]  }
   0x8   :  { %1683 = vmatpush1.bf16.msra.mxu0 %v3040_v7  ;;  %1643 = vmatprep.subr.bf16.mxu1 %v3041_v8  ;;  %v3049_v13 = vld [vmem:[%s4666_s1 + $0x264] ss:$16 sps:$4 sm:$0xff]   ;;  %v3052_v15 = vld [vmem:[%s4666_s1 + $0x260] ss:$16 sps:$4 sm:$0xff]   ;;  %v3758_v8 = vld [vmem:[%s4667_s0 + $0x8] sm:$0xff] }
   0x9   :  { %1684 = vmatprep.subr.bf16.mxu0 %v3043_v9  ;;  %v3053_v16 = vld [vmem:[%s4666_s1 + $0x84] ss:$16 sps:$4 sm:$0xff]   ;;  %v3057_v18 = vld [vmem:[%s4666_s1 + $0x80] ss:$16 sps:$4 sm:$0xff]  }
   0xa   :  { %v3055_v17 = vld [vmem:[%s4666_s1 + $0x284] ss:$16 sps:$4 sm:$0xff]   ;;  %v3058_v19 = vld [vmem:[%s4666_s1 + $0x280] ss:$16 sps:$4 sm:$0xff]  }
   0xb   :  { %1644 = vmatpush1.bf16.msra.mxu1 %v3045_v10  ;;  %v3059_v20 = vld [vmem:[%s4666_s1 + $0xa4] ss:$16 sps:$4 sm:$0xff]   ;;  %v3063_v22 = vld [vmem:[%s4666_s1 + $0xa0] ss:$16 sps:$4 sm:$0xff]  }
   0xc   :  { %1685 = vmatpush1.bf16.msra.mxu0 %v3046_v11  ;;  %1645 = vmatprep.subr.bf16.mxu1 %v3047_v12  ;;  %v3061_v21 = vld [vmem:[%s4666_s1 + $0x2a4] ss:$16 sps:$4 sm:$0xff]   ;;  %v3064_v23 = vld [vmem:[%s4666_s1 + $0x2a0] ss:$16 sps:$4 sm:$0xff]  }
   0xd   :  { %1686 = vmatprep.subr.bf16.mxu0 %v3049_v13  ;;  %v3065_v24 = vld [vmem:[%s4666_s1 + $0xc4] ss:$16 sps:$4 sm:$0xff]   ;;  %v3069_v26 = vld [vmem:[%s4666_s1 + $0xc0] ss:$16 sps:$4 sm:$0xff]   ;;  %v3774_v13 = vrot.slane %v3758_v8, %v3703_v49 }
   0xe   :  { %v3067_v25 = vld [vmem:[%s4666_s1 + $0x2c4] ss:$16 sps:$4 sm:$0xff]   ;;  %v3070_v27 = vld [vmem:[%s4666_s1 + $0x2c0] ss:$16 sps:$4 sm:$0xff]  }
   0xf   :  { %1646 = vmatpush1.bf16.msra.mxu1 %v3051_v14  ;;  %v3071_v28 = vld [vmem:[%s4666_s1 + $0xe4] ss:$16 sps:$4 sm:$0xff]   ;;  %v3075_v30 = vld [vmem:[%s4666_s1 + $0xe0] ss:$16 sps:$4 sm:$0xff]  }
  0x10   :  { %1687 = vmatpush1.bf16.msra.mxu0 %v3052_v15  ;;  %1647 = vmatprep.subr.bf16.mxu1 %v3053_v16  ;;  %v3073_v29 = vld [vmem:[%s4666_s1 + $0x2e4] ss:$16 sps:$4 sm:$0xff]   ;;  %v3076_v31 = vld [vmem:[%s4666_s1 + $0x2e0] ss:$16 sps:$4 sm:$0xff]  }
  0x11   :  { %1688 = vmatprep.subr.bf16.mxu0 %v3055_v17  ;;  %v3077_v32 = vld [vmem:[%s4666_s1 + $0x104] ss:$16 sps:$4 sm:$0xff]   ;;  %v3081_v34 = vld [vmem:[%s4666_s1 + $0x100] ss:$16 sps:$4 sm:$0xff]   ;;  %v3132_v17 = vld [vmem:[%s4666_s1 + $0xc] ss:$16 sps:$4 sm:$0xff]  }
  0x12   :  { %v3079_v33 = vld [vmem:[%s4666_s1 + $0x304] ss:$16 sps:$4 sm:$0xff]   ;;  %v3082_v35 = vld [vmem:[%s4666_s1 + $0x300] ss:$16 sps:$4 sm:$0xff]  }
  0x13   :  { %1648 = vmatpush1.bf16.msra.mxu1 %v3057_v18  ;;  %v3083_v39 = vld [vmem:[%s4666_s1 + $0x124] ss:$16 sps:$4 sm:$0xff]   ;;  %v3087_v41 = vld [vmem:[%s4666_s1 + $0x120] ss:$16 sps:$4 sm:$0xff]   ;;  %v63_v18 = vcombine.high %v3774_v13, %v3774_v13 }
  0x14   :  { %1689 = vmatpush1.bf16.msra.mxu0 %v3058_v19  ;;  %1649 = vmatprep.subr.bf16.mxu1 %v3059_v20  ;;  %v3085_v40 = vld [vmem:[%s4666_s1 + $0x324] ss:$16 sps:$4 sm:$0xff]   ;;  %v3088_v44 = vld [vmem:[%s4666_s1 + $0x320] ss:$16 sps:$4 sm:$0xff]  }
  0x15   :  { %1690 = vmatprep.subr.bf16.mxu0 %v3061_v21  ;;  %v3089_v45 = vld [vmem:[%s4666_s1 + $0x144] ss:$16 sps:$4 sm:$0xff]   ;;  %v3093_v47 = vld [vmem:[%s4666_s1 + $0x140] ss:$16 sps:$4 sm:$0xff]  }
  0x16   :  { %v3091_v46 = vld [vmem:[%s4666_s1 + $0x344] ss:$16 sps:$4 sm:$0xff]   ;;  %v3094_v48 = vld [vmem:[%s4666_s1 + $0x340] ss:$16 sps:$4 sm:$0xff]  }
  0x17   :  { %1650 = vmatpush1.bf16.msra.mxu1 %v3063_v22  ;;  %v3095_v50 = vld [vmem:[%s4666_s1 + $0x164] ss:$16 sps:$4 sm:$0xff]   ;;  %v3099_v55 = vld [vmem:[%s4666_s1 + $0x160] ss:$16 sps:$4 sm:$0xff]   ;;  %v3130_v22 = vld [vmem:[%s4666_s1 + $0x8] ss:$16 sps:$4 sm:$0xff]  }
  0x18   :  { %1691 = vmatpush1.bf16.msra.mxu0 %v3064_v23  ;;  %1651 = vmatprep.subr.bf16.mxu1 %v3065_v24  ;;  %v3097_v51 = vld [vmem:[%s4666_s1 + $0x364] ss:$16 sps:$4 sm:$0xff]   ;;  %v3100_v56 = vld [vmem:[%s4666_s1 + $0x360] ss:$16 sps:$4 sm:$0xff]   ;;  %v3138_v24 = vld [vmem:[%s4666_s1 + $0x2c] ss:$16 sps:$4 sm:$0xff]  }
  0x19   :  { %1692 = vmatprep.subr.bf16.mxu0 %v3067_v25  ;;  %v27_v52 = vld [vmem:[%s4667_s0] sm:$0xff]  ;;  %v3806_v25 = vpack.c.bf16 %v63_v18, %v63_v18  ;;  %v3216_v18 = vld [vmem:[%s4666_s1 + $0x1cc] ss:$16 sps:$4 sm:$0xff]  }
  0x1a   :  { %v38_v53 = vrot.slane %v27_v52, %v3703_v49  ;;  %v31_v54 = vcombine.high %v27_v52, %v27_v52  ;;  %v3101_v57 = vld [vmem:[%s4666_s1 + $0x184] ss:$16 sps:$4 sm:$0xff]   ;;  %v3105_v63 = vld [vmem:[%s4666_s1 + $0x180] ss:$16 sps:$4 sm:$0xff]  }
  0x1b   :  { %1652 = vmatpush1.bf16.msra.mxu1 %v3069_v26  ;;  %v3103_v58 = vld [vmem:[%s4666_s1 + $0x384] ss:$16 sps:$4 sm:$0xff]   ;;  %v3106_v0 = vld [vmem:[%s4666_s1 + $0x380] ss:$16 sps:$4 sm:$0xff]  }
  0x1c   :  { %1693 = vmatpush1.bf16.msra.mxu0 %v3070_v27  ;;  %1653 = vmatprep.subr.bf16.mxu1 %v3071_v28  ;;  %v46_v59 = vcombine.high %v38_v53, %v38_v53  ;;  %v45_v60 = vrot.slane %v31_v54, %v3703_v49  ;;  %v3107_v1 = vld [vmem:[%s4666_s1 + $0x1a4] ss:$16 sps:$4 sm:$0xff]   ;;  %v3111_v4 = vld [vmem:[%s4666_s1 + $0x1a0] ss:$16 sps:$4 sm:$0xff]   ;;  %v3790_v19 = vpack.c.bf16 %v38_v53, %v38_v53  ;;  %v3136_v27 = vld [vmem:[%s4666_s1 + $0x28] ss:$16 sps:$4 sm:$0xff]  }
  0x1d   :  { %1694 = vmatprep.subr.bf16.mxu0 %v3073_v29  ;;  %v3109_v2 = vld [vmem:[%s4666_s1 + $0x3a4] ss:$16 sps:$4 sm:$0xff]   ;;  %v3112_v5 = vld [vmem:[%s4666_s1 + $0x3a0] ss:$16 sps:$4 sm:$0xff]   ;;  %v3144_v29 = vld [vmem:[%s4666_s1 + $0x4c] ss:$16 sps:$4 sm:$0xff]  }
  0x1e   :  { %v74_v61 = vpack.c.bf16 %v46_v59, %v46_v59  ;;  %v47_v62 = vcombine.high %v45_v60, %v45_v60  ;;  %v3113_v6 = vld [vmem:[%s4666_s1 + $0x1c4] ss:$16 sps:$4 sm:$0xff]   ;;  %v3117_v9 = vld [vmem:[%s4666_s1 + $0x1c0] ss:$16 sps:$4 sm:$0xff]   ;;  %v3792_v20 = vpack.c.bf16 %v45_v60, %v45_v60  ;;  %v3172_v53 = vld [vmem:[%s4666_s1 + $0xe8] ss:$16 sps:$4 sm:$0xff]  }
  0x1f   :  { %1654 = vmatpush1.bf16.msra.mxu1 %v3075_v30  ;;  %v3115_v7 = vld [vmem:[%s4666_s1 + $0x3c4] ss:$16 sps:$4 sm:$0xff]   ;;  %v3118_v10 = vld [vmem:[%s4666_s1 + $0x3c0] ss:$16 sps:$4 sm:$0xff]   ;;  %v3186_v59 = vld [vmem:[%s4666_s1 + $0x12c] ss:$16 sps:$4 sm:$0xff]  }
  0x20   :  { %1695 = vmatpush1.bf16.msra.mxu0 %v3076_v31  ;;  %1655 = vmatprep.subr.bf16.mxu1 %v3077_v32  ;;  %v3740_v3 = vpack.c.bf16 %v47_v62, %v47_v62  ;;  %v3119_v11 = vld [vmem:[%s4666_s1 + $0x1e4] ss:$16 sps:$4 sm:$0xff]   ;;  %v3123_v14 = vld [vmem:[%s4666_s1 + $0x1e0] ss:$16 sps:$4 sm:$0xff]   ;;  %v3142_v31 = vld [vmem:[%s4666_s1 + $0x48] ss:$16 sps:$4 sm:$0xff]  }
  0x21   :  { %1696 = vmatprep.subr.bf16.mxu0 %v3079_v33  ;;  %1671 = vmatprep.mubr.bf16.mxu1 %v74_v61  ;;  %v3121_v12 = vld [vmem:[%s4666_s1 + $0x3e4] ss:$16 sps:$4 sm:$0xff]   ;;  %v3124_v15 = vld [vmem:[%s4666_s1 + $0x3e0] ss:$16 sps:$4 sm:$0xff]   ;;  %v3150_v33 = vld [vmem:[%s4666_s1 + $0x6c] ss:$16 sps:$4 sm:$0xff]  }
  0x22   :  { %1712 = vmatprep.mubr.bf16.mxu0 %v3740_v3  ;;  %v3129_v16 = vld [vmem:[%s4666_s1 + $0x404] ss:$16 sps:$4 sm:$0xff]   ;;  %v3127_v21 = vld [vmem:[%s4666_s1 + $0x400] ss:$16 sps:$4 sm:$0xff]  }
  0x23   :  { %1656 = vmatpush1.bf16.msra.mxu1 %v3081_v34  ;;  %v3135_v23 = vld [vmem:[%s4666_s1 + $0x424] ss:$16 sps:$4 sm:$0xff]   ;;  %v3133_v26 = vld [vmem:[%s4666_s1 + $0x420] ss:$16 sps:$4 sm:$0xff]  }
  0x24   :  { %1697 = vmatpush1.bf16.msra.mxu0 %v3082_v35  ;;  %1657 = vmatprep.subr.bf16.mxu1 %v3083_v39  ;;  %v3141_v28 = vld [vmem:[%s4666_s1 + $0x444] ss:$16 sps:$4 sm:$0xff]   ;;  %v3139_v30 = vld [vmem:[%s4666_s1 + $0x440] ss:$16 sps:$4 sm:$0xff]   ;;  %v3148_v35 = vld [vmem:[%s4666_s1 + $0x68] ss:$16 sps:$4 sm:$0xff]  }
  0x25   :  { %1698 = vmatprep.subr.bf16.mxu0 %v3085_v40  ;;  %v3147_v32 = vld [vmem:[%s4666_s1 + $0x464] ss:$16 sps:$4 sm:$0xff]   ;;  %v3145_v34 = vld [vmem:[%s4666_s1 + $0x460] ss:$16 sps:$4 sm:$0xff]   ;;  %v3154_v39 = vld [vmem:[%s4666_s1 + $0x88] ss:$16 sps:$4 sm:$0xff]  }
  0x26   :  { %v3153_v36 = vld [vmem:[%s4666_s1 + $0x484] ss:$16 sps:$4 sm:$0xff]   ;;  %v3151_v38 = vld [vmem:[%s4666_s1 + $0x480] ss:$16 sps:$4 sm:$0xff]  }
  0x27   :  { %1658 = vmatpush1.bf16.msra.mxu1 %v3087_v41  ;;  %v3159_v40 = vld [vmem:[%s4666_s1 + $0x4a4] ss:$16 sps:$4 sm:$0xff]   ;;  %v3162_v41 = vld [vmem:[%s4666_s1 + $0xac] ss:$16 sps:$4 sm:$0xff]   ;;  %v3157_v42 = vld [vmem:[%s4666_s1 + $0x4a0] ss:$16 sps:$4 sm:$0xff]  }
  0x28   :  { %1699 = vmatpush1.bf16.msra.mxu0 %v3088_v44  ;;  %1659 = vmatprep.subr.bf16.mxu1 %v3089_v45  ;;  %v3160_v44 = vld [vmem:[%s4666_s1 + $0xa8] ss:$16 sps:$4 sm:$0xff]   ;;  %v3165_v45 = vld [vmem:[%s4666_s1 + $0x4c4] ss:$16 sps:$4 sm:$0xff]   ;;  %v3169_v52 = vld [vmem:[%s4666_s1 + $0x4e0] ss:$16 sps:$4 sm:$0xff]  }
  0x29   :  { %1700 = vmatprep.subr.bf16.mxu0 %v3091_v46  ;;  %v3168_v46 = vld [vmem:[%s4666_s1 + $0xcc] ss:$16 sps:$4 sm:$0xff]   ;;  %v3177_v54 = vld [vmem:[%s4666_s1 + $0x504] ss:$16 sps:$4 sm:$0xff]   ;;  %v3181_v60 = vld [vmem:[%s4666_s1 + $0x520] ss:$16 sps:$4 sm:$0xff]  }
  0x2a   :  { %v3189_v62 = vld [vmem:[%s4666_s1 + $0x544] ss:$16 sps:$4 sm:$0xff]  }
  0x2b   :  { %1660 = vmatpush1.bf16.msra.mxu1 %v3093_v47  ;;  %v3163_v47 = vld [vmem:[%s4666_s1 + $0x4c0] ss:$16 sps:$4 sm:$0xff]  }
  0x2c   :  { %1701 = vmatpush1.bf16.msra.mxu0 %v3094_v48  ;;  %1661 = vmatprep.subr.bf16.mxu1 %v3095_v50  ;;  %v3166_v48 = vld [vmem:[%s4666_s1 + $0xc8] ss:$16 sps:$4 sm:$0xff]   ;;  %v3171_v50 = vld [vmem:[%s4666_s1 + $0x4e4] ss:$16 sps:$4 sm:$0xff]  }
  0x2d   :  { %1702 = vmatprep.subr.bf16.mxu0 %v3097_v51  ;;  %v3174_v51 = vld [vmem:[%s4666_s1 + $0xec] ss:$16 sps:$4 sm:$0xff]  }
  0x2f   :  { %1662 = vmatpush1.bf16.msra.mxu1 %v3099_v55  ;;  %v3180_v55 = vld [vmem:[%s4666_s1 + $0x10c] ss:$16 sps:$4 sm:$0xff]  }
  0x30   :  { %1703 = vmatpush1.bf16.msra.mxu0 %v3100_v56  ;;  %1663 = vmatprep.subr.bf16.mxu1 %v3101_v57  ;;  %v3175_v56 = vld [vmem:[%s4666_s1 + $0x500] ss:$16 sps:$4 sm:$0xff]   ;;  %v3178_v57 = vld [vmem:[%s4666_s1 + $0x108] ss:$16 sps:$4 sm:$0xff]  }
  0x31   :  { %1704 = vmatprep.subr.bf16.mxu0 %v3103_v58  ;;  %v3183_v58 = vld [vmem:[%s4666_s1 + $0x524] ss:$16 sps:$4 sm:$0xff]  }
  0x33   :  { %1664 = vmatpush1.bf16.msra.mxu1 %v3105_v63  ;;  %v3192_v63 = vld [vmem:[%s4666_s1 + $0x14c] ss:$16 sps:$4 sm:$0xff]  }
  0x34   :  { %1705 = vmatpush1.bf16.msra.mxu0 %v3106_v0  ;;  %1665 = vmatprep.subr.bf16.mxu1 %v3107_v1  ;;  %v3187_v0 = vld [vmem:[%s4666_s1 + $0x540] ss:$16 sps:$4 sm:$0xff]   ;;  %v3190_v1 = vld [vmem:[%s4666_s1 + $0x148] ss:$16 sps:$4 sm:$0xff]  }
  0x35   :  { %1706 = vmatprep.subr.bf16.mxu0 %v3109_v2  ;;  %v3195_v2 = vld [vmem:[%s4666_s1 + $0x564] ss:$16 sps:$4 sm:$0xff]  }
  0x37   :  { %1666 = vmatpush1.bf16.msra.mxu1 %v3111_v4  ;;  %v3198_v4 = vld [vmem:[%s4666_s1 + $0x16c] ss:$16 sps:$4 sm:$0xff]  }
  0x38   :  { %1707 = vmatpush1.bf16.msra.mxu0 %v3112_v5  ;;  %1667 = vmatprep.subr.bf16.mxu1 %v3113_v6  ;;  %v3193_v5 = vld [vmem:[%s4666_s1 + $0x560] ss:$16 sps:$4 sm:$0xff]   ;;  %v3196_v6 = vld [vmem:[%s4666_s1 + $0x168] ss:$16 sps:$4 sm:$0xff]  }
  0x39   :  { %1708 = vmatprep.subr.bf16.mxu0 %v3115_v7  ;;  %v3201_v7 = vld [vmem:[%s4666_s1 + $0x584] ss:$16 sps:$4 sm:$0xff]  }
  0x3b   :  { %1668 = vmatpush1.bf16.msra.mxu1 %v3117_v9  ;;  %v3204_v9 = vld [vmem:[%s4666_s1 + $0x18c] ss:$16 sps:$4 sm:$0xff]  }
  0x3c   :  { %1709 = vmatpush1.bf16.msra.mxu0 %v3118_v10  ;;  %1669 = vmatprep.subr.bf16.mxu1 %v3119_v11  ;;  %v3199_v10 = vld [vmem:[%s4666_s1 + $0x580] ss:$16 sps:$4 sm:$0xff]   ;;  %v3202_v11 = vld [vmem:[%s4666_s1 + $0x188] ss:$16 sps:$4 sm:$0xff]  }
  0x3d   :  { %1710 = vmatprep.subr.bf16.mxu0 %v3121_v12  ;;  %v3207_v12 = vld [vmem:[%s4666_s1 + $0x5a4] ss:$16 sps:$4 sm:$0xff]  }
  0x3f   :  { %1670 = vmatpush1.bf16.msra.mxu1 %v3123_v14  ;;  %v3210_v14 = vld [vmem:[%s4666_s1 + $0x1ac] ss:$16 sps:$4 sm:$0xff]  }
  0x40   :  { %1711 = vmatpush1.bf16.msra.mxu0 %v3124_v15  ;;  %1803 = vmatprep.subr.bf16.mxu1 %v3132_v17  ;;  %v3205_v15 = vld [vmem:[%s4666_s1 + $0x5a0] ss:$16 sps:$4 sm:$0xff]   ;;  %v3213_v17 = vld [vmem:[%s4666_s1 + $0x5c4] ss:$16 sps:$4 sm:$0xff]  }
  0x41   :  { %1721 = vmatprep.subr.bf16.mxu0 %v3129_v16  ;;  %v3208_v16 = vld [vmem:[%s4666_s1 + $0x1a8] ss:$16 sps:$4 sm:$0xff]  }
  0x42   :  { %1672 = vmatmul.mubr.bf16.vlgmr.msra.gmra.mrb[0].mxu1 %v3790_v19 }
  0x43   :  { %1713 = vmatmul.mubr.bf16.vlgmr.msra.gmra.mrb[0].mxu0 %v3792_v20  ;;  %1804 = vmatpush1.bf16.msra.mxu1 %v3130_v22  ;;  %v3211_v22 = vld [vmem:[%s4666_s1 + $0x5c0] ss:$16 sps:$4 sm:$0xff]  }
  0x44   :  { %1722 = vmatpush1.bf16.msra.mxu0 %v3127_v21  ;;  %1805 = vmatprep.subr.bf16.mxu1 %v3138_v24  ;;  %v48_v21 = vcombine.high %v3758_v8, %v3758_v8  ;;  %v3219_v24 = vld [vmem:[%s4666_s1 + $0x5e4] ss:$16 sps:$4 sm:$0xff]   ;;  %v3222_v8 = vld [vmem:[%s4666_s1 + $0x1ec] ss:$16 sps:$4 sm:$0xff]  }
  0x45   :  { %1723 = vmatprep.subr.bf16.mxu0 %v3135_v23  ;;  %1753 = vmatprep.mubr.bf16.mxu0 %v3806_v25  ;;  %v3214_v23 = vld [vmem:[%s4666_s1 + $0x1c8] ss:$16 sps:$4 sm:$0xff]  }
  0x46   :  { %1835 = vmatprep.mubr.bf16.mxu1 %v74_v61  ;;  %v3184_v61 = vld [vmem:[%s4666_s1 + $0x128] ss:$16 sps:$4 sm:$0xff]  }
  0x47   :  { %1806 = vmatpush1.bf16.msra.mxu1 %v3136_v27  ;;  %v3217_v27 = vld [vmem:[%s4666_s1 + $0x5e0] ss:$16 sps:$4 sm:$0xff]  }
  0x48   :  { %1724 = vmatpush1.bf16.msra.mxu0 %v3133_v26  ;;  %1807 = vmatprep.subr.bf16.mxu1 %v3144_v29  ;;  %v3982_v26 = vrot.slane %v48_v21, %v3703_v49  ;;  %v3225_v29 = vld [vmem:[%s4666_s1 + $0x604] ss:$16 sps:$4 sm:$0xff]   ;;  %v3228_v49 = vld [vmem:[%s4666_s1 + $0x20c] ss:$16 sps:$4 sm:$0xff]   ;;  %v3295_v21 = vld [vmem:[%s4666_s1 + $0x780] ss:$16 sps:$4 sm:$0xff]  }
  0x49   :  { %1725 = vmatprep.subr.bf16.mxu0 %v3141_v28  ;;  %v3220_v28 = vld [vmem:[%s4666_s1 + $0x1e8] ss:$16 sps:$4 sm:$0xff]  }
  0x4b   :  { %1808 = vmatpush1.bf16.msra.mxu1 %v3142_v31  ;;  %v4000_v31 = vpack.c.bf16 %v3774_v13, %v3774_v13  ;;  %v3234_v13 = vld [vmem:[%s4666_s1 + $0x22c] ss:$16 sps:$4 sm:$0xff]  }
  0x4c   :  { %1726 = vmatpush1.bf16.msra.mxu0 %v3139_v30  ;;  %1809 = vmatprep.subr.bf16.mxu1 %v3150_v33  ;;  %v64_v30 = vcombine.high %v3982_v26, %v3982_v26  ;;  %v3226_v33 = vld [vmem:[%s4666_s1 + $0x208] ss:$16 sps:$4 sm:$0xff]  }
  0x4d   :  { %1727 = vmatprep.subr.bf16.mxu0 %v3147_v32  ;;  %v3223_v32 = vld [vmem:[%s4666_s1 + $0x600] ss:$16 sps:$4 sm:$0xff]  }
  0x4f   :  { %1810 = vmatpush1.bf16.msra.mxu1 %v3148_v35  ;;  %v4014_v35 = vpack.c.bf16 %v64_v30, %v64_v30  ;;  %v3310_v30 = vld [vmem:[%s4666_s1 + $0x3c8] ss:$16 sps:$4 sm:$0xff]  }
  0x50   :  { %1728 = vmatpush1.bf16.msra.mxu0 %v3145_v34  ;;  %1811 = vmatprep.subr.bf16.mxu1 %v3156_v37  ;;  %v3231_v34 = vld [vmem:[%s4666_s1 + $0x624] ss:$16 sps:$4 sm:$0xff]   ;;  %v3232_v37 = vld [vmem:[%s4666_s1 + $0x228] ss:$16 sps:$4 sm:$0xff]  }
  0x51   :  { %1729 = vmatprep.subr.bf16.mxu0 %v3153_v36  ;;  %v3229_v36 = vld [vmem:[%s4666_s1 + $0x620] ss:$16 sps:$4 sm:$0xff]  }
  0x53   :  { %1812 = vmatpush1.bf16.msra.mxu1 %v3154_v39  ;;  %v3235_v39 = vld [vmem:[%s4666_s1 + $0x640] ss:$16 sps:$4 sm:$0xff]  }
  0x54   :  { %1730 = vmatpush1.bf16.msra.mxu0 %v3151_v38  ;;  %1813 = vmatprep.subr.bf16.mxu1 %v3162_v41  ;;  %v3237_v38 = vld [vmem:[%s4666_s1 + $0x644] ss:$16 sps:$4 sm:$0xff]  }
  0x55   :  { %1731 = vmatprep.subr.bf16.mxu0 %v3159_v40  ;;  %v3238_v40 = vld [vmem:[%s4666_s1 + $0x248] ss:$16 sps:$4 sm:$0xff]   ;;  %v3243_v41 = vld [vmem:[%s4666_s1 + $0x664] ss:$16 sps:$4 sm:$0xff]  }
  0x57   :  { %1814 = vmatpush1.bf16.msra.mxu1 %v3160_v44  ;;  %v3244_v44 = vld [vmem:[%s4666_s1 + $0x268] ss:$16 sps:$4 sm:$0xff]  }
  0x58   :  { %1732 = vmatpush1.bf16.msra.mxu0 %v3157_v42  ;;  %1815 = vmatprep.subr.bf16.mxu1 %v3168_v46  ;;  %v3241_v42 = vld [vmem:[%s4666_s1 + $0x660] ss:$16 sps:$4 sm:$0xff]   ;;  %v3252_v46 = vld [vmem:[%s4666_s1 + $0x28c] ss:$16 sps:$4 sm:$0xff]  }
  0x59   :  { %1733 = vmatprep.subr.bf16.mxu0 %v3165_v45  ;;  %v3249_v45 = vld [vmem:[%s4666_s1 + $0x684] ss:$16 sps:$4 sm:$0xff]  }
  0x5b   :  { %1816 = vmatpush1.bf16.msra.mxu1 %v3166_v48  ;;  %v3250_v48 = vld [vmem:[%s4666_s1 + $0x288] ss:$16 sps:$4 sm:$0xff]  }
  0x5c   :  { %1734 = vmatpush1.bf16.msra.mxu0 %v3163_v47  ;;  %1817 = vmatprep.subr.bf16.mxu1 %v3174_v51  ;;  %v3247_v47 = vld [vmem:[%s4666_s1 + $0x680] ss:$16 sps:$4 sm:$0xff]   ;;  %v3258_v51 = vld [vmem:[%s4666_s1 + $0x2ac] ss:$16 sps:$4 sm:$0xff]  }
  0x5d   :  { %1735 = vmatprep.subr.bf16.mxu0 %v3171_v50  ;;  %v3255_v50 = vld [vmem:[%s4666_s1 + $0x6a4] ss:$16 sps:$4 sm:$0xff]  }
  0x5f   :  { %1818 = vmatpush1.bf16.msra.mxu1 %v3172_v53  ;;  %v3256_v53 = vld [vmem:[%s4666_s1 + $0x2a8] ss:$16 sps:$4 sm:$0xff]  }
  0x60   :  { %1736 = vmatpush1.bf16.msra.mxu0 %v3169_v52  ;;  %1819 = vmatprep.subr.bf16.mxu1 %v3180_v55  ;;  %v3253_v52 = vld [vmem:[%s4666_s1 + $0x6a0] ss:$16 sps:$4 sm:$0xff]   ;;  %v3264_v55 = vld [vmem:[%s4666_s1 + $0x2cc] ss:$16 sps:$4 sm:$0xff]  }
  0x61   :  { %1737 = vmatprep.subr.bf16.mxu0 %v3177_v54  ;;  %v3261_v54 = vld [vmem:[%s4666_s1 + $0x6c4] ss:$16 sps:$4 sm:$0xff]  }
  0x63   :  { %1820 = vmatpush1.bf16.msra.mxu1 %v3178_v57  ;;  %v3262_v57 = vld [vmem:[%s4666_s1 + $0x2c8] ss:$16 sps:$4 sm:$0xff]  }
  0x64   :  { %1738 = vmatpush1.bf16.msra.mxu0 %v3175_v56  ;;  %1821 = vmatprep.subr.bf16.mxu1 %v3186_v59  ;;  %v3259_v56 = vld [vmem:[%s4666_s1 + $0x6c0] ss:$16 sps:$4 sm:$0xff]   ;;  %v3270_v59 = vld [vmem:[%s4666_s1 + $0x2ec] ss:$16 sps:$4 sm:$0xff]  }
  0x65   :  { %1739 = vmatprep.subr.bf16.mxu0 %v3183_v58  ;;  %v3267_v58 = vld [vmem:[%s4666_s1 + $0x6e4] ss:$16 sps:$4 sm:$0xff]  }
  0x67   :  { %1822 = vmatpush1.bf16.msra.mxu1 %v3184_v61  ;;  %v3268_v61 = vld [vmem:[%s4666_s1 + $0x2e8] ss:$16 sps:$4 sm:$0xff]  }
  0x68   :  { %1740 = vmatpush1.bf16.msra.mxu0 %v3181_v60  ;;  %1823 = vmatprep.subr.bf16.mxu1 %v3192_v63  ;;  %v3265_v60 = vld [vmem:[%s4666_s1 + $0x6e0] ss:$16 sps:$4 sm:$0xff]   ;;  %v3276_v63 = vld [vmem:[%s4666_s1 + $0x30c] ss:$16 sps:$4 sm:$0xff]  }
  0x69   :  { %1741 = vmatprep.subr.bf16.mxu0 %v3189_v62  ;;  %v3273_v62 = vld [vmem:[%s4666_s1 + $0x704] ss:$16 sps:$4 sm:$0xff]  }
  0x6b   :  { %1824 = vmatpush1.bf16.msra.mxu1 %v3190_v1  ;;  %v3274_v1 = vld [vmem:[%s4666_s1 + $0x308] ss:$16 sps:$4 sm:$0xff]  }
  0x6c   :  { %1742 = vmatpush1.bf16.msra.mxu0 %v3187_v0  ;;  %1825 = vmatprep.subr.bf16.mxu1 %v3198_v4  ;;  %v3271_v0 = vld [vmem:[%s4666_s1 + $0x700] ss:$16 sps:$4 sm:$0xff]   ;;  %v3282_v4 = vld [vmem:[%s4666_s1 + $0x32c] ss:$16 sps:$4 sm:$0xff]  }
  0x6d   :  { %1743 = vmatprep.subr.bf16.mxu0 %v3195_v2  ;;  %v3279_v2 = vld [vmem:[%s4666_s1 + $0x724] ss:$16 sps:$4 sm:$0xff]  }
  0x6f   :  { %1826 = vmatpush1.bf16.msra.mxu1 %v3196_v6  ;;  %v3280_v6 = vld [vmem:[%s4666_s1 + $0x328] ss:$16 sps:$4 sm:$0xff]  }
  0x70   :  { %1744 = vmatpush1.bf16.msra.mxu0 %v3193_v5  ;;  %1827 = vmatprep.subr.bf16.mxu1 %v3204_v9  ;;  %v3277_v5 = vld [vmem:[%s4666_s1 + $0x720] ss:$16 sps:$4 sm:$0xff]   ;;  %v3288_v9 = vld [vmem:[%s4666_s1 + $0x34c] ss:$16 sps:$4 sm:$0xff]  }
  0x71   :  { %1745 = vmatprep.subr.bf16.mxu0 %v3201_v7  ;;  %v3285_v7 = vld [vmem:[%s4666_s1 + $0x744] ss:$16 sps:$4 sm:$0xff]  }
  0x73   :  { %1828 = vmatpush1.bf16.msra.mxu1 %v3202_v11  ;;  %v3286_v11 = vld [vmem:[%s4666_s1 + $0x348] ss:$16 sps:$4 sm:$0xff]  }
  0x74   :  { %1746 = vmatpush1.bf16.msra.mxu0 %v3199_v10  ;;  %1829 = vmatprep.subr.bf16.mxu1 %v3210_v14  ;;  %v3283_v10 = vld [vmem:[%s4666_s1 + $0x740] ss:$16 sps:$4 sm:$0xff]   ;;  %v3294_v14 = vld [vmem:[%s4666_s1 + $0x36c] ss:$16 sps:$4 sm:$0xff]  }
  0x75   :  { %1747 = vmatprep.subr.bf16.mxu0 %v3207_v12  ;;  %v3291_v12 = vld [vmem:[%s4666_s1 + $0x764] ss:$16 sps:$4 sm:$0xff]  }
  0x77   :  { %1830 = vmatpush1.bf16.msra.mxu1 %v3208_v16  ;;  %v3292_v16 = vld [vmem:[%s4666_s1 + $0x368] ss:$16 sps:$4 sm:$0xff]  }
  0x78   :  { %1748 = vmatpush1.bf16.msra.mxu0 %v3205_v15  ;;  %1831 = vmatprep.subr.bf16.mxu1 %v3216_v18  ;;  %v3289_v15 = vld [vmem:[%s4666_s1 + $0x760] ss:$16 sps:$4 sm:$0xff]   ;;  %v3300_v18 = vld [vmem:[%s4666_s1 + $0x38c] ss:$16 sps:$4 sm:$0xff]  }
  0x79   :  { %1749 = vmatprep.subr.bf16.mxu0 %v3213_v17  ;;  %v3297_v17 = vld [vmem:[%s4666_s1 + $0x784] ss:$16 sps:$4 sm:$0xff]  }
  0x7b   :  { %1832 = vmatpush1.bf16.msra.mxu1 %v3214_v23  ;;  %v3303_v23 = vld [vmem:[%s4666_s1 + $0x7a4] ss:$16 sps:$4 sm:$0xff]  }
  0x7c   :  { %1750 = vmatpush1.bf16.msra.mxu0 %v3211_v22  ;;  %1833 = vmatprep.subr.bf16.mxu1 %v3222_v8  ;;  %v3298_v22 = vld [vmem:[%s4666_s1 + $0x388] ss:$16 sps:$4 sm:$0xff]   ;;  %v3301_v8 = vld [vmem:[%s4666_s1 + $0x7a0] ss:$16 sps:$4 sm:$0xff]  }
  0x7d   :  { %1751 = vmatprep.subr.bf16.mxu0 %v3219_v24  ;;  %v3306_v24 = vld [vmem:[%s4666_s1 + $0x3ac] ss:$16 sps:$4 sm:$0xff]  }
  0x7f   :  { %1834 = vmatpush1.bf16.msra.mxu1 %v3220_v28  ;;  %v3309_v28 = vld [vmem:[%s4666_s1 + $0x7c4] ss:$16 sps:$4 sm:$0xff]  }
  0x80   :  { %1752 = vmatpush1.bf16.msra.mxu0 %v3217_v27  ;;  %1844 = vmatprep.subr.bf16.mxu1 %v3228_v49  ;;  %v3304_v27 = vld [vmem:[%s4666_s1 + $0x3a8] ss:$16 sps:$4 sm:$0xff]   ;;  %v3307_v49 = vld [vmem:[%s4666_s1 + $0x7c0] ss:$16 sps:$4 sm:$0xff]  }
  0x81   :  { %1762 = vmatprep.subr.bf16.mxu0 %v3225_v29  ;;  %v3312_v29 = vld [vmem:[%s4666_s1 + $0x3cc] ss:$16 sps:$4 sm:$0xff]  }
  0x82   :  { %1836 = vmatmul.mubr.bf16.vlgmr.msra.gmra.mrb[4].mxu1 %v3790_v19  ;;  %v3240_v19 = vld [vmem:[%s4666_s1 + $0x24c] ss:$16 sps:$4 sm:$0xff]  }
  0x83   :  { %1754 = vmatmul.mubr.bf16.vlgmr.msra.gmra.mrb[0].mxu0 %v4000_v31  ;;  %1845 = vmatpush1.bf16.msra.mxu1 %v3226_v33  ;;  %v3318_v33 = vld [vmem:[%s4666_s1 + $0x3ec] ss:$16 sps:$4 sm:$0xff]  }
  0x84   :  { %1763 = vmatpush1.bf16.msra.mxu0 %v3223_v32  ;;  %1846 = vmatprep.subr.bf16.mxu1 %v3234_v13  ;;  %v3315_v32 = vld [vmem:[%s4666_s1 + $0x7e4] ss:$16 sps:$4 sm:$0xff]   ;;  %v3316_v13 = vld [vmem:[%s4666_s1 + $0x3e8] ss:$16 sps:$4 sm:$0xff]  }
  0x85   :  { %1764 = vmatprep.subr.bf16.mxu0 %v3231_v34  ;;  %1794 = vmatprep.mubr.bf16.mxu0 %v4014_v35  ;;  %v3313_v34 = vld [vmem:[%s4666_s1 + $0x7e0] ss:$16 sps:$4 sm:$0xff]  }
  0x86   :  { %1876 = vmatprep.mubr.bf16.mxu1 %v3740_v3  ;;  %v3246_v3 = vld [vmem:[%s4666_s1 + $0x26c] ss:$16 sps:$4 sm:$0xff]  }
  0x87   :  { %1847 = vmatpush1.bf16.msra.mxu1 %v3232_v37  ;;  %v4199_v37 = vpack.c.bf16 %v3982_v26, %v3982_v26  ;;  %v3322_v26 = vld [vmem:[%s4666_s1 + $0x428] ss:$16 sps:$4 sm:$0xff]  }
  0x88   :  { %1765 = vmatpush1.bf16.msra.mxu0 %v3229_v36  ;;  %1848 = vmatprep.subr.bf16.mxu1 %v3240_v19  ;;  %v3321_v36 = vld [vmem:[%s4666_s1 + $0x40c] ss:$16 sps:$4 sm:$0xff]  }
  0x89   :  { %1766 = vmatprep.subr.bf16.mxu0 %v3237_v38  ;;  %v3319_v38 = vld [vmem:[%s4666_s1 + $0x408] ss:$16 sps:$4 sm:$0xff]   ;;  %v3324_v19 = vld [vmem:[%s4666_s1 + $0x42c] ss:$16 sps:$4 sm:$0xff]  }
  0x8b   :  { %1849 = vmatpush1.bf16.msra.mxu1 %v3238_v40  ;;  %v3415_v40 = vld [vmem:[%s4668_s3] ss:$8 sps:$4 sm:$0xff]  }
  0x8c   :  { %1767 = vmatpush1.bf16.msra.mxu0 %v3235_v39  ;;  %1850 = vmatprep.subr.bf16.mxu1 %v3246_v3  ;;  %v3327_v39 = vld [vmem:[%s4666_s1 + $0x44c] ss:$16 sps:$4 sm:$0xff]   ;;  %v3325_v3 = vld [vmem:[%s4666_s1 + $0x448] ss:$16 sps:$4 sm:$0xff]  }
  0x8d   :  { %1768 = vmatprep.subr.bf16.mxu0 %v3243_v41  ;;  %v3420_v41 = vld [vmem:[%s4668_s3 + $0x14] ss:$8 sps:$4 sm:$0xff]  }
  0x8f   :  { %1851 = vmatpush1.bf16.msra.mxu1 %v3244_v44  ;;  %v3423_v44 = vld [vmem:[%s4668_s3 + $0x24] ss:$8 sps:$4 sm:$0xff]  }
  0x90   :  { %1769 = vmatpush1.bf16.msra.mxu0 %v3241_v42  ;;  %1852 = vmatprep.subr.bf16.mxu1 %v3252_v46  ;;  %v3418_v42 = vld [vmem:[%s4668_s3 + $0x10] ss:$8 sps:$4 sm:$0xff]   ;;  %v3333_v46 = vld [vmem:[%s4666_s1 + $0x48c] ss:$16 sps:$4 sm:$0xff]  }
  0x91   :  { %1770 = vmatprep.subr.bf16.mxu0 %v3249_v45  ;;  %v3328_v45 = vld [vmem:[%s4666_s1 + $0x468] ss:$16 sps:$4 sm:$0xff]  }
  0x93   :  { %1853 = vmatpush1.bf16.msra.mxu1 %v3250_v48  ;;  %v3426_v48 = vld [vmem:[%s4668_s3 + $0x34] ss:$8 sps:$4 sm:$0xff]  }
  0x94   :  { %1771 = vmatpush1.bf16.msra.mxu0 %v3247_v47  ;;  %1854 = vmatprep.subr.bf16.mxu1 %v3258_v51  ;;  %v3421_v47 = vld [vmem:[%s4668_s3 + $0x20] ss:$8 sps:$4 sm:$0xff]   ;;  %v3336_v51 = vld [vmem:[%s4666_s1 + $0x4ac] ss:$16 sps:$4 sm:$0xff]  }
  0x95   :  { %1772 = vmatprep.subr.bf16.mxu0 %v3255_v50  ;;  %v3331_v50 = vld [vmem:[%s4666_s1 + $0x488] ss:$16 sps:$4 sm:$0xff]  }
  0x97   :  { %1855 = vmatpush1.bf16.msra.mxu1 %v3256_v53  ;;  %v3429_v53 = vld [vmem:[%s4668_s3 + $0x44] ss:$8 sps:$4 sm:$0xff]  }
  0x98   :  { %1773 = vmatpush1.bf16.msra.mxu0 %v3253_v52  ;;  %1856 = vmatprep.subr.bf16.mxu1 %v3264_v55  ;;  %v3424_v52 = vld [vmem:[%s4668_s3 + $0x30] ss:$8 sps:$4 sm:$0xff]   ;;  %v3339_v55 = vld [vmem:[%s4666_s1 + $0x4cc] ss:$16 sps:$4 sm:$0xff]  }
  0x99   :  { %1774 = vmatprep.subr.bf16.mxu0 %v3261_v54  ;;  %v3334_v54 = vld [vmem:[%s4666_s1 + $0x4a8] ss:$16 sps:$4 sm:$0xff]  }
  0x9b   :  { %1857 = vmatpush1.bf16.msra.mxu1 %v3262_v57  ;;  %v3432_v57 = vld [vmem:[%s4668_s3 + $0x54] ss:$8 sps:$4 sm:$0xff]  }
  0x9c   :  { %1775 = vmatpush1.bf16.msra.mxu0 %v3259_v56  ;;  %1858 = vmatprep.subr.bf16.mxu1 %v3270_v59  ;;  %v3427_v56 = vld [vmem:[%s4668_s3 + $0x40] ss:$8 sps:$4 sm:$0xff]   ;;  %v3430_v59 = vld [vmem:[%s4668_s3 + $0x50] ss:$8 sps:$4 sm:$0xff]  }
  0x9d   :  { %1776 = vmatprep.subr.bf16.mxu0 %v3267_v58  ;;  %v3337_v58 = vld [vmem:[%s4666_s1 + $0x4c8] ss:$16 sps:$4 sm:$0xff]  }
  0x9f   :  { %1859 = vmatpush1.bf16.msra.mxu1 %v3268_v61  ;;  %v3435_v61 = vld [vmem:[%s4668_s3 + $0x64] ss:$8 sps:$4 sm:$0xff]  }
  0xa0   :  { %1777 = vmatpush1.bf16.msra.mxu0 %v3265_v60  ;;  %1860 = vmatprep.subr.bf16.mxu1 %v3276_v63  ;;  %v3342_v60 = vld [vmem:[%s4666_s1 + $0x4ec] ss:$16 sps:$4 sm:$0xff]   ;;  %v3433_v63 = vld [vmem:[%s4668_s3 + $0x60] ss:$8 sps:$4 sm:$0xff]  }
  0xa1   :  { %1778 = vmatprep.subr.bf16.mxu0 %v3273_v62  ;;  %v3340_v62 = vld [vmem:[%s4666_s1 + $0x4e8] ss:$16 sps:$4 sm:$0xff]  }
  0xa3   :  { %1861 = vmatpush1.bf16.msra.mxu1 %v3274_v1  ;;  %v3438_v1 = vld [vmem:[%s4668_s3 + $0x74] ss:$8 sps:$4 sm:$0xff]  }
  0xa4   :  { %1779 = vmatpush1.bf16.msra.mxu0 %v3271_v0  ;;  %1862 = vmatprep.subr.bf16.mxu1 %v3282_v4  ;;  %v3345_v0 = vld [vmem:[%s4666_s1 + $0x50c] ss:$16 sps:$4 sm:$0xff]   ;;  %v3436_v4 = vld [vmem:[%s4668_s3 + $0x70] ss:$8 sps:$4 sm:$0xff]  }
  0xa5   :  { %1780 = vmatprep.subr.bf16.mxu0 %v3279_v2  ;;  %v3343_v2 = vld [vmem:[%s4666_s1 + $0x508] ss:$16 sps:$4 sm:$0xff]  }
  0xa7   :  { %1863 = vmatpush1.bf16.msra.mxu1 %v3280_v6  ;;  %v3441_v6 = vld [vmem:[%s4668_s3 + $0x84] ss:$8 sps:$4 sm:$0xff]  }
  0xa8   :  { %1781 = vmatpush1.bf16.msra.mxu0 %v3277_v5  ;;  %1864 = vmatprep.subr.bf16.mxu1 %v3288_v9  ;;  %v3348_v5 = vld [vmem:[%s4666_s1 + $0x52c] ss:$16 sps:$4 sm:$0xff]   ;;  %v3439_v9 = vld [vmem:[%s4668_s3 + $0x80] ss:$8 sps:$4 sm:$0xff]  }
  0xa9   :  { %1782 = vmatprep.subr.bf16.mxu0 %v3285_v7  ;;  %v3346_v7 = vld [vmem:[%s4666_s1 + $0x528] ss:$16 sps:$4 sm:$0xff]  }
  0xab   :  { %1865 = vmatpush1.bf16.msra.mxu1 %v3286_v11  ;;  %v3444_v11 = vld [vmem:[%s4668_s3 + $0x94] ss:$8 sps:$4 sm:$0xff]  }
  0xac   :  { %1783 = vmatpush1.bf16.msra.mxu0 %v3283_v10  ;;  %1866 = vmatprep.subr.bf16.mxu1 %v3294_v14  ;;  %v3351_v10 = vld [vmem:[%s4666_s1 + $0x54c] ss:$16 sps:$4 sm:$0xff]   ;;  %v3442_v14 = vld [vmem:[%s4668_s3 + $0x90] ss:$8 sps:$4 sm:$0xff]  }
  0xad   :  { %1784 = vmatprep.subr.bf16.mxu0 %v3291_v12  ;;  %v3349_v12 = vld [vmem:[%s4666_s1 + $0x548] ss:$16 sps:$4 sm:$0xff]  }
  0xaf   :  { %1867 = vmatpush1.bf16.msra.mxu1 %v3292_v16  ;;  %v3447_v16 = vld [vmem:[%s4668_s3 + $0xa4] ss:$8 sps:$4 sm:$0xff]  }
  0xb0   :  { %1785 = vmatpush1.bf16.msra.mxu0 %v3289_v15  ;;  %1868 = vmatprep.subr.bf16.mxu1 %v3300_v18  ;;  %v3354_v15 = vld [vmem:[%s4666_s1 + $0x56c] ss:$16 sps:$4 sm:$0xff]   ;;  %v3445_v18 = vld [vmem:[%s4668_s3 + $0xa0] ss:$8 sps:$4 sm:$0xff]  }
  0xb1   :  { %1786 = vmatprep.subr.bf16.mxu0 %v3297_v17  ;;  %v3352_v17 = vld [vmem:[%s4666_s1 + $0x568] ss:$16 sps:$4 sm:$0xff]  }
  0xb3   :  { %1869 = vmatpush1.bf16.msra.mxu1 %v3298_v22  ;;  %v3450_v22 = vld [vmem:[%s4668_s3 + $0xb4] ss:$8 sps:$4 sm:$0xff]  }
  0xb4   :  { %1787 = vmatpush1.bf16.msra.mxu0 %v3295_v21  ;;  %1870 = vmatprep.subr.bf16.mxu1 %v3306_v24  ;;  %v3357_v21 = vld [vmem:[%s4666_s1 + $0x58c] ss:$16 sps:$4 sm:$0xff]   ;;  %v3448_v24 = vld [vmem:[%s4668_s3 + $0xb0] ss:$8 sps:$4 sm:$0xff]  }
  0xb5   :  { %1788 = vmatprep.subr.bf16.mxu0 %v3303_v23  ;;  %v3355_v23 = vld [vmem:[%s4666_s1 + $0x588] ss:$16 sps:$4 sm:$0xff]  }
  0xb7   :  { %1871 = vmatpush1.bf16.msra.mxu1 %v3304_v27  ;;  %v3453_v27 = vld [vmem:[%s4668_s3 + $0xc4] ss:$8 sps:$4 sm:$0xff]  }
  0xb8   :  { %1789 = vmatpush1.bf16.msra.mxu0 %v3301_v8  ;;  %1872 = vmatprep.subr.bf16.mxu1 %v3312_v29  ;;  %v3360_v8 = vld [vmem:[%s4666_s1 + $0x5ac] ss:$16 sps:$4 sm:$0xff]   ;;  %v3451_v29 = vld [vmem:[%s4668_s3 + $0xc0] ss:$8 sps:$4 sm:$0xff]  }
  0xb9   :  { %1790 = vmatprep.subr.bf16.mxu0 %v3309_v28  ;;  %v3358_v28 = vld [vmem:[%s4666_s1 + $0x5a8] ss:$16 sps:$4 sm:$0xff]  }
  0xbb   :  { %1873 = vmatpush1.bf16.msra.mxu1 %v3310_v30  ;;  %v3456_v30 = vld [vmem:[%s4668_s3 + $0xd4] ss:$8 sps:$4 sm:$0xff]  }
  0xbc   :  { %1791 = vmatpush1.bf16.msra.mxu0 %v3307_v49  ;;  %1874 = vmatprep.subr.bf16.mxu1 %v3318_v33  ;;  %v3363_v49 = vld [vmem:[%s4666_s1 + $0x5cc] ss:$16 sps:$4 sm:$0xff]   ;;  %v3454_v33 = vld [vmem:[%s4668_s3 + $0xd0] ss:$8 sps:$4 sm:$0xff]  }
  0xbd   :  { %1792 = vmatprep.subr.bf16.mxu0 %v3315_v32  ;;  %v3361_v32 = vld [vmem:[%s4666_s1 + $0x5c8] ss:$16 sps:$4 sm:$0xff]  }
  0xbf   :  { %1875 = vmatpush1.bf16.msra.mxu1 %v3316_v13  ;;  %v3364_v13 = vld [vmem:[%s4666_s1 + $0x5e8] ss:$16 sps:$4 sm:$0xff]  }
  0xc0   :  { %1793 = vmatpush1.bf16.msra.mxu0 %v3313_v34  ;;  %1885 = vmatprep.subr.bf16.mxu1 %v3321_v36  ;;  %v3366_v34 = vld [vmem:[%s4666_s1 + $0x5ec] ss:$16 sps:$4 sm:$0xff]  }
  0xc1   :  { %v3369_v36 = vld [vmem:[%s4666_s1 + $0x60c] ss:$16 sps:$4 sm:$0xff]  }
  0xc2   :  { %1877 = vmatmul.mubr.bf16.vlgmr.msra.gmra.mrb[4].mxu1 %v3792_v20  ;;  %v3417_v20 = vld [vmem:[%s4668_s3 + $0x4] ss:$8 sps:$4 sm:$0xff]  }
  0xc3   :  { %1795 = vmatmul.mubr.bf16.vlgmr.msra.gmra.mrb[0].mxu0 %v4199_v37  ;;  %1886 = vmatpush1.bf16.msra.mxu1 %v3319_v38  ;;  %v3367_v38 = vld [vmem:[%s4666_s1 + $0x608] ss:$16 sps:$4 sm:$0xff]  }
  0xc4   :  { %1917 = vmatprep.mubr.bf16.mxu1 %v3806_v25  ;;  %1887 = vmatprep.subr.bf16.mxu1 %v3324_v19  ;;  %v3330_v25 = vld [vmem:[%s4666_s1 + $0x46c] ss:$16 sps:$4 sm:$0xff]  }
  0xc5   :  { %2371 = vmatprep.subr.bf16.mxu0 %v3417_v20  ;;  %v3372_v19 = vld [vmem:[%s4666_s1 + $0x62c] ss:$16 sps:$4 sm:$0xff]  }
  0xc6   :  { %2372 = vmatpush1.bf16.msra.mxu0 %v3415_v40  ;;  %v3373_v40 = vld [vmem:[%s4666_s1 + $0x648] ss:$16 sps:$4 sm:$0xff]   ;;  %v3381_v20 = vld [vmem:[%s4666_s1 + $0x68c] ss:$16 sps:$4 sm:$0xff]  }
  0xc7   :  { %1888 = vmatpush1.bf16.msra.mxu1 %v3322_v26  ;;  %2373 = vmatprep.subr.bf16.mxu0 %v3420_v41  ;;  %v3370_v26 = vld [vmem:[%s4666_s1 + $0x628] ss:$16 sps:$4 sm:$0xff]  }
  0xc8   :  { %1889 = vmatprep.subr.bf16.mxu1 %v3327_v39  ;;  %v3375_v39 = vld [vmem:[%s4666_s1 + $0x64c] ss:$16 sps:$4 sm:$0xff]   ;;  %v3379_v41 = vld [vmem:[%s4666_s1 + $0x688] ss:$16 sps:$4 sm:$0xff]  }
  0xca   :  { %2374 = vmatpush1.bf16.msra.mxu0 %v3418_v42  ;;  %v3387_v42 = vld [vmem:[%s4666_s1 + $0x6cc] ss:$16 sps:$4 sm:$0xff]  }
  0xcb   :  { %1890 = vmatpush1.bf16.msra.mxu1 %v3325_v3  ;;  %2375 = vmatprep.subr.bf16.mxu0 %v3423_v44  ;;  %v3384_v3 = vld [vmem:[%s4666_s1 + $0x6ac] ss:$16 sps:$4 sm:$0xff]  }
  0xcc   :  { %1891 = vmatprep.subr.bf16.mxu1 %v3330_v25  ;;  %v3382_v25 = vld [vmem:[%s4666_s1 + $0x6a8] ss:$16 sps:$4 sm:$0xff]   ;;  %v3459_v44 = vld [vmem:[%s4668_s3 + $0xe4] ss:$8 sps:$4 sm:$0xff]  }
  0xce   :  { %2376 = vmatpush1.bf16.msra.mxu0 %v3421_v47 }
  0xcf   :  { %1892 = vmatpush1.bf16.msra.mxu1 %v3328_v45  ;;  %2377 = vmatprep.subr.bf16.mxu0 %v3426_v48 }
  0xd0   :  { %1893 = vmatprep.subr.bf16.mxu1 %v3333_v46  ;;  %v3457_v46 = vld [vmem:[%s4668_s3 + $0xe0] ss:$8 sps:$4 sm:$0xff]  }
  0xd2   :  { %2378 = vmatpush1.bf16.msra.mxu0 %v3424_v52  ;;  %v3390_v52 = vld [vmem:[%s4666_s1 + $0x6ec] ss:$16 sps:$4 sm:$0xff]  }
  0xd3   :  { %1894 = vmatpush1.bf16.msra.mxu1 %v3331_v50  ;;  %2379 = vmatprep.subr.bf16.mxu0 %v3429_v53  ;;  %v3385_v50 = vld [vmem:[%s4666_s1 + $0x6c8] ss:$16 sps:$4 sm:$0xff]   ;;  %v3462_v53 = vld [vmem:[%s4668_s3 + $0xf4] ss:$8 sps:$4 sm:$0xff]  }
  0xd4   :  { %1895 = vmatprep.subr.bf16.mxu1 %v3336_v51 }
  0xd6   :  { %2380 = vmatpush1.bf16.msra.mxu0 %v3427_v56  ;;  %v3393_v56 = vld [vmem:[%s4666_s1 + $0x70c] ss:$16 sps:$4 sm:$0xff]  }
  0xd7   :  { %1896 = vmatpush1.bf16.msra.mxu1 %v3334_v54  ;;  %2381 = vmatprep.subr.bf16.mxu0 %v3432_v57  ;;  %v3460_v54 = vld [vmem:[%s4668_s3 + $0xf0] ss:$8 sps:$4 sm:$0xff]   ;;  %v3465_v57 = vld [vmem:[%s4668_s3 + $0x104] ss:$8 sps:$4 sm:$0xff]  }
  0xd8   :  { %1897 = vmatprep.subr.bf16.mxu1 %v3339_v55  ;;  %v3388_v55 = vld [vmem:[%s4666_s1 + $0x6e8] ss:$16 sps:$4 sm:$0xff]  }
  0xda   :  { %2382 = vmatpush1.bf16.msra.mxu0 %v3430_v59  ;;  %v3396_v59 = vld [vmem:[%s4666_s1 + $0x72c] ss:$16 sps:$4 sm:$0xff]  }
  0xdb   :  { %1898 = vmatpush1.bf16.msra.mxu1 %v3337_v58  ;;  %2383 = vmatprep.subr.bf16.mxu0 %v3435_v61  ;;  %v3391_v58 = vld [vmem:[%s4666_s1 + $0x708] ss:$16 sps:$4 sm:$0xff]   ;;  %v3399_v61 = vld [vmem:[%s4666_s1 + $0x74c] ss:$16 sps:$4 sm:$0xff]  }
  0xdc   :  { %1899 = vmatprep.subr.bf16.mxu1 %v3342_v60  ;;  %v3394_v60 = vld [vmem:[%s4666_s1 + $0x728] ss:$16 sps:$4 sm:$0xff]  }
  0xde   :  { %2384 = vmatpush1.bf16.msra.mxu0 %v3433_v63  ;;  %v3402_v63 = vld [vmem:[%s4666_s1 + $0x76c] ss:$16 sps:$4 sm:$0xff]  }
  0xdf   :  { %1900 = vmatpush1.bf16.msra.mxu1 %v3340_v62  ;;  %2385 = vmatprep.subr.bf16.mxu0 %v3438_v1  ;;  %v3397_v62 = vld [vmem:[%s4666_s1 + $0x748] ss:$16 sps:$4 sm:$0xff]   ;;  %v3405_v1 = vld [vmem:[%s4666_s1 + $0x78c] ss:$16 sps:$4 sm:$0xff]  }
  0xe0   :  { %1901 = vmatprep.subr.bf16.mxu1 %v3345_v0  ;;  %v3400_v0 = vld [vmem:[%s4666_s1 + $0x768] ss:$16 sps:$4 sm:$0xff]  }
  0xe2   :  { %2386 = vmatpush1.bf16.msra.mxu0 %v3436_v4  ;;  %v3408_v4 = vld [vmem:[%s4666_s1 + $0x7ac] ss:$16 sps:$4 sm:$0xff]  }
  0xe3   :  { %1902 = vmatpush1.bf16.msra.mxu1 %v3343_v2  ;;  %2387 = vmatprep.subr.bf16.mxu0 %v3441_v6  ;;  %v3403_v2 = vld [vmem:[%s4666_s1 + $0x788] ss:$16 sps:$4 sm:$0xff]   ;;  %v3411_v6 = vld [vmem:[%s4666_s1 + $0x7cc] ss:$16 sps:$4 sm:$0xff]  }
  0xe4   :  { %1903 = vmatprep.subr.bf16.mxu1 %v3348_v5  ;;  %v3406_v5 = vld [vmem:[%s4666_s1 + $0x7a8] ss:$16 sps:$4 sm:$0xff]  }
  0xe6   :  { %2388 = vmatpush1.bf16.msra.mxu0 %v3439_v9  ;;  %v3414_v9 = vld [vmem:[%s4666_s1 + $0x7ec] ss:$16 sps:$4 sm:$0xff]  }
  0xe7   :  { %1904 = vmatpush1.bf16.msra.mxu1 %v3346_v7  ;;  %2389 = vmatprep.subr.bf16.mxu0 %v3444_v11  ;;  %v3409_v7 = vld [vmem:[%s4666_s1 + $0x7c8] ss:$16 sps:$4 sm:$0xff]   ;;  %v341_v11 = vsub.s32 0, %v3685_v43 }
  0xe8   :  { %1905 = vmatprep.subr.bf16.mxu1 %v3351_v10  ;;  %v3412_v10 = vld [vmem:[%s4666_s1 + $0x7e8] ss:$16 sps:$4 sm:$0xff]  }
  0xea   :  { %2390 = vmatpush1.bf16.msra.mxu0 %v3442_v14  ;;  %v345_v14 = vsub.s32 1, %v3685_v43 }
  0xeb   :  { %1906 = vmatpush1.bf16.msra.mxu1 %v3349_v12  ;;  %2391 = vmatprep.subr.bf16.mxu0 %v3447_v16  ;;  %v4499_v12 = vld [vmem:[%s4669_s2] sm:$0xf] }
  0xec   :  { %1907 = vmatprep.subr.bf16.mxu1 %v3354_v15  ;;  %v342_v15 = vrot.slane %v4499_v12, %v341_v11  ;;  %v346_v16 = vrot.slane %v4499_v12, %v345_v14 }
  0xee   :  { %2392 = vmatpush1.bf16.msra.mxu0 %v3445_v18 }
  0xef   :  { %1908 = vmatpush1.bf16.msra.mxu1 %v3352_v17  ;;  %2393 = vmatprep.subr.bf16.mxu0 %v3450_v22 }
  0xf0   :  { %1909 = vmatprep.subr.bf16.mxu1 %v3357_v21 }
  0xf2   :  { %2394 = vmatpush1.bf16.msra.mxu0 %v3448_v24 }
  0xf3   :  { %1910 = vmatpush1.bf16.msra.mxu1 %v3355_v23  ;;  %2395 = vmatprep.subr.bf16.mxu0 %v3453_v27 }
  0xf4   :  { %1911 = vmatprep.subr.bf16.mxu1 %v3360_v8 }
  0xf6   :  { %2396 = vmatpush1.bf16.msra.mxu0 %v3451_v29 }
  0xf7   :  { %1912 = vmatpush1.bf16.msra.mxu1 %v3358_v28  ;;  %2397 = vmatprep.subr.bf16.mxu0 %v3456_v30 }
  0xf8   :  { %1913 = vmatprep.subr.bf16.mxu1 %v3363_v49  ;;  %v3463_v49 = vld [vmem:[%s4668_s3 + $0x100] ss:$8 sps:$4 sm:$0xff]  }
  0xfa   :  { %2398 = vmatpush1.bf16.msra.mxu0 %v3454_v33  ;;  %v3466_v33 = vld [vmem:[%s4668_s3 + $0x110] ss:$8 sps:$4 sm:$0xff]  }
  0xfb   :  { %1914 = vmatpush1.bf16.msra.mxu1 %v3361_v32  ;;  %2399 = vmatprep.subr.bf16.mxu0 %v3459_v44  ;;  %v3468_v32 = vld [vmem:[%s4668_s3 + $0x114] ss:$8 sps:$4 sm:$0xff]   ;;  %v3519_v44 = vld [vmem:[%s4670_s5 + $0x60] sm:$0xff]  }
  0xfc   :  { %1915 = vmatprep.subr.bf16.mxu1 %v3366_v34  ;;  %v3471_v34 = vld [vmem:[%s4668_s3 + $0x124] ss:$8 sps:$4 sm:$0xff]  }
  0xfe   :  { %2400 = vmatpush1.bf16.msra.mxu0 %v3457_v46  ;;  %v3478_v46 = vld [vmem:[%s4668_s3 + $0x150] ss:$8 sps:$4 sm:$0xff]  }
  0xff   :  { %1916 = vmatpush1.bf16.msra.mxu1 %v3364_v13  ;;  %2401 = vmatprep.subr.bf16.mxu0 %v3462_v53  ;;  %v3511_v13 = vld [vmem:[%s4670_s5 + $0x40] sm:$0xff]   ;;  %v3484_v53 = vld [vmem:[%s4668_s3 + $0x170] ss:$8 sps:$4 sm:$0xff]  }
 0x100   :  { %1926 = vmatprep.subr.bf16.mxu1 %v3369_v36  ;;  %v3512_v36 = vld [vmem:[%s4670_s5] sm:$0xff]  }
 0x102   :  { %1918 = vmatmul.mubr.bf16.vlgmr.msra.gmra.mrb[4].mxu1 %v4000_v31  ;;  %v3378_v31 = vld [vmem:[%s4666_s1 + $0x66c] ss:$16 sps:$4 sm:$0xff]   ;;  %2402 = vmatpush1.bf16.msra.mxu0 %v3460_v54 }
 0x103   :  { %1927 = vmatpush1.bf16.msra.mxu1 %v3367_v38  ;;  %1958 = vmatprep.mubr.bf16.mxu1 %v4014_v35  ;;  %v3376_v35 = vld [vmem:[%s4666_s1 + $0x668] ss:$16 sps:$4 sm:$0xff]   ;;  %v3489_v54 = vld [vmem:[%s4668_s3 + $0x184] ss:$8 sps:$4 sm:$0xff]  }
 0x104   :  { %1928 = vmatprep.subr.bf16.mxu1 %v3372_v19  ;;  %2412 = vmatprep.subr.bf16.mxu0 %v3465_v57  ;;  %v3469_v38 = vld [vmem:[%s4668_s3 + $0x120] ss:$8 sps:$4 sm:$0xff]   ;;  %v3490_v57 = vld [vmem:[%s4668_s3 + $0x190] ss:$8 sps:$4 sm:$0xff]  }
 0x105   :  { %v3513_v19 = vld [vmem:[%s4670_s5 + $0x48] sm:$0xff]  }
 0x107   :  { %1929 = vmatpush1.bf16.msra.mxu1 %v3370_v26  ;;  %v3514_v26 = vld [vmem:[%s4670_s5 + $0x8] sm:$0xff]  }
 0x108   :  { %1930 = vmatprep.subr.bf16.mxu1 %v3375_v39  ;;  %v3515_v39 = vld [vmem:[%s4670_s5 + $0x50] sm:$0xff]  }
 0x10b   :  { %1931 = vmatpush1.bf16.msra.mxu1 %v3373_v40  ;;  %v3474_v40 = vld [vmem:[%s4668_s3 + $0x134] ss:$8 sps:$4 sm:$0xff]  }
 0x10c   :  { %1932 = vmatprep.subr.bf16.mxu1 %v3378_v31  ;;  %v3472_v31 = vld [vmem:[%s4668_s3 + $0x130] ss:$8 sps:$4 sm:$0xff]  }
 0x10f   :  { %1933 = vmatpush1.bf16.msra.mxu1 %v3376_v35  ;;  %v3516_v35 = vld [vmem:[%s4670_s5 + $0x10] sm:$0xff]  }
 0x110   :  { %1934 = vmatprep.subr.bf16.mxu1 %v3381_v20  ;;  %v3517_v20 = vld [vmem:[%s4670_s5 + $0x58] sm:$0xff]  }
 0x113   :  { %1935 = vmatpush1.bf16.msra.mxu1 %v3379_v41  ;;  %v3477_v41 = vld [vmem:[%s4668_s3 + $0x144] ss:$8 sps:$4 sm:$0xff]  }
 0x114   :  { %1936 = vmatprep.subr.bf16.mxu1 %v3384_v3  ;;  %v3475_v3 = vld [vmem:[%s4668_s3 + $0x140] ss:$8 sps:$4 sm:$0xff]  }
 0x115   :  { %v1673_v45 = vpop.f32.mrb[0].mxu1 }
 0x116   :  { %v1675_v47 = vpop.f32.mrb[1].mxu1  ;;  %v1674_v17 = vadd.f32 %v1673_v45, %v342_v15  ;;  %v3520_v45 = vld [vmem:[%s4670_s5 + $0x20] sm:$0xff]  }
 0x117   :  { %v1677_v48 = vpop.f32.mrb[2].mxu1  ;;  %1937 = vmatpush1.bf16.msra.mxu1 %v3382_v25  ;;  %v1676_v18 = vadd.f32 %v1675_v47, %v346_v16  ;;  %v3480_v25 = vld [vmem:[%s4668_s3 + $0x154] ss:$8 sps:$4 sm:$0xff]   ;;  %v3521_v47 = vld [vmem:[%s4670_s5 + $0x68] sm:$0xff]  }
 0x118   :  { %v1678_v51 = vpop.f32.mrb[3].mxu1  ;;  %1938 = vmatprep.subr.bf16.mxu1 %v3387_v42  ;;  %v3518_v42 = vld [vmem:[%s4670_s5 + $0x18] sm:$0xff]   ;;  %v3483_v48 = vld [vmem:[%s4668_s3 + $0x164] ss:$8 sps:$4 sm:$0xff]  }
 0x119   :  { %v3481_v51 = vld [vmem:[%s4668_s3 + $0x160] ss:$8 sps:$4 sm:$0xff]  }
 0x11b   :  { %1939 = vmatpush1.bf16.msra.mxu1 %v3385_v50  ;;  %v3522_v50 = vld [vmem:[%s4670_s5 + $0x28] sm:$0xff]  }
 0x11c   :  { %1940 = vmatprep.subr.bf16.mxu1 %v3390_v52  ;;  %v3486_v52 = vld [vmem:[%s4668_s3 + $0x174] ss:$8 sps:$4 sm:$0xff]  }
 0x11f   :  { %1941 = vmatpush1.bf16.msra.mxu1 %v3388_v55  ;;  %v3487_v55 = vld [vmem:[%s4668_s3 + $0x180] ss:$8 sps:$4 sm:$0xff]  }
 0x120   :  { %1942 = vmatprep.subr.bf16.mxu1 %v3393_v56  ;;  %v3492_v56 = vld [vmem:[%s4668_s3 + $0x194] ss:$8 sps:$4 sm:$0xff]  }
 0x123   :  { %1943 = vmatpush1.bf16.msra.mxu1 %v3391_v58  ;;  %v3495_v58 = vld [vmem:[%s4668_s3 + $0x1a4] ss:$8 sps:$4 sm:$0xff]  }
 0x124   :  { %1944 = vmatprep.subr.bf16.mxu1 %v3396_v59  ;;  %v3493_v59 = vld [vmem:[%s4668_s3 + $0x1a0] ss:$8 sps:$4 sm:$0xff]  }
 0x127   :  { %1945 = vmatpush1.bf16.msra.mxu1 %v3394_v60  ;;  %v3498_v60 = vld [vmem:[%s4668_s3 + $0x1b4] ss:$8 sps:$4 sm:$0xff]  }
 0x128   :  { %1946 = vmatprep.subr.bf16.mxu1 %v3399_v61  ;;  %v3496_v61 = vld [vmem:[%s4668_s3 + $0x1b0] ss:$8 sps:$4 sm:$0xff]  }
 0x12b   :  { %1947 = vmatpush1.bf16.msra.mxu1 %v3397_v62  ;;  %v3501_v62 = vld [vmem:[%s4668_s3 + $0x1c4] ss:$8 sps:$4 sm:$0xff]  }
 0x12c   :  { %1948 = vmatprep.subr.bf16.mxu1 %v3402_v63  ;;  %v3499_v63 = vld [vmem:[%s4668_s3 + $0x1c0] ss:$8 sps:$4 sm:$0xff]  }
 0x12f   :  { %1949 = vmatpush1.bf16.msra.mxu1 %v3400_v0  ;;  %v3504_v0 = vld [vmem:[%s4668_s3 + $0x1d4] ss:$8 sps:$4 sm:$0xff]  }
 0x130   :  { %1950 = vmatprep.subr.bf16.mxu1 %v3405_v1  ;;  %v3502_v1 = vld [vmem:[%s4668_s3 + $0x1d0] ss:$8 sps:$4 sm:$0xff]  }
 0x133   :  { %1951 = vmatpush1.bf16.msra.mxu1 %v3403_v2  ;;  %v3507_v2 = vld [vmem:[%s4668_s3 + $0x1e4] ss:$8 sps:$4 sm:$0xff]  }
 0x134   :  { %1952 = vmatprep.subr.bf16.mxu1 %v3408_v4  ;;  %v3505_v4 = vld [vmem:[%s4668_s3 + $0x1e0] ss:$8 sps:$4 sm:$0xff]  }
 0x137   :  { %1953 = vmatpush1.bf16.msra.mxu1 %v3406_v5  ;;  %v3510_v5 = vld [vmem:[%s4668_s3 + $0x1f4] ss:$8 sps:$4 sm:$0xff]  }
 0x138   :  { %1954 = vmatprep.subr.bf16.mxu1 %v3411_v6  ;;  %v3508_v6 = vld [vmem:[%s4668_s3 + $0x1f0] ss:$8 sps:$4 sm:$0xff]  }
 0x13b   :  { %1955 = vmatpush1.bf16.msra.mxu1 %v3409_v7  ;;  %v349_v7 = vsub.s32 2, %v3685_v43 }
 0x13c   :  { %1956 = vmatprep.subr.bf16.mxu1 %v3414_v9  ;;  %v353_v9 = vsub.s32 3, %v3685_v43 }
 0x13e   :  { %v354_v15 = vrot.slane %v4499_v12, %v353_v9 }
 0x13f   :  { %1957 = vmatpush1.bf16.msra.mxu1 %v3412_v10  ;;  %v350_v10 = vrot.slane %v4499_v12, %v349_v7  ;;  %v3524_v12 = vld [vmem:[%s4670_s5 + $0x30] sm:$0xff]  }
 0x140   :  { %2974 = vmatprep.subr.bf16.mxu1 %v3511_v13 }
 0x142   :  { %1959 = vmatmul.mubr.bf16.vlgmr.msra.gmra.mrb[4].mxu1 %v4199_v37 }
 0x143   :  { %2975 = vmatpush3.bf16.msra.mxu1 %v3512_v36 }
 0x144   :  { %2976 = vmatprep.subr.bf16.mxu1 %v3513_v19 }
 0x147   :  { %2977 = vmatpush3.bf16.msra.mxu1 %v3514_v26 }
 0x148   :  { %2978 = vmatprep.subr.bf16.mxu1 %v3515_v39 }
 0x14b   :  { %2979 = vmatpush3.bf16.msra.mxu1 %v3516_v35 }
 0x14c   :  { %2980 = vmatprep.subr.bf16.mxu1 %v3517_v20 }
 0x14f   :  { %2981 = vmatpush3.bf16.msra.mxu1 %v3518_v42 }
 0x150   :  { %2982 = vmatprep.subr.bf16.mxu1 %v3519_v44 }
 0x153   :  { %2983 = vmatpush3.bf16.msra.mxu1 %v3520_v45 }
 0x154   :  { %2984 = vmatprep.subr.bf16.mxu1 %v3521_v47 }
 0x157   :  { %2985 = vmatpush3.bf16.msra.mxu1 %v3522_v50 }
 0x196   :  { %v1796_v37 = vpop.f32.mrb[0].mxu0 }
 0x197   :  { %v2997_v21 = vadd.f32 %v1796_v37, %v1674_v17  ;;  %v1798_v22 = vpop.f32.mrb[1].mxu0 }
 0x198   :  { %v2999_v23 = vadd.f32 %v1798_v22, %v1676_v18  ;;  %v1800_v24 = vpop.f32.mrb[2].mxu0 }
 0x199   :  { %v1967_v8 = vmax.f32 %v2997_v21, 0.0  ;;  %v1801_v27 = vpop.f32.mrb[3].mxu0 }
 0x19a   :  { %v1968_v28 = vmax.f32 %v2999_v23, 0.0 }
 0x19b   :  { %v1971_v30 = vpack.c.bf16 %v1967_v8, %v1967_v8 }
 0x19c   :  { %v1972_v29 = vpack.c.bf16 %v1968_v28, %v1968_v28  ;;  %v3523_v28 = vld [vmem:[%s4670_s5 + $0x70] sm:$0xff]  }
 0x19d   :  { %2986 = vmatprep.subr.bf16.mxu1 %v3523_v28 }
 0x19e   :  { %2403 = vmatprep.mubr.bf16.mxu0 %v1972_v29  ;;  %2987 = vmatpush3.bf16.msra.mxu1 %v3524_v12  ;;  %v3525_v29 = vld [vmem:[%s4670_s5 + $0x78] sm:$0xff]  }
 0x19f   :  { %2404 = vmatmul.mubr.bf16.vlgmr.msra.gmra.mrb[4].mxu0 %v1971_v30  ;;  %2988 = vmatprep.subr.bf16.mxu1 %v3525_v29  ;;  %v2039_v30 = vld [vmem:[%s4671_s4] sm:$0x3] }
 0x1a0   :  { %2413 = vmatpush1.bf16.msra.mxu0 %v3463_v49  ;;  %v3526_v49 = vld [vmem:[%s4670_s5 + $0x38] sm:$0xff]  }
 0x1a1   :  { %2414 = vmatprep.subr.bf16.mxu0 %v3468_v32  ;;  %v2044_v32 = vrot.slane %v2039_v30, %v341_v11  ;;  %v2957_v11 = vld [vmem:[%s4672_s6] ss:$0 sm:$0xff] }
 0x1a2   :  { %2989 = vmatpush3.bf16.msra.mxu1 %v3526_v49 }
 0x1a4   :  { %2415 = vmatpush1.bf16.msra.mxu0 %v3466_v33  ;;  %v2048_v33 = vrot.slane %v2039_v30, %v345_v14 }
 0x1a5   :  { %2416 = vmatprep.subr.bf16.mxu0 %v3471_v34 }
 0x1a8   :  { %2417 = vmatpush1.bf16.msra.mxu0 %v3469_v38 }
 0x1a9   :  { %2418 = vmatprep.subr.bf16.mxu0 %v3474_v40 }
 0x1ac   :  { %2419 = vmatpush1.bf16.msra.mxu0 %v3472_v31 }
 0x1ad   :  { %2420 = vmatprep.subr.bf16.mxu0 %v3477_v41 }
 0x1b0   :  { %2421 = vmatpush1.bf16.msra.mxu0 %v3475_v3 }
 0x1b1   :  { %2422 = vmatprep.subr.bf16.mxu0 %v3480_v25 }
 0x1b4   :  { %2423 = vmatpush1.bf16.msra.mxu0 %v3478_v46 }
 0x1b5   :  { %2424 = vmatprep.subr.bf16.mxu0 %v3483_v48 }
 0x1b8   :  { %2425 = vmatpush1.bf16.msra.mxu0 %v3481_v51 }
 0x1b9   :  { %2426 = vmatprep.subr.bf16.mxu0 %v3486_v52 }
 0x1bc   :  { %2427 = vmatpush1.bf16.msra.mxu0 %v3484_v53 }
 0x1bd   :  { %2428 = vmatprep.subr.bf16.mxu0 %v3489_v54 }
 0x1c0   :  { %2429 = vmatpush1.bf16.msra.mxu0 %v3487_v55 }
 0x1c1   :  { %2430 = vmatprep.subr.bf16.mxu0 %v3492_v56 }
 0x1c4   :  { %2431 = vmatpush1.bf16.msra.mxu0 %v3490_v57 }
 0x1c5   :  { %2432 = vmatprep.subr.bf16.mxu0 %v3495_v58 }
 0x1c8   :  { %2433 = vmatpush1.bf16.msra.mxu0 %v3493_v59 }
 0x1c9   :  { %2434 = vmatprep.subr.bf16.mxu0 %v3498_v60 }
 0x1cc   :  { %2435 = vmatpush1.bf16.msra.mxu0 %v3496_v61 }
 0x1cd   :  { %2436 = vmatprep.subr.bf16.mxu0 %v3501_v62 }
 0x1d0   :  { %2437 = vmatpush1.bf16.msra.mxu0 %v3499_v63 }
 0x1d1   :  { %2438 = vmatprep.subr.bf16.mxu0 %v3504_v0 }
 0x1d4   :  { %2439 = vmatpush1.bf16.msra.mxu0 %v3502_v1 }
 0x1d5   :  { %2440 = vmatprep.subr.bf16.mxu0 %v3507_v2 }
 0x1d8   :  { %2441 = vmatpush1.bf16.msra.mxu0 %v3505_v4 }
 0x1d9   :  { %2442 = vmatprep.subr.bf16.mxu0 %v3510_v5 }
 0x1dc   :  { %2443 = vmatpush1.bf16.msra.mxu0 %v3508_v6 }
 0x215   :  { %v1960_v16 = vpop.f32.mrb[4].mxu1 }
 0x216   :  { %v3000_v17 = vadd.f32 %v1960_v16, %v350_v10  ;;  %v1962_v18 = vpop.f32.mrb[5].mxu1 }
 0x217   :  { %v3001_v37 = vadd.f32 %v1962_v18, %v354_v15  ;;  %v1964_v21 = vpop.f32.mrb[6].mxu1 }
 0x218   :  { %v1969_v22 = vmax.f32 %v3000_v17, 0.0  ;;  %v1965_v23 = vpop.f32.mrb[7].mxu1 }
 0x219   :  { %v1970_v24 = vmax.f32 %v3001_v37, 0.0 }
 0x21a   :  { %v1973_v27 = vpack.c.bf16 %v1969_v22, %v1969_v22 }
 0x21b   :  { %v1974_v8 = vpack.c.bf16 %v1970_v24, %v1970_v24 }
 0x21d   :  { %2444 = vmatprep.mubr.bf16.mxu0 %v1974_v8 }
 0x21e   :  { %2445 = vmatmul.mubr.bf16.vlgmr.msra.gmra.mrb[4].mxu0 %v1973_v27 }
 0x2f1   :  { %v2446_v34 = vpop.f32.mrb[4].mxu0 }
 0x2f2   :  { %v3002_v13 = vadd.f32 %v2446_v34, %v2044_v32  ;;  %v2448_v36 = vpop.f32.mrb[5].mxu0 }
 0x2f3   :  { %v3003_v38 = vadd.f32 %v2448_v36, %v2048_v33  ;;  %v2450_v19 = vpop.f32.mrb[6].mxu0 }
 0x2f4   :  { %v2453_v26 = vmax.f32 %v3002_v13, 0.0  ;;  %v2451_v39 = vpop.f32.mrb[7].mxu0 }
 0x2f5   :  { %v2454_v40 = vmax.f32 %v3003_v38, 0.0 }
 0x2f6   :  { %v2455_v35 = vpack.c.bf16 %v2453_v26, %v2453_v26 }
 0x2f7   :  { %v2456_v31 = vpack.c.bf16 %v2454_v40, %v2454_v40 }
 0x2f9   :  { %2624 = vmatprep.mubr.bf16.mxu1 %v2456_v31 }
 0x2fa   :  { %2625 = vmatmul.mubr.bf16.vlgmr.msra.gmra.mrb[8].mxu1 %v2455_v35 }
 0x3cd   :  { %v2990_v20 = vpop.f32.mrb[8].mxu1 }
 0x3ce   :  { %v2991_v41 = vpop.f32.mrb[9].mxu1 }
 0x3cf   :  { %v2992_v43 = vadd.f32 %v2991_v41, %v2990_v20  ;;  %v2993_v14 = vpop.f32.mrb[10].mxu1 }
 0x3d0   :  { %v2994_v3 = vpop.f32.mrb[11].mxu1 }
 0x3d1   :  { %v2627_v25 = vadd.f32 %v2992_v43, %v2957_v11 }
 0x3d3   :  { %2632 = vst [vmem:[%s4673_s7] sm:$0x3] %v2627_v25 }

// kernel: _lambda_.7
= control target key start
LH: loop header
LB: loop body
LE: loop exit
PB: predicated region body
PF: predicated region fallthrough
CT: control target
= control target key end

     0   :  { %v3580_v36 = vmov 1983009808   ;;  %v36_v38 = vlaneseq  ;;  %s4729_s0 = inlined_call_operand.vmem [shape: f32[2,1024], index: 0, kind: input, shape index: {}]   ;;  %s4730_s1 = inlined_call_operand.vmem [shape: bf16[1024,512], index: 1, kind: input, shape index: {}]   ;;  %s4731_s2 = inlined_call_operand.vmem [shape: f32[1,512], index: 2, kind: input, shape index: {}]   ;;  %s4732_s3 = inlined_call_operand.vmem [shape: bf16[512,256], index: 3, kind: input, shape index: {}]   ;;  %s4733_s4 = inlined_call_operand.vmem [shape: f32[1,256], index: 4, kind: input, shape index: {}]   ;;  %s4734_s5 = inlined_call_operand.vmem [shape: bf16[256,128], index: 5, kind: input, shape index: {}]   ;;  %s4735_s6 = inlined_call_operand.vmem [shape: f32[1,128], index: 6, kind: input, shape index: {}]   ;;  %s4736_s7 = inlined_call_operand.hbm [shape: f32[2,128], index: 7, kind: output, shape index: {}]  }
   0x1   :  { %v3054_v0 = vld [vmem:[%s4730_s1 + $0x4] ss:$16 sps:$4 sm:$0xff]   ;;  %v3058_v2 = vld [vmem:[%s4730_s1] ss:$16 sps:$4 sm:$0xff]   ;;  %v34_v37 = vunpack.c.l.s4 %v3580_v36 }
   0x2   :  { %v3056_v1 = vld [vmem:[%s4730_s1 + $0x204] ss:$16 sps:$4 sm:$0xff]   ;;  %1640 = vmatprep.subr.bf16.mxu1 %v3054_v0  ;;  %v3059_v3 = vld [vmem:[%s4730_s1 + $0x200] ss:$16 sps:$4 sm:$0xff]   ;;  %v3739_v43 = vshrl.u32 %v36_v38, 7 }
   0x3   :  { %1681 = vmatprep.subr.bf16.mxu0 %v3056_v1  ;;  %v3060_v4 = vld [vmem:[%s4730_s1 + $0x24] ss:$16 sps:$4 sm:$0xff]   ;;  %1641 = vmatpush1.bf16.msra.mxu1 %v3058_v2  ;;  %v3064_v6 = vld [vmem:[%s4730_s1 + $0x20] ss:$16 sps:$4 sm:$0xff]   ;;  %v35_v42 = vunpack.c.0.s8 %v34_v37  ;;  %v3186_v37 = vld [vmem:[%s4730_s1 + $0xac] ss:$16 sps:$4 sm:$0xff]  }
   0x4   :  { %1682 = vmatpush1.bf16.msra.mxu0 %v3059_v3  ;;  %v3062_v5 = vld [vmem:[%s4730_s1 + $0x224] ss:$16 sps:$4 sm:$0xff]   ;;  %1642 = vmatprep.subr.bf16.mxu1 %v3060_v4  ;;  %v3065_v7 = vld [vmem:[%s4730_s1 + $0x220] ss:$16 sps:$4 sm:$0xff]  }
   0x5   :  { %1683 = vmatprep.subr.bf16.mxu0 %v3062_v5  ;;  %v3066_v8 = vld [vmem:[%s4730_s1 + $0x44] ss:$16 sps:$4 sm:$0xff]   ;;  %v3070_v10 = vld [vmem:[%s4730_s1 + $0x40] ss:$16 sps:$4 sm:$0xff]   ;;  %v3757_v49 = vsub.s32 %v35_v42, %v3739_v43  ;;  %v3914_v42 = vld [vmem:[%s4729_s0 + $0x8] sm:$0xff] }
   0x6   :  { %v3068_v9 = vld [vmem:[%s4730_s1 + $0x244] ss:$16 sps:$4 sm:$0xff]   ;;  %v3071_v11 = vld [vmem:[%s4730_s1 + $0x240] ss:$16 sps:$4 sm:$0xff]  }
   0x7   :  { %1643 = vmatpush1.bf16.msra.mxu1 %v3064_v6  ;;  %v3072_v12 = vld [vmem:[%s4730_s1 + $0x64] ss:$16 sps:$4 sm:$0xff]   ;;  %v3076_v14 = vld [vmem:[%s4730_s1 + $0x60] ss:$16 sps:$4 sm:$0xff]  }
   0x8   :  { %1684 = vmatpush1.bf16.msra.mxu0 %v3065_v7  ;;  %1644 = vmatprep.subr.bf16.mxu1 %v3066_v8  ;;  %v3074_v13 = vld [vmem:[%s4730_s1 + $0x264] ss:$16 sps:$4 sm:$0xff]   ;;  %v3077_v15 = vld [vmem:[%s4730_s1 + $0x260] ss:$16 sps:$4 sm:$0xff]  }
   0x9   :  { %1685 = vmatprep.subr.bf16.mxu0 %v3068_v9  ;;  %v3078_v16 = vld [vmem:[%s4730_s1 + $0x84] ss:$16 sps:$4 sm:$0xff]   ;;  %v3082_v18 = vld [vmem:[%s4730_s1 + $0x80] ss:$16 sps:$4 sm:$0xff]  }
   0xa   :  { %v3080_v17 = vld [vmem:[%s4730_s1 + $0x284] ss:$16 sps:$4 sm:$0xff]   ;;  %v3083_v19 = vld [vmem:[%s4730_s1 + $0x280] ss:$16 sps:$4 sm:$0xff]  }
   0xb   :  { %1645 = vmatpush1.bf16.msra.mxu1 %v3070_v10  ;;  %v3084_v20 = vld [vmem:[%s4730_s1 + $0xa4] ss:$16 sps:$4 sm:$0xff]   ;;  %v3088_v22 = vld [vmem:[%s4730_s1 + $0xa0] ss:$16 sps:$4 sm:$0xff]  }
   0xc   :  { %1686 = vmatpush1.bf16.msra.mxu0 %v3071_v11  ;;  %1646 = vmatprep.subr.bf16.mxu1 %v3072_v12  ;;  %v3086_v21 = vld [vmem:[%s4730_s1 + $0x2a4] ss:$16 sps:$4 sm:$0xff]   ;;  %v3089_v23 = vld [vmem:[%s4730_s1 + $0x2a0] ss:$16 sps:$4 sm:$0xff]  }
   0xd   :  { %1687 = vmatprep.subr.bf16.mxu0 %v3074_v13  ;;  %v3090_v24 = vld [vmem:[%s4730_s1 + $0xc4] ss:$16 sps:$4 sm:$0xff]   ;;  %v3094_v26 = vld [vmem:[%s4730_s1 + $0xc0] ss:$16 sps:$4 sm:$0xff]  }
   0xe   :  { %v3092_v25 = vld [vmem:[%s4730_s1 + $0x2c4] ss:$16 sps:$4 sm:$0xff]   ;;  %v3095_v27 = vld [vmem:[%s4730_s1 + $0x2c0] ss:$16 sps:$4 sm:$0xff]  }
   0xf   :  { %1647 = vmatpush1.bf16.msra.mxu1 %v3076_v14  ;;  %v3096_v28 = vld [vmem:[%s4730_s1 + $0xe4] ss:$16 sps:$4 sm:$0xff]   ;;  %v3100_v30 = vld [vmem:[%s4730_s1 + $0xe0] ss:$16 sps:$4 sm:$0xff]  }
  0x10   :  { %1688 = vmatpush1.bf16.msra.mxu0 %v3077_v15  ;;  %1648 = vmatprep.subr.bf16.mxu1 %v3078_v16  ;;  %v3098_v29 = vld [vmem:[%s4730_s1 + $0x2e4] ss:$16 sps:$4 sm:$0xff]   ;;  %v3101_v31 = vld [vmem:[%s4730_s1 + $0x2e0] ss:$16 sps:$4 sm:$0xff]   ;;  %v3156_v15 = vld [vmem:[%s4730_s1 + $0xc] ss:$16 sps:$4 sm:$0xff]  }
  0x11   :  { %1689 = vmatprep.subr.bf16.mxu0 %v3080_v17  ;;  %v3102_v32 = vld [vmem:[%s4730_s1 + $0x104] ss:$16 sps:$4 sm:$0xff]   ;;  %v3106_v34 = vld [vmem:[%s4730_s1 + $0x100] ss:$16 sps:$4 sm:$0xff]  }
  0x12   :  { %v3104_v33 = vld [vmem:[%s4730_s1 + $0x304] ss:$16 sps:$4 sm:$0xff]   ;;  %v3107_v35 = vld [vmem:[%s4730_s1 + $0x300] ss:$16 sps:$4 sm:$0xff]  }
  0x13   :  { %1649 = vmatpush1.bf16.msra.mxu1 %v3082_v18  ;;  %v3108_v39 = vld [vmem:[%s4730_s1 + $0x124] ss:$16 sps:$4 sm:$0xff]   ;;  %v3112_v41 = vld [vmem:[%s4730_s1 + $0x120] ss:$16 sps:$4 sm:$0xff]  }
  0x14   :  { %1690 = vmatpush1.bf16.msra.mxu0 %v3083_v19  ;;  %1650 = vmatprep.subr.bf16.mxu1 %v3084_v20  ;;  %v3110_v40 = vld [vmem:[%s4730_s1 + $0x324] ss:$16 sps:$4 sm:$0xff]   ;;  %v3113_v44 = vld [vmem:[%s4730_s1 + $0x320] ss:$16 sps:$4 sm:$0xff]   ;;  %v3154_v19 = vld [vmem:[%s4730_s1 + $0x8] ss:$16 sps:$4 sm:$0xff]  }
  0x15   :  { %1691 = vmatprep.subr.bf16.mxu0 %v3086_v21  ;;  %v3114_v45 = vld [vmem:[%s4730_s1 + $0x144] ss:$16 sps:$4 sm:$0xff]   ;;  %v3118_v47 = vld [vmem:[%s4730_s1 + $0x140] ss:$16 sps:$4 sm:$0xff]   ;;  %v3162_v21 = vld [vmem:[%s4730_s1 + $0x2c] ss:$16 sps:$4 sm:$0xff]  }
  0x16   :  { %v3116_v46 = vld [vmem:[%s4730_s1 + $0x344] ss:$16 sps:$4 sm:$0xff]   ;;  %v3119_v48 = vld [vmem:[%s4730_s1 + $0x340] ss:$16 sps:$4 sm:$0xff]  }
  0x17   :  { %1651 = vmatpush1.bf16.msra.mxu1 %v3088_v22  ;;  %v3120_v50 = vld [vmem:[%s4730_s1 + $0x164] ss:$16 sps:$4 sm:$0xff]   ;;  %v3124_v53 = vld [vmem:[%s4730_s1 + $0x160] ss:$16 sps:$4 sm:$0xff]  }
  0x18   :  { %1692 = vmatpush1.bf16.msra.mxu0 %v3089_v23  ;;  %1652 = vmatprep.subr.bf16.mxu1 %v3090_v24  ;;  %v3122_v51 = vld [vmem:[%s4730_s1 + $0x364] ss:$16 sps:$4 sm:$0xff]   ;;  %v3125_v56 = vld [vmem:[%s4730_s1 + $0x360] ss:$16 sps:$4 sm:$0xff]   ;;  %v3160_v23 = vld [vmem:[%s4730_s1 + $0x28] ss:$16 sps:$4 sm:$0xff]  }
  0x19   :  { %1693 = vmatprep.subr.bf16.mxu0 %v3092_v25  ;;  %v28_v52 = vld [vmem:[%s4729_s0] sm:$0xff]  ;;  %v3168_v25 = vld [vmem:[%s4730_s1 + $0x4c] ss:$16 sps:$4 sm:$0xff]  }
  0x1a   :  { %v39_v54 = vrot.slane %v28_v52, %v3757_v49  ;;  %v32_v55 = vcombine.high %v28_v52, %v28_v52  ;;  %v3126_v57 = vld [vmem:[%s4730_s1 + $0x184] ss:$16 sps:$4 sm:$0xff]   ;;  %v3130_v61 = vld [vmem:[%s4730_s1 + $0x180] ss:$16 sps:$4 sm:$0xff]  }
  0x1b   :  { %1653 = vmatpush1.bf16.msra.mxu1 %v3094_v26  ;;  %v3128_v58 = vld [vmem:[%s4730_s1 + $0x384] ss:$16 sps:$4 sm:$0xff]   ;;  %v3131_v0 = vld [vmem:[%s4730_s1 + $0x380] ss:$16 sps:$4 sm:$0xff]  }
  0x1c   :  { %1694 = vmatpush1.bf16.msra.mxu0 %v3095_v27  ;;  %1654 = vmatprep.subr.bf16.mxu1 %v3096_v28  ;;  %v47_v59 = vcombine.high %v39_v54, %v39_v54  ;;  %v46_v60 = vrot.slane %v32_v55, %v3757_v49  ;;  %v3132_v1 = vld [vmem:[%s4730_s1 + $0x1a4] ss:$16 sps:$4 sm:$0xff]   ;;  %v3136_v4 = vld [vmem:[%s4730_s1 + $0x1a0] ss:$16 sps:$4 sm:$0xff]   ;;  %v3833_v16 = vpack.c.bf16 %v39_v54, %v39_v54  ;;  %v3166_v27 = vld [vmem:[%s4730_s1 + $0x48] ss:$16 sps:$4 sm:$0xff]  }
  0x1d   :  { %1695 = vmatprep.subr.bf16.mxu0 %v3098_v29  ;;  %v3134_v2 = vld [vmem:[%s4730_s1 + $0x3a4] ss:$16 sps:$4 sm:$0xff]   ;;  %v3137_v5 = vld [vmem:[%s4730_s1 + $0x3a0] ss:$16 sps:$4 sm:$0xff]   ;;  %v3174_v29 = vld [vmem:[%s4730_s1 + $0x6c] ss:$16 sps:$4 sm:$0xff]  }
  0x1e   :  { %v75_v62 = vpack.c.bf16 %v47_v59, %v47_v59  ;;  %v48_v63 = vcombine.high %v46_v60, %v46_v60  ;;  %v3138_v6 = vld [vmem:[%s4730_s1 + $0x1c4] ss:$16 sps:$4 sm:$0xff]   ;;  %v3142_v8 = vld [vmem:[%s4730_s1 + $0x1c0] ss:$16 sps:$4 sm:$0xff]   ;;  %v3838_v18 = vpack.c.bf16 %v46_v60, %v46_v60  ;;  %v3204_v55 = vld [vmem:[%s4730_s1 + $0x10c] ss:$16 sps:$4 sm:$0xff]  }
  0x1f   :  { %1655 = vmatpush1.bf16.msra.mxu1 %v3100_v30  ;;  %v3140_v7 = vld [vmem:[%s4730_s1 + $0x3c4] ss:$16 sps:$4 sm:$0xff]   ;;  %v3143_v9 = vld [vmem:[%s4730_s1 + $0x3c0] ss:$16 sps:$4 sm:$0xff]   ;;  %v3210_v59 = vld [vmem:[%s4730_s1 + $0x12c] ss:$16 sps:$4 sm:$0xff]  }
  0x20   :  { %1696 = vmatpush1.bf16.msra.mxu0 %v3101_v31  ;;  %1656 = vmatprep.subr.bf16.mxu1 %v3102_v32  ;;  %v3794_v3 = vpack.c.bf16 %v48_v63, %v48_v63  ;;  %v3144_v10 = vld [vmem:[%s4730_s1 + $0x1e4] ss:$16 sps:$4 sm:$0xff]   ;;  %v3148_v12 = vld [vmem:[%s4730_s1 + $0x1e0] ss:$16 sps:$4 sm:$0xff]   ;;  %v3172_v31 = vld [vmem:[%s4730_s1 + $0x68] ss:$16 sps:$4 sm:$0xff]  }
  0x21   :  { %1697 = vmatprep.subr.bf16.mxu0 %v3104_v33  ;;  %1672 = vmatprep.mubr.bf16.mxu1 %v75_v62  ;;  %v3146_v11 = vld [vmem:[%s4730_s1 + $0x3e4] ss:$16 sps:$4 sm:$0xff]   ;;  %v3149_v13 = vld [vmem:[%s4730_s1 + $0x3e0] ss:$16 sps:$4 sm:$0xff]   ;;  %v3180_v33 = vld [vmem:[%s4730_s1 + $0x8c] ss:$16 sps:$4 sm:$0xff]  }
  0x22   :  { %1713 = vmatprep.mubr.bf16.mxu0 %v3794_v3  ;;  %v3153_v14 = vld [vmem:[%s4730_s1 + $0x404] ss:$16 sps:$4 sm:$0xff]   ;;  %v3151_v17 = vld [vmem:[%s4730_s1 + $0x400] ss:$16 sps:$4 sm:$0xff]   ;;  %v3216_v63 = vld [vmem:[%s4730_s1 + $0x14c] ss:$16 sps:$4 sm:$0xff]  }
  0x23   :  { %1657 = vmatpush1.bf16.msra.mxu1 %v3106_v34  ;;  %v3159_v20 = vld [vmem:[%s4730_s1 + $0x424] ss:$16 sps:$4 sm:$0xff]   ;;  %v3157_v22 = vld [vmem:[%s4730_s1 + $0x420] ss:$16 sps:$4 sm:$0xff]  }
  0x24   :  { %1698 = vmatpush1.bf16.msra.mxu0 %v3107_v35  ;;  %1658 = vmatprep.subr.bf16.mxu1 %v3108_v39  ;;  %v3165_v24 = vld [vmem:[%s4730_s1 + $0x444] ss:$16 sps:$4 sm:$0xff]   ;;  %v3163_v26 = vld [vmem:[%s4730_s1 + $0x440] ss:$16 sps:$4 sm:$0xff]   ;;  %v3178_v35 = vld [vmem:[%s4730_s1 + $0x88] ss:$16 sps:$4 sm:$0xff]  }
  0x25   :  { %1699 = vmatprep.subr.bf16.mxu0 %v3110_v40  ;;  %v3171_v28 = vld [vmem:[%s4730_s1 + $0x464] ss:$16 sps:$4 sm:$0xff]   ;;  %v3169_v30 = vld [vmem:[%s4730_s1 + $0x460] ss:$16 sps:$4 sm:$0xff]   ;;  %v3184_v39 = vld [vmem:[%s4730_s1 + $0xa8] ss:$16 sps:$4 sm:$0xff]  }
  0x26   :  { %v3177_v32 = vld [vmem:[%s4730_s1 + $0x484] ss:$16 sps:$4 sm:$0xff]   ;;  %v3175_v34 = vld [vmem:[%s4730_s1 + $0x480] ss:$16 sps:$4 sm:$0xff]  }
  0x27   :  { %1659 = vmatpush1.bf16.msra.mxu1 %v3112_v41  ;;  %v3183_v36 = vld [vmem:[%s4730_s1 + $0x4a4] ss:$16 sps:$4 sm:$0xff]   ;;  %v3181_v38 = vld [vmem:[%s4730_s1 + $0x4a0] ss:$16 sps:$4 sm:$0xff]   ;;  %v3192_v41 = vld [vmem:[%s4730_s1 + $0xcc] ss:$16 sps:$4 sm:$0xff]  }
  0x28   :  { %1700 = vmatpush1.bf16.msra.mxu0 %v3113_v44  ;;  %1660 = vmatprep.subr.bf16.mxu1 %v3114_v45  ;;  %v3189_v40 = vld [vmem:[%s4730_s1 + $0x4c4] ss:$16 sps:$4 sm:$0xff]   ;;  %v3918_v44 = vrot.slane %v3914_v42, %v3757_v49  ;;  %v3187_v45 = vld [vmem:[%s4730_s1 + $0x4c0] ss:$16 sps:$4 sm:$0xff]  }
  0x29   :  { %1701 = vmatprep.subr.bf16.mxu0 %v3116_v46  ;;  %v3190_v46 = vld [vmem:[%s4730_s1 + $0xc8] ss:$16 sps:$4 sm:$0xff]   ;;  %v3193_v52 = vld [vmem:[%s4730_s1 + $0x4e0] ss:$16 sps:$4 sm:$0xff]   ;;  %v3201_v54 = vld [vmem:[%s4730_s1 + $0x504] ss:$16 sps:$4 sm:$0xff]  }
  0x2a   :  { %v3205_v60 = vld [vmem:[%s4730_s1 + $0x520] ss:$16 sps:$4 sm:$0xff]  }
  0x2b   :  { %1661 = vmatpush1.bf16.msra.mxu1 %v3118_v47  ;;  %v64_v47 = vcombine.high %v3918_v44, %v3918_v44 }
  0x2c   :  { %1702 = vmatpush1.bf16.msra.mxu0 %v3119_v48  ;;  %1662 = vmatprep.subr.bf16.mxu1 %v3120_v50  ;;  %v3195_v48 = vld [vmem:[%s4730_s1 + $0x4e4] ss:$16 sps:$4 sm:$0xff]   ;;  %v3198_v50 = vld [vmem:[%s4730_s1 + $0xec] ss:$16 sps:$4 sm:$0xff]  }
  0x2d   :  { %1703 = vmatprep.subr.bf16.mxu0 %v3122_v51  ;;  %v3934_v51 = vpack.c.bf16 %v64_v47, %v64_v47  ;;  %v3274_v47 = vld [vmem:[%s4730_s1 + $0x288] ss:$16 sps:$4 sm:$0xff]  }
  0x2f   :  { %1663 = vmatpush1.bf16.msra.mxu1 %v3124_v53  ;;  %v3196_v53 = vld [vmem:[%s4730_s1 + $0xe8] ss:$16 sps:$4 sm:$0xff]  }
  0x30   :  { %1704 = vmatpush1.bf16.msra.mxu0 %v3125_v56  ;;  %1664 = vmatprep.subr.bf16.mxu1 %v3126_v57  ;;  %v3199_v56 = vld [vmem:[%s4730_s1 + $0x500] ss:$16 sps:$4 sm:$0xff]   ;;  %v3202_v57 = vld [vmem:[%s4730_s1 + $0x108] ss:$16 sps:$4 sm:$0xff]  }
  0x31   :  { %1705 = vmatprep.subr.bf16.mxu0 %v3128_v58  ;;  %v3207_v58 = vld [vmem:[%s4730_s1 + $0x524] ss:$16 sps:$4 sm:$0xff]  }
  0x33   :  { %1665 = vmatpush1.bf16.msra.mxu1 %v3130_v61  ;;  %v3208_v61 = vld [vmem:[%s4730_s1 + $0x128] ss:$16 sps:$4 sm:$0xff]  }
  0x34   :  { %1706 = vmatpush1.bf16.msra.mxu0 %v3131_v0  ;;  %1666 = vmatprep.subr.bf16.mxu1 %v3132_v1  ;;  %v3211_v0 = vld [vmem:[%s4730_s1 + $0x540] ss:$16 sps:$4 sm:$0xff]   ;;  %v3214_v1 = vld [vmem:[%s4730_s1 + $0x148] ss:$16 sps:$4 sm:$0xff]  }
  0x35   :  { %1707 = vmatprep.subr.bf16.mxu0 %v3134_v2  ;;  %v3219_v2 = vld [vmem:[%s4730_s1 + $0x564] ss:$16 sps:$4 sm:$0xff]  }
  0x37   :  { %1667 = vmatpush1.bf16.msra.mxu1 %v3136_v4  ;;  %v3222_v4 = vld [vmem:[%s4730_s1 + $0x16c] ss:$16 sps:$4 sm:$0xff]  }
  0x38   :  { %1708 = vmatpush1.bf16.msra.mxu0 %v3137_v5  ;;  %1668 = vmatprep.subr.bf16.mxu1 %v3138_v6  ;;  %v3217_v5 = vld [vmem:[%s4730_s1 + $0x560] ss:$16 sps:$4 sm:$0xff]   ;;  %v3220_v6 = vld [vmem:[%s4730_s1 + $0x168] ss:$16 sps:$4 sm:$0xff]  }
  0x39   :  { %1709 = vmatprep.subr.bf16.mxu0 %v3140_v7  ;;  %v3225_v7 = vld [vmem:[%s4730_s1 + $0x584] ss:$16 sps:$4 sm:$0xff]  }
  0x3b   :  { %1669 = vmatpush1.bf16.msra.mxu1 %v3142_v8  ;;  %v3228_v8 = vld [vmem:[%s4730_s1 + $0x18c] ss:$16 sps:$4 sm:$0xff]  }
  0x3c   :  { %1710 = vmatpush1.bf16.msra.mxu0 %v3143_v9  ;;  %1670 = vmatprep.subr.bf16.mxu1 %v3144_v10  ;;  %v3223_v9 = vld [vmem:[%s4730_s1 + $0x580] ss:$16 sps:$4 sm:$0xff]   ;;  %v3226_v10 = vld [vmem:[%s4730_s1 + $0x188] ss:$16 sps:$4 sm:$0xff]  }
  0x3d   :  { %1711 = vmatprep.subr.bf16.mxu0 %v3146_v11  ;;  %v3231_v11 = vld [vmem:[%s4730_s1 + $0x5a4] ss:$16 sps:$4 sm:$0xff]  }
  0x3f   :  { %1671 = vmatpush1.bf16.msra.mxu1 %v3148_v12  ;;  %v3234_v12 = vld [vmem:[%s4730_s1 + $0x1ac] ss:$16 sps:$4 sm:$0xff]  }
  0x40   :  { %1712 = vmatpush1.bf16.msra.mxu0 %v3149_v13  ;;  %1804 = vmatprep.subr.bf16.mxu1 %v3156_v15  ;;  %v3229_v13 = vld [vmem:[%s4730_s1 + $0x5a0] ss:$16 sps:$4 sm:$0xff]   ;;  %v3237_v15 = vld [vmem:[%s4730_s1 + $0x5c4] ss:$16 sps:$4 sm:$0xff]  }
  0x41   :  { %1722 = vmatprep.subr.bf16.mxu0 %v3153_v14  ;;  %v3232_v14 = vld [vmem:[%s4730_s1 + $0x1a8] ss:$16 sps:$4 sm:$0xff]  }
  0x42   :  { %1673 = vmatmul.mubr.bf16.vlgmr.msra.gmra.mrb[0].mxu1 %v3833_v16 }
  0x43   :  { %1714 = vmatmul.mubr.bf16.vlgmr.msra.gmra.mrb[0].mxu0 %v3838_v18  ;;  %1805 = vmatpush1.bf16.msra.mxu1 %v3154_v19  ;;  %v49_v19 = vcombine.high %v3914_v42, %v3914_v42  ;;  %v3268_v42 = vld [vmem:[%s4730_s1 + $0x268] ss:$16 sps:$4 sm:$0xff]  }
  0x44   :  { %1723 = vmatpush1.bf16.msra.mxu0 %v3151_v17  ;;  %1806 = vmatprep.subr.bf16.mxu1 %v3162_v21  ;;  %v3240_v17 = vld [vmem:[%s4730_s1 + $0x1cc] ss:$16 sps:$4 sm:$0xff]   ;;  %v3238_v21 = vld [vmem:[%s4730_s1 + $0x1c8] ss:$16 sps:$4 sm:$0xff]  }
  0x45   :  { %1724 = vmatprep.subr.bf16.mxu0 %v3159_v20  ;;  %1836 = vmatprep.mubr.bf16.mxu1 %v75_v62  ;;  %v3213_v62 = vld [vmem:[%s4730_s1 + $0x544] ss:$16 sps:$4 sm:$0xff]   ;;  %v3235_v20 = vld [vmem:[%s4730_s1 + $0x5c0] ss:$16 sps:$4 sm:$0xff]  }
  0x46   :  { %1754 = vmatprep.mubr.bf16.mxu0 %v3934_v51 }
  0x47   :  { %1807 = vmatpush1.bf16.msra.mxu1 %v3160_v23  ;;  %v3246_v23 = vld [vmem:[%s4730_s1 + $0x1ec] ss:$16 sps:$4 sm:$0xff]  }
  0x48   :  { %1725 = vmatpush1.bf16.msra.mxu0 %v3157_v22  ;;  %1808 = vmatprep.subr.bf16.mxu1 %v3168_v25  ;;  %v3243_v22 = vld [vmem:[%s4730_s1 + $0x5e4] ss:$16 sps:$4 sm:$0xff]   ;;  %v3241_v25 = vld [vmem:[%s4730_s1 + $0x5e0] ss:$16 sps:$4 sm:$0xff]  }
  0x49   :  { %1726 = vmatprep.subr.bf16.mxu0 %v3165_v24  ;;  %v4036_v24 = vrot.slane %v49_v19, %v3757_v49  ;;  %v3252_v49 = vld [vmem:[%s4730_s1 + $0x20c] ss:$16 sps:$4 sm:$0xff]   ;;  %v3319_v19 = vld [vmem:[%s4730_s1 + $0x780] ss:$16 sps:$4 sm:$0xff]  }
  0x4b   :  { %1809 = vmatpush1.bf16.msra.mxu1 %v3166_v27  ;;  %v3249_v27 = vld [vmem:[%s4730_s1 + $0x604] ss:$16 sps:$4 sm:$0xff]  }
  0x4c   :  { %1727 = vmatpush1.bf16.msra.mxu0 %v3163_v26  ;;  %1810 = vmatprep.subr.bf16.mxu1 %v3174_v29  ;;  %v3244_v26 = vld [vmem:[%s4730_s1 + $0x1e8] ss:$16 sps:$4 sm:$0xff]   ;;  %v4054_v29 = vpack.c.bf16 %v3918_v44, %v3918_v44  ;;  %v3273_v44 = vld [vmem:[%s4730_s1 + $0x684] ss:$16 sps:$4 sm:$0xff]  }
  0x4d   :  { %1728 = vmatprep.subr.bf16.mxu0 %v3171_v28  ;;  %v65_v28 = vcombine.high %v4036_v24, %v4036_v24 }
  0x4f   :  { %1811 = vmatpush1.bf16.msra.mxu1 %v3172_v31  ;;  %v3250_v31 = vld [vmem:[%s4730_s1 + $0x208] ss:$16 sps:$4 sm:$0xff]  }
  0x50   :  { %1729 = vmatpush1.bf16.msra.mxu0 %v3169_v30  ;;  %1812 = vmatprep.subr.bf16.mxu1 %v3180_v33  ;;  %v3247_v30 = vld [vmem:[%s4730_s1 + $0x600] ss:$16 sps:$4 sm:$0xff]   ;;  %v3258_v33 = vld [vmem:[%s4730_s1 + $0x22c] ss:$16 sps:$4 sm:$0xff]  }
  0x51   :  { %1730 = vmatprep.subr.bf16.mxu0 %v3177_v32  ;;  %v3255_v32 = vld [vmem:[%s4730_s1 + $0x624] ss:$16 sps:$4 sm:$0xff]  }
  0x53   :  { %1813 = vmatpush1.bf16.msra.mxu1 %v3178_v35  ;;  %v3253_v35 = vld [vmem:[%s4730_s1 + $0x620] ss:$16 sps:$4 sm:$0xff]  }
  0x54   :  { %1731 = vmatpush1.bf16.msra.mxu0 %v3175_v34  ;;  %1814 = vmatprep.subr.bf16.mxu1 %v3186_v37  ;;  %v4068_v34 = vpack.c.bf16 %v65_v28, %v65_v28  ;;  %v3261_v37 = vld [vmem:[%s4730_s1 + $0x644] ss:$16 sps:$4 sm:$0xff]   ;;  %v3334_v28 = vld [vmem:[%s4730_s1 + $0x3c8] ss:$16 sps:$4 sm:$0xff]  }
  0x55   :  { %1732 = vmatprep.subr.bf16.mxu0 %v3183_v36  ;;  %v3256_v36 = vld [vmem:[%s4730_s1 + $0x228] ss:$16 sps:$4 sm:$0xff]  }
  0x57   :  { %1815 = vmatpush1.bf16.msra.mxu1 %v3184_v39  ;;  %v3262_v39 = vld [vmem:[%s4730_s1 + $0x248] ss:$16 sps:$4 sm:$0xff]  }
  0x58   :  { %1733 = vmatpush1.bf16.msra.mxu0 %v3181_v38  ;;  %1816 = vmatprep.subr.bf16.mxu1 %v3192_v41  ;;  %v3259_v38 = vld [vmem:[%s4730_s1 + $0x640] ss:$16 sps:$4 sm:$0xff]  }
  0x59   :  { %1734 = vmatprep.subr.bf16.mxu0 %v3189_v40  ;;  %v3267_v40 = vld [vmem:[%s4730_s1 + $0x664] ss:$16 sps:$4 sm:$0xff]   ;;  %v3265_v41 = vld [vmem:[%s4730_s1 + $0x660] ss:$16 sps:$4 sm:$0xff]  }
  0x5b   :  { %1817 = vmatpush1.bf16.msra.mxu1 %v3190_v46  ;;  %v3271_v46 = vld [vmem:[%s4730_s1 + $0x680] ss:$16 sps:$4 sm:$0xff]  }
  0x5c   :  { %1735 = vmatpush1.bf16.msra.mxu0 %v3187_v45  ;;  %1818 = vmatprep.subr.bf16.mxu1 %v3198_v50  ;;  %v3276_v45 = vld [vmem:[%s4730_s1 + $0x28c] ss:$16 sps:$4 sm:$0xff]  }
  0x5d   :  { %1736 = vmatprep.subr.bf16.mxu0 %v3195_v48  ;;  %v3279_v48 = vld [vmem:[%s4730_s1 + $0x6a4] ss:$16 sps:$4 sm:$0xff]   ;;  %v3282_v50 = vld [vmem:[%s4730_s1 + $0x2ac] ss:$16 sps:$4 sm:$0xff]  }
  0x5f   :  { %1819 = vmatpush1.bf16.msra.mxu1 %v3196_v53  ;;  %v3280_v53 = vld [vmem:[%s4730_s1 + $0x2a8] ss:$16 sps:$4 sm:$0xff]  }
  0x60   :  { %1737 = vmatpush1.bf16.msra.mxu0 %v3193_v52  ;;  %1820 = vmatprep.subr.bf16.mxu1 %v3204_v55  ;;  %v3277_v52 = vld [vmem:[%s4730_s1 + $0x6a0] ss:$16 sps:$4 sm:$0xff]   ;;  %v3288_v55 = vld [vmem:[%s4730_s1 + $0x2cc] ss:$16 sps:$4 sm:$0xff]  }
  0x61   :  { %1738 = vmatprep.subr.bf16.mxu0 %v3201_v54  ;;  %v3285_v54 = vld [vmem:[%s4730_s1 + $0x6c4] ss:$16 sps:$4 sm:$0xff]  }
  0x63   :  { %1821 = vmatpush1.bf16.msra.mxu1 %v3202_v57  ;;  %v3286_v57 = vld [vmem:[%s4730_s1 + $0x2c8] ss:$16 sps:$4 sm:$0xff]  }
  0x64   :  { %1739 = vmatpush1.bf16.msra.mxu0 %v3199_v56  ;;  %1822 = vmatprep.subr.bf16.mxu1 %v3210_v59  ;;  %v3283_v56 = vld [vmem:[%s4730_s1 + $0x6c0] ss:$16 sps:$4 sm:$0xff]   ;;  %v3294_v59 = vld [vmem:[%s4730_s1 + $0x2ec] ss:$16 sps:$4 sm:$0xff]  }
  0x65   :  { %1740 = vmatprep.subr.bf16.mxu0 %v3207_v58  ;;  %v3291_v58 = vld [vmem:[%s4730_s1 + $0x6e4] ss:$16 sps:$4 sm:$0xff]  }
  0x67   :  { %1823 = vmatpush1.bf16.msra.mxu1 %v3208_v61  ;;  %v3292_v61 = vld [vmem:[%s4730_s1 + $0x2e8] ss:$16 sps:$4 sm:$0xff]  }
  0x68   :  { %1741 = vmatpush1.bf16.msra.mxu0 %v3205_v60  ;;  %1824 = vmatprep.subr.bf16.mxu1 %v3216_v63  ;;  %v3289_v60 = vld [vmem:[%s4730_s1 + $0x6e0] ss:$16 sps:$4 sm:$0xff]   ;;  %v3300_v63 = vld [vmem:[%s4730_s1 + $0x30c] ss:$16 sps:$4 sm:$0xff]  }
  0x69   :  { %1742 = vmatprep.subr.bf16.mxu0 %v3213_v62  ;;  %v3297_v62 = vld [vmem:[%s4730_s1 + $0x704] ss:$16 sps:$4 sm:$0xff]  }
  0x6b   :  { %1825 = vmatpush1.bf16.msra.mxu1 %v3214_v1  ;;  %v3298_v1 = vld [vmem:[%s4730_s1 + $0x308] ss:$16 sps:$4 sm:$0xff]  }
  0x6c   :  { %1743 = vmatpush1.bf16.msra.mxu0 %v3211_v0  ;;  %1826 = vmatprep.subr.bf16.mxu1 %v3222_v4  ;;  %v3295_v0 = vld [vmem:[%s4730_s1 + $0x700] ss:$16 sps:$4 sm:$0xff]   ;;  %v3306_v4 = vld [vmem:[%s4730_s1 + $0x32c] ss:$16 sps:$4 sm:$0xff]  }
  0x6d   :  { %1744 = vmatprep.subr.bf16.mxu0 %v3219_v2  ;;  %v3303_v2 = vld [vmem:[%s4730_s1 + $0x724] ss:$16 sps:$4 sm:$0xff]  }
  0x6f   :  { %1827 = vmatpush1.bf16.msra.mxu1 %v3220_v6  ;;  %v3304_v6 = vld [vmem:[%s4730_s1 + $0x328] ss:$16 sps:$4 sm:$0xff]  }
  0x70   :  { %1745 = vmatpush1.bf16.msra.mxu0 %v3217_v5  ;;  %1828 = vmatprep.subr.bf16.mxu1 %v3228_v8  ;;  %v3301_v5 = vld [vmem:[%s4730_s1 + $0x720] ss:$16 sps:$4 sm:$0xff]   ;;  %v3312_v8 = vld [vmem:[%s4730_s1 + $0x34c] ss:$16 sps:$4 sm:$0xff]  }
  0x71   :  { %1746 = vmatprep.subr.bf16.mxu0 %v3225_v7  ;;  %v3309_v7 = vld [vmem:[%s4730_s1 + $0x744] ss:$16 sps:$4 sm:$0xff]  }
  0x73   :  { %1829 = vmatpush1.bf16.msra.mxu1 %v3226_v10  ;;  %v3310_v10 = vld [vmem:[%s4730_s1 + $0x348] ss:$16 sps:$4 sm:$0xff]  }
  0x74   :  { %1747 = vmatpush1.bf16.msra.mxu0 %v3223_v9  ;;  %1830 = vmatprep.subr.bf16.mxu1 %v3234_v12  ;;  %v3307_v9 = vld [vmem:[%s4730_s1 + $0x740] ss:$16 sps:$4 sm:$0xff]   ;;  %v3318_v12 = vld [vmem:[%s4730_s1 + $0x36c] ss:$16 sps:$4 sm:$0xff]  }
  0x75   :  { %1748 = vmatprep.subr.bf16.mxu0 %v3231_v11  ;;  %v3315_v11 = vld [vmem:[%s4730_s1 + $0x764] ss:$16 sps:$4 sm:$0xff]  }
  0x77   :  { %1831 = vmatpush1.bf16.msra.mxu1 %v3232_v14  ;;  %v3316_v14 = vld [vmem:[%s4730_s1 + $0x368] ss:$16 sps:$4 sm:$0xff]  }
  0x78   :  { %1749 = vmatpush1.bf16.msra.mxu0 %v3229_v13  ;;  %1832 = vmatprep.subr.bf16.mxu1 %v3240_v17  ;;  %v3313_v13 = vld [vmem:[%s4730_s1 + $0x760] ss:$16 sps:$4 sm:$0xff]   ;;  %v3324_v17 = vld [vmem:[%s4730_s1 + $0x38c] ss:$16 sps:$4 sm:$0xff]  }
  0x79   :  { %1750 = vmatprep.subr.bf16.mxu0 %v3237_v15  ;;  %v3321_v15 = vld [vmem:[%s4730_s1 + $0x784] ss:$16 sps:$4 sm:$0xff]  }
  0x7b   :  { %1833 = vmatpush1.bf16.msra.mxu1 %v3238_v21  ;;  %v3327_v21 = vld [vmem:[%s4730_s1 + $0x7a4] ss:$16 sps:$4 sm:$0xff]  }
  0x7c   :  { %1751 = vmatpush1.bf16.msra.mxu0 %v3235_v20  ;;  %1834 = vmatprep.subr.bf16.mxu1 %v3246_v23  ;;  %v3322_v20 = vld [vmem:[%s4730_s1 + $0x388] ss:$16 sps:$4 sm:$0xff]   ;;  %v3325_v23 = vld [vmem:[%s4730_s1 + $0x7a0] ss:$16 sps:$4 sm:$0xff]  }
  0x7d   :  { %1752 = vmatprep.subr.bf16.mxu0 %v3243_v22  ;;  %v3330_v22 = vld [vmem:[%s4730_s1 + $0x3ac] ss:$16 sps:$4 sm:$0xff]  }
  0x7f   :  { %1835 = vmatpush1.bf16.msra.mxu1 %v3244_v26  ;;  %v3333_v26 = vld [vmem:[%s4730_s1 + $0x7c4] ss:$16 sps:$4 sm:$0xff]  }
  0x80   :  { %1753 = vmatpush1.bf16.msra.mxu0 %v3241_v25  ;;  %1845 = vmatprep.subr.bf16.mxu1 %v3252_v49  ;;  %v3328_v25 = vld [vmem:[%s4730_s1 + $0x3a8] ss:$16 sps:$4 sm:$0xff]   ;;  %v3331_v49 = vld [vmem:[%s4730_s1 + $0x7c0] ss:$16 sps:$4 sm:$0xff]  }
  0x81   :  { %1763 = vmatprep.subr.bf16.mxu0 %v3249_v27  ;;  %v3336_v27 = vld [vmem:[%s4730_s1 + $0x3cc] ss:$16 sps:$4 sm:$0xff]  }
  0x82   :  { %1837 = vmatmul.mubr.bf16.vlgmr.msra.gmra.mrb[4].mxu1 %v3833_v16  ;;  %v3264_v16 = vld [vmem:[%s4730_s1 + $0x24c] ss:$16 sps:$4 sm:$0xff]  }
  0x83   :  { %1755 = vmatmul.mubr.bf16.vlgmr.msra.gmra.mrb[0].mxu0 %v4054_v29  ;;  %1846 = vmatpush1.bf16.msra.mxu1 %v3250_v31  ;;  %v3342_v31 = vld [vmem:[%s4730_s1 + $0x3ec] ss:$16 sps:$4 sm:$0xff]  }
  0x84   :  { %1764 = vmatpush1.bf16.msra.mxu0 %v3247_v30  ;;  %1847 = vmatprep.subr.bf16.mxu1 %v3258_v33  ;;  %v3339_v30 = vld [vmem:[%s4730_s1 + $0x7e4] ss:$16 sps:$4 sm:$0xff]   ;;  %v3340_v33 = vld [vmem:[%s4730_s1 + $0x3e8] ss:$16 sps:$4 sm:$0xff]  }
  0x85   :  { %1765 = vmatprep.subr.bf16.mxu0 %v3255_v32  ;;  %1795 = vmatprep.mubr.bf16.mxu0 %v4068_v34  ;;  %v3337_v32 = vld [vmem:[%s4730_s1 + $0x7e0] ss:$16 sps:$4 sm:$0xff]  }
  0x86   :  { %1877 = vmatprep.mubr.bf16.mxu1 %v3794_v3  ;;  %v3270_v3 = vld [vmem:[%s4730_s1 + $0x26c] ss:$16 sps:$4 sm:$0xff]  }
  0x87   :  { %1848 = vmatpush1.bf16.msra.mxu1 %v3256_v36  ;;  %v3344_v36 = vld [vmem:[%s4730_s1 + $0x408] ss:$16 sps:$4 sm:$0xff]  }
  0x88   :  { %1766 = vmatpush1.bf16.msra.mxu0 %v3253_v35  ;;  %1849 = vmatprep.subr.bf16.mxu1 %v3264_v16  ;;  %v3346_v35 = vld [vmem:[%s4730_s1 + $0x40c] ss:$16 sps:$4 sm:$0xff]  }
  0x89   :  { %1767 = vmatprep.subr.bf16.mxu0 %v3261_v37  ;;  %v4256_v37 = vpack.c.bf16 %v4036_v24, %v4036_v24  ;;  %v3349_v16 = vld [vmem:[%s4730_s1 + $0x42c] ss:$16 sps:$4 sm:$0xff]  }
  0x8a   :  { %v3442_v24 = vld [vmem:[%s4732_s3 + $0x4] ss:$8 sps:$4 sm:$0xff]  }
  0x8b   :  { %1850 = vmatpush1.bf16.msra.mxu1 %v3262_v39  ;;  %v3347_v39 = vld [vmem:[%s4730_s1 + $0x428] ss:$16 sps:$4 sm:$0xff]  }
  0x8c   :  { %1768 = vmatpush1.bf16.msra.mxu0 %v3259_v38  ;;  %1851 = vmatprep.subr.bf16.mxu1 %v3270_v3  ;;  %v3440_v38 = vld [vmem:[%s4732_s3] ss:$8 sps:$4 sm:$0xff]   ;;  %v3443_v3 = vld [vmem:[%s4732_s3 + $0x10] ss:$8 sps:$4 sm:$0xff]  }
  0x8d   :  { %1769 = vmatprep.subr.bf16.mxu0 %v3267_v40  ;;  %v3445_v40 = vld [vmem:[%s4732_s3 + $0x14] ss:$8 sps:$4 sm:$0xff]  }
  0x8f   :  { %1852 = vmatpush1.bf16.msra.mxu1 %v3268_v42  ;;  %v3355_v42 = vld [vmem:[%s4730_s1 + $0x46c] ss:$16 sps:$4 sm:$0xff]  }
  0x90   :  { %1770 = vmatpush1.bf16.msra.mxu0 %v3265_v41  ;;  %1853 = vmatprep.subr.bf16.mxu1 %v3276_v45  ;;  %v3350_v41 = vld [vmem:[%s4730_s1 + $0x448] ss:$16 sps:$4 sm:$0xff]  }
  0x91   :  { %1771 = vmatprep.subr.bf16.mxu0 %v3273_v44  ;;  %v3446_v44 = vld [vmem:[%s4732_s3 + $0x20] ss:$8 sps:$4 sm:$0xff]  }
  0x92   :  { %v3353_v45 = vld [vmem:[%s4730_s1 + $0x468] ss:$16 sps:$4 sm:$0xff]  }
  0x93   :  { %1854 = vmatpush1.bf16.msra.mxu1 %v3274_v47  ;;  %v3451_v47 = vld [vmem:[%s4732_s3 + $0x34] ss:$8 sps:$4 sm:$0xff]  }
  0x94   :  { %1772 = vmatpush1.bf16.msra.mxu0 %v3271_v46  ;;  %1855 = vmatprep.subr.bf16.mxu1 %v3282_v50  ;;  %v3358_v46 = vld [vmem:[%s4730_s1 + $0x48c] ss:$16 sps:$4 sm:$0xff]  }
  0x95   :  { %1773 = vmatprep.subr.bf16.mxu0 %v3279_v48  ;;  %v3449_v48 = vld [vmem:[%s4732_s3 + $0x30] ss:$8 sps:$4 sm:$0xff]   ;;  %v3454_v50 = vld [vmem:[%s4732_s3 + $0x44] ss:$8 sps:$4 sm:$0xff]  }
  0x97   :  { %1856 = vmatpush1.bf16.msra.mxu1 %v3280_v53  ;;  %v3361_v53 = vld [vmem:[%s4730_s1 + $0x4ac] ss:$16 sps:$4 sm:$0xff]  }
  0x98   :  { %1774 = vmatpush1.bf16.msra.mxu0 %v3277_v52  ;;  %1857 = vmatprep.subr.bf16.mxu1 %v3288_v55  ;;  %v3356_v52 = vld [vmem:[%s4730_s1 + $0x488] ss:$16 sps:$4 sm:$0xff]   ;;  %v3457_v55 = vld [vmem:[%s4732_s3 + $0x54] ss:$8 sps:$4 sm:$0xff]  }
  0x99   :  { %1775 = vmatprep.subr.bf16.mxu0 %v3285_v54  ;;  %v3452_v54 = vld [vmem:[%s4732_s3 + $0x40] ss:$8 sps:$4 sm:$0xff]  }
  0x9b   :  { %1858 = vmatpush1.bf16.msra.mxu1 %v3286_v57  ;;  %v3364_v57 = vld [vmem:[%s4730_s1 + $0x4cc] ss:$16 sps:$4 sm:$0xff]  }
  0x9c   :  { %1776 = vmatpush1.bf16.msra.mxu0 %v3283_v56  ;;  %1859 = vmatprep.subr.bf16.mxu1 %v3294_v59  ;;  %v3359_v56 = vld [vmem:[%s4730_s1 + $0x4a8] ss:$16 sps:$4 sm:$0xff]  }
  0x9d   :  { %1777 = vmatprep.subr.bf16.mxu0 %v3291_v58 }
  0x9f   :  { %1860 = vmatpush1.bf16.msra.mxu1 %v3292_v61 }
  0xa0   :  { %1778 = vmatpush1.bf16.msra.mxu0 %v3289_v60  ;;  %1861 = vmatprep.subr.bf16.mxu1 %v3300_v63 }
  0xa1   :  { %1779 = vmatprep.subr.bf16.mxu0 %v3297_v62 }
  0xa3   :  { %1862 = vmatpush1.bf16.msra.mxu1 %v3298_v1 }
  0xa4   :  { %1780 = vmatpush1.bf16.msra.mxu0 %v3295_v0  ;;  %1863 = vmatprep.subr.bf16.mxu1 %v3306_v4 }
  0xa5   :  { %1781 = vmatprep.subr.bf16.mxu0 %v3303_v2 }
  0xa7   :  { %1864 = vmatpush1.bf16.msra.mxu1 %v3304_v6 }
  0xa8   :  { %1782 = vmatpush1.bf16.msra.mxu0 %v3301_v5  ;;  %1865 = vmatprep.subr.bf16.mxu1 %v3312_v8 }
  0xa9   :  { %1783 = vmatprep.subr.bf16.mxu0 %v3309_v7 }
  0xab   :  { %1866 = vmatpush1.bf16.msra.mxu1 %v3310_v10 }
  0xac   :  { %1784 = vmatpush1.bf16.msra.mxu0 %v3307_v9  ;;  %1867 = vmatprep.subr.bf16.mxu1 %v3318_v12 }
  0xad   :  { %1785 = vmatprep.subr.bf16.mxu0 %v3315_v11 }
  0xaf   :  { %1868 = vmatpush1.bf16.msra.mxu1 %v3316_v14 }
  0xb0   :  { %1786 = vmatpush1.bf16.msra.mxu0 %v3313_v13  ;;  %1869 = vmatprep.subr.bf16.mxu1 %v3324_v17 }
  0xb1   :  { %1787 = vmatprep.subr.bf16.mxu0 %v3321_v15 }
  0xb3   :  { %1870 = vmatpush1.bf16.msra.mxu1 %v3322_v20 }
  0xb4   :  { %1788 = vmatpush1.bf16.msra.mxu0 %v3319_v19  ;;  %1871 = vmatprep.subr.bf16.mxu1 %v3330_v22 }
  0xb5   :  { %1789 = vmatprep.subr.bf16.mxu0 %v3327_v21 }
  0xb7   :  { %1872 = vmatpush1.bf16.msra.mxu1 %v3328_v25 }
  0xb8   :  { %1790 = vmatpush1.bf16.msra.mxu0 %v3325_v23  ;;  %1873 = vmatprep.subr.bf16.mxu1 %v3336_v27 }
  0xb9   :  { %1791 = vmatprep.subr.bf16.mxu0 %v3333_v26 }
  0xbb   :  { %1874 = vmatpush1.bf16.msra.mxu1 %v3334_v28 }
  0xbc   :  { %1792 = vmatpush1.bf16.msra.mxu0 %v3331_v49  ;;  %1875 = vmatprep.subr.bf16.mxu1 %v3342_v31 }
  0xbd   :  { %1793 = vmatprep.subr.bf16.mxu0 %v3339_v30 }
  0xbf   :  { %1876 = vmatpush1.bf16.msra.mxu1 %v3340_v33 }
  0xc0   :  { %1794 = vmatpush1.bf16.msra.mxu0 %v3337_v32  ;;  %1886 = vmatprep.subr.bf16.mxu1 %v3346_v35 }
  0xc1   :  { %2372 = vmatprep.subr.bf16.mxu0 %v3442_v24 }
  0xc2   :  { %1878 = vmatmul.mubr.bf16.vlgmr.msra.gmra.mrb[4].mxu1 %v3838_v18  ;;  %v3352_v18 = vld [vmem:[%s4730_s1 + $0x44c] ss:$16 sps:$4 sm:$0xff]  }
  0xc3   :  { %1796 = vmatmul.mubr.bf16.vlgmr.msra.gmra.mrb[0].mxu0 %v4256_v37  ;;  %1887 = vmatpush1.bf16.msra.mxu1 %v3344_v36 }
  0xc4   :  { %1918 = vmatprep.mubr.bf16.mxu1 %v3934_v51  ;;  %1888 = vmatprep.subr.bf16.mxu1 %v3349_v16  ;;  %v3448_v51 = vld [vmem:[%s4732_s3 + $0x24] ss:$8 sps:$4 sm:$0xff]  }
  0xc5   :  { %2373 = vmatpush1.bf16.msra.mxu0 %v3440_v38 }
  0xc6   :  { %2374 = vmatprep.subr.bf16.mxu0 %v3445_v40 }
  0xc7   :  { %1889 = vmatpush1.bf16.msra.mxu1 %v3347_v39 }
  0xc8   :  { %1890 = vmatprep.subr.bf16.mxu1 %v3352_v18 }
  0xc9   :  { %2375 = vmatpush1.bf16.msra.mxu0 %v3443_v3 }
  0xca   :  { %2376 = vmatprep.subr.bf16.mxu0 %v3448_v51 }
  0xcb   :  { %1891 = vmatpush1.bf16.msra.mxu1 %v3350_v41 }
  0xcc   :  { %1892 = vmatprep.subr.bf16.mxu1 %v3355_v42 }
  0xcd   :  { %2377 = vmatpush1.bf16.msra.mxu0 %v3446_v44 }
  0xce   :  { %2378 = vmatprep.subr.bf16.mxu0 %v3451_v47 }
  0xcf   :  { %1893 = vmatpush1.bf16.msra.mxu1 %v3353_v45 }
  0xd0   :  { %1894 = vmatprep.subr.bf16.mxu1 %v3358_v46 }
  0xd1   :  { %2379 = vmatpush1.bf16.msra.mxu0 %v3449_v48 }
  0xd2   :  { %2380 = vmatprep.subr.bf16.mxu0 %v3454_v50 }
  0xd3   :  { %1895 = vmatpush1.bf16.msra.mxu1 %v3356_v52 }
  0xd4   :  { %1896 = vmatprep.subr.bf16.mxu1 %v3361_v53 }
  0xd5   :  { %12 = vsyncpa [#allocation3], 0  ;;  %2381 = vmatpush1.bf16.msra.mxu0 %v3452_v54  ;;  %v3455_v58 = vld [vmem:[%s4732_s3 + $0x50] ss:$8 sps:$4 sm:$0xff]   ;;  %v3460_v59 = vld [vmem:[%s4732_s3 + $0x64] ss:$8 sps:$4 sm:$0xff]  }
  0xd6   :  { %2382 = vmatprep.subr.bf16.mxu0 %v3457_v55  ;;  %v3362_v60 = vld [vmem:[%s4730_s1 + $0x4c8] ss:$16 sps:$4 sm:$0xff]   ;;  %v3367_v61 = vld [vmem:[%s4730_s1 + $0x4ec] ss:$16 sps:$4 sm:$0xff]   ;;  %vm2633_vm0 = vcmask 1041408   ;;  %s3581_s30 = smov [#allocation2]  }
  0xd7   :  { %1897 = vmatpush1.bf16.msra.mxu1 %v3359_v56  ;;  %v3458_v62 = vld [vmem:[%s4732_s3 + $0x60] ss:$8 sps:$4 sm:$0xff]   ;;  %v3463_v63 = vld [vmem:[%s4732_s3 + $0x74] ss:$8 sps:$4 sm:$0xff]   ;;  %v3461_v2 = vld [vmem:[%s4732_s3 + $0x70] ss:$8 sps:$4 sm:$0xff]  }
  0xd8   :  { %1898 = vmatprep.subr.bf16.mxu1 %v3364_v57  ;;  %v3365_v0 = vld [vmem:[%s4730_s1 + $0x4e8] ss:$16 sps:$4 sm:$0xff]   ;;  %v3370_v1 = vld [vmem:[%s4730_s1 + $0x50c] ss:$16 sps:$4 sm:$0xff]   ;;  %s2653_s8 = sshll.u32 %s3581_s30, 4  ;;  %s2654_s8 = int_to_ptr.vmem [resolvable:$true] %s2653_s8 }
  0xd9   :  { %2383 = vmatpush1.bf16.msra.mxu0 %v3455_v58  ;;  %v3466_v4 = vld [vmem:[%s4732_s3 + $0x84] ss:$8 sps:$4 sm:$0xff]   ;;  %v3368_v5 = vld [vmem:[%s4730_s1 + $0x508] ss:$16 sps:$4 sm:$0xff]   ;;  %v3469_v8 = vld [vmem:[%s4732_s3 + $0x94] ss:$8 sps:$4 sm:$0xff]   ;;  %p3561_p1 = scmp.lt.s32.totalorder %s2654_s8, %s2654_s8 }
  0xda   :  { %2384 = vmatprep.subr.bf16.mxu0 %v3460_v59  ;;  %v3373_v6 = vld [vmem:[%s4730_s1 + $0x52c] ss:$16 sps:$4 sm:$0xff]   ;;  %v3464_v7 = vld [vmem:[%s4732_s3 + $0x80] ss:$8 sps:$4 sm:$0xff]   ;;  %v3467_v11 = vld [vmem:[%s4732_s3 + $0x90] ss:$8 sps:$4 sm:$0xff]  }
  0xdb   :  { %1899 = vmatpush1.bf16.msra.mxu1 %v3362_v60  ;;  %v3371_v9 = vld [vmem:[%s4730_s1 + $0x528] ss:$16 sps:$4 sm:$0xff]   ;;  %v3376_v10 = vld [vmem:[%s4730_s1 + $0x54c] ss:$16 sps:$4 sm:$0xff]  }
  0xdc   :  { %1900 = vmatprep.subr.bf16.mxu1 %v3367_v61  ;;  %v3472_v12 = vld [vmem:[%s4732_s3 + $0xa4] ss:$8 sps:$4 sm:$0xff]   ;;  %v3374_v13 = vld [vmem:[%s4730_s1 + $0x548] ss:$16 sps:$4 sm:$0xff]   ;;  %v3475_v17 = vld [vmem:[%s4732_s3 + $0xb4] ss:$8 sps:$4 sm:$0xff]  }
  0xdd   :  { %2385 = vmatpush1.bf16.msra.mxu0 %v3458_v62  ;;  %v3379_v14 = vld [vmem:[%s4730_s1 + $0x56c] ss:$16 sps:$4 sm:$0xff]   ;;  %v3470_v15 = vld [vmem:[%s4732_s3 + $0xa0] ss:$8 sps:$4 sm:$0xff]   ;;  %v3473_v21 = vld [vmem:[%s4732_s3 + $0xb0] ss:$8 sps:$4 sm:$0xff]  }
  0xde   :  { %2386 = vmatprep.subr.bf16.mxu0 %v3463_v63  ;;  %v3377_v19 = vld [vmem:[%s4730_s1 + $0x568] ss:$16 sps:$4 sm:$0xff]   ;;  %v3382_v20 = vld [vmem:[%s4730_s1 + $0x58c] ss:$16 sps:$4 sm:$0xff]  }
  0xdf   :  { %1901 = vmatpush1.bf16.msra.mxu1 %v3365_v0  ;;  %v3478_v22 = vld [vmem:[%s4732_s3 + $0xc4] ss:$8 sps:$4 sm:$0xff]   ;;  %v3380_v23 = vld [vmem:[%s4730_s1 + $0x588] ss:$16 sps:$4 sm:$0xff]   ;;  %v3481_v27 = vld [vmem:[%s4732_s3 + $0xd4] ss:$8 sps:$4 sm:$0xff]  }
  0xe0   :  { %1902 = vmatprep.subr.bf16.mxu1 %v3370_v1  ;;  %v3385_v25 = vld [vmem:[%s4730_s1 + $0x5ac] ss:$16 sps:$4 sm:$0xff]   ;;  %v3476_v26 = vld [vmem:[%s4732_s3 + $0xc0] ss:$8 sps:$4 sm:$0xff]   ;;  %v3479_v30 = vld [vmem:[%s4732_s3 + $0xd0] ss:$8 sps:$4 sm:$0xff]  }
  0xe1   :  { %2387 = vmatpush1.bf16.msra.mxu0 %v3461_v2  ;;  %v3383_v49 = vld [vmem:[%s4730_s1 + $0x5a8] ss:$16 sps:$4 sm:$0xff]   ;;  %v3388_v28 = vld [vmem:[%s4730_s1 + $0x5cc] ss:$16 sps:$4 sm:$0xff]  }
  0xe2   :  { %2388 = vmatprep.subr.bf16.mxu0 %v3466_v4  ;;  %v3386_v31 = vld [vmem:[%s4730_s1 + $0x5c8] ss:$16 sps:$4 sm:$0xff]   ;;  %v3391_v32 = vld [vmem:[%s4730_s1 + $0x5ec] ss:$16 sps:$4 sm:$0xff]  }
  0xe3   :  { %1903 = vmatpush1.bf16.msra.mxu1 %v3368_v5  ;;  %v3389_v33 = vld [vmem:[%s4730_s1 + $0x5e8] ss:$16 sps:$4 sm:$0xff]   ;;  %v3394_v35 = vld [vmem:[%s4730_s1 + $0x60c] ss:$16 sps:$4 sm:$0xff]  }
  0xe4   :  { %1904 = vmatprep.subr.bf16.mxu1 %v3373_v6  ;;  %v3392_v36 = vld [vmem:[%s4730_s1 + $0x608] ss:$16 sps:$4 sm:$0xff]   ;;  %v3397_v16 = vld [vmem:[%s4730_s1 + $0x62c] ss:$16 sps:$4 sm:$0xff]  }
  0xe5   :  { %2389 = vmatpush1.bf16.msra.mxu0 %v3464_v7  ;;  %v3395_v38 = vld [vmem:[%s4730_s1 + $0x628] ss:$16 sps:$4 sm:$0xff]   ;;  %v3400_v24 = vld [vmem:[%s4730_s1 + $0x64c] ss:$16 sps:$4 sm:$0xff]  }
  0xe6   :  { %2390 = vmatprep.subr.bf16.mxu0 %v3469_v8  ;;  %v3398_v39 = vld [vmem:[%s4730_s1 + $0x648] ss:$16 sps:$4 sm:$0xff]   ;;  %v3406_v40 = vld [vmem:[%s4730_s1 + $0x68c] ss:$16 sps:$4 sm:$0xff]  }
  0xe7   :  { %1905 = vmatpush1.bf16.msra.mxu1 %v3371_v9  ;;  %v3404_v18 = vld [vmem:[%s4730_s1 + $0x688] ss:$16 sps:$4 sm:$0xff]   ;;  %v3409_v3 = vld [vmem:[%s4730_s1 + $0x6ac] ss:$16 sps:$4 sm:$0xff]  }
  0xe8   :  { %1906 = vmatprep.subr.bf16.mxu1 %v3376_v10  ;;  %v3407_v51 = vld [vmem:[%s4730_s1 + $0x6a8] ss:$16 sps:$4 sm:$0xff]   ;;  %v3412_v41 = vld [vmem:[%s4730_s1 + $0x6cc] ss:$16 sps:$4 sm:$0xff]   ;;  %v342_v10 = vsub.s32 0, %v3739_v43 }
  0xe9   :  { %2391 = vmatpush1.bf16.msra.mxu0 %v3467_v11  ;;  %v3484_v42 = vld [vmem:[%s4732_s3 + $0xe4] ss:$8 sps:$4 sm:$0xff]   ;;  %v3482_v45 = vld [vmem:[%s4732_s3 + $0xe0] ss:$8 sps:$4 sm:$0xff]   ;;  %v3487_v53 = vld [vmem:[%s4732_s3 + $0xf4] ss:$8 sps:$4 sm:$0xff]  }
  0xea   :  { %2392 = vmatprep.subr.bf16.mxu0 %v3472_v12  ;;  %v3410_v48 = vld [vmem:[%s4730_s1 + $0x6c8] ss:$16 sps:$4 sm:$0xff]   ;;  %v3415_v52 = vld [vmem:[%s4730_s1 + $0x6ec] ss:$16 sps:$4 sm:$0xff]   ;;  %v4553_v11 = vld [vmem:[%s4731_s2] sm:$0xf] }
  0xeb   :  { %1907 = vmatpush1.bf16.msra.mxu1 %v3374_v13  ;;  %v3485_v54 = vld [vmem:[%s4732_s3 + $0xf0] ss:$8 sps:$4 sm:$0xff]   ;;  %v3418_v56 = vld [vmem:[%s4730_s1 + $0x70c] ss:$16 sps:$4 sm:$0xff]   ;;  %v346_v12 = vsub.s32 1, %v3739_v43  ;;  %v343_v13 = vrot.slane %v4553_v11, %v342_v10 }
  0xec   :  { %1908 = vmatprep.subr.bf16.mxu1 %v3379_v14  ;;  %v3413_v55 = vld [vmem:[%s4730_s1 + $0x6e8] ss:$16 sps:$4 sm:$0xff]   ;;  %v3490_v57 = vld [vmem:[%s4732_s3 + $0x104] ss:$8 sps:$4 sm:$0xff]  }
  0xed   :  { %2393 = vmatpush1.bf16.msra.mxu0 %v3470_v15  ;;  %v3416_v58 = vld [vmem:[%s4730_s1 + $0x708] ss:$16 sps:$4 sm:$0xff]   ;;  %v3421_v59 = vld [vmem:[%s4730_s1 + $0x72c] ss:$16 sps:$4 sm:$0xff]   ;;  %v347_v14 = vrot.slane %v4553_v11, %v346_v12 }
  0xee   :  { %2394 = vmatprep.subr.bf16.mxu0 %v3475_v17  ;;  %v3419_v60 = vld [vmem:[%s4730_s1 + $0x728] ss:$16 sps:$4 sm:$0xff]   ;;  %v3424_v61 = vld [vmem:[%s4730_s1 + $0x74c] ss:$16 sps:$4 sm:$0xff]  }
  0xef   :  { %1909 = vmatpush1.bf16.msra.mxu1 %v3377_v19  ;;  %v3422_v62 = vld [vmem:[%s4730_s1 + $0x748] ss:$16 sps:$4 sm:$0xff]   ;;  %v3427_v63 = vld [vmem:[%s4730_s1 + $0x76c] ss:$16 sps:$4 sm:$0xff]  }
  0xf0   :  { %1910 = vmatprep.subr.bf16.mxu1 %v3382_v20  ;;  %v3425_v0 = vld [vmem:[%s4730_s1 + $0x768] ss:$16 sps:$4 sm:$0xff]   ;;  %v3430_v1 = vld [vmem:[%s4730_s1 + $0x78c] ss:$16 sps:$4 sm:$0xff]  }
  0xf1   :  { %2395 = vmatpush1.bf16.msra.mxu0 %v3473_v21  ;;  %v3428_v2 = vld [vmem:[%s4730_s1 + $0x788] ss:$16 sps:$4 sm:$0xff]   ;;  %v3433_v4 = vld [vmem:[%s4730_s1 + $0x7ac] ss:$16 sps:$4 sm:$0xff]  }
  0xf2   :  { %2396 = vmatprep.subr.bf16.mxu0 %v3478_v22  ;;  %v3431_v5 = vld [vmem:[%s4730_s1 + $0x7a8] ss:$16 sps:$4 sm:$0xff]   ;;  %v3436_v6 = vld [vmem:[%s4730_s1 + $0x7cc] ss:$16 sps:$4 sm:$0xff]  }
  0xf3   :  { %1911 = vmatpush1.bf16.msra.mxu1 %v3380_v23  ;;  %v3434_v7 = vld [vmem:[%s4730_s1 + $0x7c8] ss:$16 sps:$4 sm:$0xff]   ;;  %v3439_v8 = vld [vmem:[%s4730_s1 + $0x7ec] ss:$16 sps:$4 sm:$0xff]  }
  0xf4   :  { %1912 = vmatprep.subr.bf16.mxu1 %v3385_v25  ;;  %v3437_v9 = vld [vmem:[%s4730_s1 + $0x7e8] ss:$16 sps:$4 sm:$0xff]  }
  0xf5   :  { %2397 = vmatpush1.bf16.msra.mxu0 %v3476_v26 }
  0xf6   :  { %2398 = vmatprep.subr.bf16.mxu0 %v3481_v27 }
  0xf7   :  { %1913 = vmatpush1.bf16.msra.mxu1 %v3383_v49  ;;  %v3488_v49 = vld [vmem:[%s4732_s3 + $0x100] ss:$8 sps:$4 sm:$0xff]  }
  0xf8   :  { %1914 = vmatprep.subr.bf16.mxu1 %v3388_v28 }
  0xf9   :  { %2399 = vmatpush1.bf16.msra.mxu0 %v3479_v30  ;;  %v3493_v30 = vld [vmem:[%s4732_s3 + $0x114] ss:$8 sps:$4 sm:$0xff]  }
  0xfa   :  { %2400 = vmatprep.subr.bf16.mxu0 %v3484_v42  ;;  %v3505_v42 = vld [vmem:[%s4732_s3 + $0x154] ss:$8 sps:$4 sm:$0xff]  }
  0xfb   :  { %1915 = vmatpush1.bf16.msra.mxu1 %v3386_v31  ;;  %v3536_v31 = vld [vmem:[%s4734_s5 + $0x40] sm:$0xff]  }
  0xfc   :  { %1916 = vmatprep.subr.bf16.mxu1 %v3391_v32  ;;  %v3537_v32 = vld [vmem:[%s4734_s5] sm:$0xff]  }
  0xfd   :  { %2401 = vmatpush1.bf16.msra.mxu0 %v3482_v45  ;;  %v3546_v45 = vld [vmem:[%s4734_s5 + $0x68] sm:$0xff]  }
  0xfe   :  { %2402 = vmatprep.subr.bf16.mxu0 %v3487_v53  ;;  %v3509_v53 = vld [vmem:[%s4732_s3 + $0x170] ss:$8 sps:$4 sm:$0xff]  }
  0xff   :  { %1917 = vmatpush1.bf16.msra.mxu1 %v3389_v33  ;;  %v3538_v33 = vld [vmem:[%s4734_s5 + $0x48] sm:$0xff]  }
 0x100   :  { %1927 = vmatprep.subr.bf16.mxu1 %v3394_v35  ;;  %v3491_v35 = vld [vmem:[%s4732_s3 + $0x110] ss:$8 sps:$4 sm:$0xff]  }
 0x101   :  { %2403 = vmatpush1.bf16.msra.mxu0 %v3485_v54  ;;  %v3514_v54 = vld [vmem:[%s4732_s3 + $0x184] ss:$8 sps:$4 sm:$0xff]  }
 0x102   :  { %1919 = vmatmul.mubr.bf16.vlgmr.msra.gmra.mrb[4].mxu1 %v4054_v29  ;;  %v3403_v29 = vld [vmem:[%s4730_s1 + $0x66c] ss:$16 sps:$4 sm:$0xff]   ;;  %2413 = vmatprep.subr.bf16.mxu0 %v3490_v57  ;;  %v3515_v57 = vld [vmem:[%s4732_s3 + $0x190] ss:$8 sps:$4 sm:$0xff]  }
 0x103   :  { %1928 = vmatpush1.bf16.msra.mxu1 %v3392_v36  ;;  %1959 = vmatprep.mubr.bf16.mxu1 %v4068_v34  ;;  %v3401_v34 = vld [vmem:[%s4730_s1 + $0x668] ss:$16 sps:$4 sm:$0xff]   ;;  %v3496_v36 = vld [vmem:[%s4732_s3 + $0x124] ss:$8 sps:$4 sm:$0xff]  }
 0x104   :  { %1929 = vmatprep.subr.bf16.mxu1 %v3397_v16  ;;  %v3539_v16 = vld [vmem:[%s4734_s5 + $0x8] sm:$0xff]  }
 0x107   :  { %1930 = vmatpush1.bf16.msra.mxu1 %v3395_v38  ;;  %v3540_v38 = vld [vmem:[%s4734_s5 + $0x50] sm:$0xff]  }
 0x108   :  { %1931 = vmatprep.subr.bf16.mxu1 %v3400_v24  ;;  %v3494_v24 = vld [vmem:[%s4732_s3 + $0x120] ss:$8 sps:$4 sm:$0xff]  }
 0x10b   :  { %1932 = vmatpush1.bf16.msra.mxu1 %v3398_v39  ;;  %v3499_v39 = vld [vmem:[%s4732_s3 + $0x134] ss:$8 sps:$4 sm:$0xff]  }
 0x10c   :  { %1933 = vmatprep.subr.bf16.mxu1 %v3403_v29  ;;  %v3541_v29 = vld [vmem:[%s4734_s5 + $0x10] sm:$0xff]  }
 0x10f   :  { %1934 = vmatpush1.bf16.msra.mxu1 %v3401_v34  ;;  %v3542_v34 = vld [vmem:[%s4734_s5 + $0x58] sm:$0xff]  }
 0x110   :  { %1935 = vmatprep.subr.bf16.mxu1 %v3406_v40  ;;  %v3497_v40 = vld [vmem:[%s4732_s3 + $0x130] ss:$8 sps:$4 sm:$0xff]  }
 0x113   :  { %1936 = vmatpush1.bf16.msra.mxu1 %v3404_v18  ;;  %v3502_v18 = vld [vmem:[%s4732_s3 + $0x144] ss:$8 sps:$4 sm:$0xff]  }
 0x114   :  { %1937 = vmatprep.subr.bf16.mxu1 %v3409_v3  ;;  %v3543_v3 = vld [vmem:[%s4734_s5 + $0x18] sm:$0xff]  }
 0x115   :  { %v1674_v44 = vpop.f32.mrb[0].mxu1 }
 0x116   :  { %v1676_v46 = vpop.f32.mrb[1].mxu1  ;;  %v1675_v15 = vadd.f32 %v1674_v44, %v343_v13  ;;  %v3545_v44 = vld [vmem:[%s4734_s5 + $0x20] sm:$0xff]  }
 0x117   :  { %v1678_v47 = vpop.f32.mrb[2].mxu1  ;;  %1938 = vmatpush1.bf16.msra.mxu1 %v3407_v51  ;;  %v1677_v17 = vadd.f32 %v1676_v46, %v347_v14  ;;  %v3544_v51 = vld [vmem:[%s4734_s5 + $0x60] sm:$0xff]   ;;  %v3503_v46 = vld [vmem:[%s4732_s3 + $0x150] ss:$8 sps:$4 sm:$0xff]  }
 0x118   :  { %v1679_v50 = vpop.f32.mrb[3].mxu1  ;;  %1939 = vmatprep.subr.bf16.mxu1 %v3412_v41  ;;  %v3500_v41 = vld [vmem:[%s4732_s3 + $0x140] ss:$8 sps:$4 sm:$0xff]   ;;  %v3508_v47 = vld [vmem:[%s4732_s3 + $0x164] ss:$8 sps:$4 sm:$0xff]  }
 0x119   :  { %v3506_v50 = vld [vmem:[%s4732_s3 + $0x160] ss:$8 sps:$4 sm:$0xff]  }
 0x11b   :  { %1940 = vmatpush1.bf16.msra.mxu1 %v3410_v48  ;;  %v3547_v48 = vld [vmem:[%s4734_s5 + $0x28] sm:$0xff]  }
 0x11c   :  { %1941 = vmatprep.subr.bf16.mxu1 %v3415_v52  ;;  %v3511_v52 = vld [vmem:[%s4732_s3 + $0x174] ss:$8 sps:$4 sm:$0xff]  }
 0x11f   :  { %1942 = vmatpush1.bf16.msra.mxu1 %v3413_v55  ;;  %v3512_v55 = vld [vmem:[%s4732_s3 + $0x180] ss:$8 sps:$4 sm:$0xff]  }
 0x120   :  { %1943 = vmatprep.subr.bf16.mxu1 %v3418_v56  ;;  %v3517_v56 = vld [vmem:[%s4732_s3 + $0x194] ss:$8 sps:$4 sm:$0xff]  }
 0x123   :  { %1944 = vmatpush1.bf16.msra.mxu1 %v3416_v58  ;;  %v3520_v58 = vld [vmem:[%s4732_s3 + $0x1a4] ss:$8 sps:$4 sm:$0xff]  }
 0x124   :  { %1945 = vmatprep.subr.bf16.mxu1 %v3421_v59  ;;  %v3518_v59 = vld [vmem:[%s4732_s3 + $0x1a0] ss:$8 sps:$4 sm:$0xff]  }
 0x127   :  { %1946 = vmatpush1.bf16.msra.mxu1 %v3419_v60  ;;  %v3523_v60 = vld [vmem:[%s4732_s3 + $0x1b4] ss:$8 sps:$4 sm:$0xff]  }
 0x128   :  { %1947 = vmatprep.subr.bf16.mxu1 %v3424_v61  ;;  %v3521_v61 = vld [vmem:[%s4732_s3 + $0x1b0] ss:$8 sps:$4 sm:$0xff]  }
 0x12b   :  { %1948 = vmatpush1.bf16.msra.mxu1 %v3422_v62  ;;  %v3526_v62 = vld [vmem:[%s4732_s3 + $0x1c4] ss:$8 sps:$4 sm:$0xff]  }
 0x12c   :  { %1949 = vmatprep.subr.bf16.mxu1 %v3427_v63  ;;  %v3524_v63 = vld [vmem:[%s4732_s3 + $0x1c0] ss:$8 sps:$4 sm:$0xff]  }
 0x12f   :  { %1950 = vmatpush1.bf16.msra.mxu1 %v3425_v0  ;;  %v3529_v0 = vld [vmem:[%s4732_s3 + $0x1d4] ss:$8 sps:$4 sm:$0xff]  }
 0x130   :  { %1951 = vmatprep.subr.bf16.mxu1 %v3430_v1  ;;  %v3527_v1 = vld [vmem:[%s4732_s3 + $0x1d0] ss:$8 sps:$4 sm:$0xff]  }
 0x133   :  { %1952 = vmatpush1.bf16.msra.mxu1 %v3428_v2  ;;  %v3532_v2 = vld [vmem:[%s4732_s3 + $0x1e4] ss:$8 sps:$4 sm:$0xff]  }
 0x134   :  { %1953 = vmatprep.subr.bf16.mxu1 %v3433_v4  ;;  %v3530_v4 = vld [vmem:[%s4732_s3 + $0x1e0] ss:$8 sps:$4 sm:$0xff]  }
 0x137   :  { %1954 = vmatpush1.bf16.msra.mxu1 %v3431_v5  ;;  %v3535_v5 = vld [vmem:[%s4732_s3 + $0x1f4] ss:$8 sps:$4 sm:$0xff]  }
 0x138   :  { %1955 = vmatprep.subr.bf16.mxu1 %v3436_v6  ;;  %v3533_v6 = vld [vmem:[%s4732_s3 + $0x1f0] ss:$8 sps:$4 sm:$0xff]  }
 0x13b   :  { %1956 = vmatpush1.bf16.msra.mxu1 %v3434_v7  ;;  %v350_v7 = vsub.s32 2, %v3739_v43 }
 0x13c   :  { %1957 = vmatprep.subr.bf16.mxu1 %v3439_v8  ;;  %v354_v8 = vsub.s32 3, %v3739_v43 }
 0x13e   :  { %v355_v13 = vrot.slane %v4553_v11, %v354_v8 }
 0x13f   :  { %1958 = vmatpush1.bf16.msra.mxu1 %v3437_v9  ;;  %v351_v9 = vrot.slane %v4553_v11, %v350_v7  ;;  %v3549_v11 = vld [vmem:[%s4734_s5 + $0x30] sm:$0xff]  }
 0x140   :  { %2998 = vmatprep.subr.bf16.mxu1 %v3536_v31 }
 0x142   :  { %1960 = vmatmul.mubr.bf16.vlgmr.msra.gmra.mrb[4].mxu1 %v4256_v37 }
 0x143   :  { %2999 = vmatpush3.bf16.msra.mxu1 %v3537_v32 }
 0x144   :  { %3000 = vmatprep.subr.bf16.mxu1 %v3538_v33 }
 0x147   :  { %3001 = vmatpush3.bf16.msra.mxu1 %v3539_v16 }
 0x148   :  { %3002 = vmatprep.subr.bf16.mxu1 %v3540_v38 }
 0x14b   :  { %3003 = vmatpush3.bf16.msra.mxu1 %v3541_v29 }
 0x14c   :  { %3004 = vmatprep.subr.bf16.mxu1 %v3542_v34 }
 0x14f   :  { %3005 = vmatpush3.bf16.msra.mxu1 %v3543_v3 }
 0x150   :  { %3006 = vmatprep.subr.bf16.mxu1 %v3544_v51 }
 0x153   :  { %3007 = vmatpush3.bf16.msra.mxu1 %v3545_v44 }
 0x154   :  { %3008 = vmatprep.subr.bf16.mxu1 %v3546_v45 }
 0x157   :  { %3009 = vmatpush3.bf16.msra.mxu1 %v3547_v48 }
 0x196   :  { %v1797_v37 = vpop.f32.mrb[0].mxu0 }
 0x197   :  { %v3021_v19 = vadd.f32 %v1797_v37, %v1675_v15  ;;  %v1799_v20 = vpop.f32.mrb[1].mxu0 }
 0x198   :  { %v3023_v21 = vadd.f32 %v1799_v20, %v1677_v17  ;;  %v1801_v22 = vpop.f32.mrb[2].mxu0 }
 0x199   :  { %v1968_v23 = vmax.f32 %v3021_v19, 0.0  ;;  %v1802_v25 = vpop.f32.mrb[3].mxu0 }
 0x19a   :  { %v1969_v26 = vmax.f32 %v3023_v21, 0.0 }
 0x19b   :  { %v1972_v28 = vpack.c.bf16 %v1968_v23, %v1968_v23 }
 0x19c   :  { %v1973_v27 = vpack.c.bf16 %v1969_v26, %v1969_v26  ;;  %v3548_v26 = vld [vmem:[%s4734_s5 + $0x70] sm:$0xff]  }
 0x19d   :  { %3010 = vmatprep.subr.bf16.mxu1 %v3548_v26 }
 0x19e   :  { %2404 = vmatprep.mubr.bf16.mxu0 %v1973_v27  ;;  %3011 = vmatpush3.bf16.msra.mxu1 %v3549_v11  ;;  %v3550_v27 = vld [vmem:[%s4734_s5 + $0x78] sm:$0xff]  }
 0x19f   :  { %2405 = vmatmul.mubr.bf16.vlgmr.msra.gmra.mrb[4].mxu0 %v1972_v28  ;;  %3012 = vmatprep.subr.bf16.mxu1 %v3550_v27  ;;  %v2040_v28 = vld [vmem:[%s4733_s4] sm:$0x3] }
 0x1a0   :  { %2414 = vmatpush1.bf16.msra.mxu0 %v3488_v49  ;;  %v3551_v49 = vld [vmem:[%s4734_s5 + $0x38] sm:$0xff]   ;;  %v2049_v31 = vrot.slane %v2040_v28, %v346_v12 }
 0x1a1   :  { %2415 = vmatprep.subr.bf16.mxu0 %v3493_v30  ;;  %v2045_v30 = vrot.slane %v2040_v28, %v342_v10  ;;  %v2981_v10 = vld [vmem:[%s4735_s6] ss:$0 sm:$0xff]  ;;  %s3556_s6 = scalar_lea.vmem %s2654_s8, 32 }
 0x1a2   :  { %3013 = vmatpush3.bf16.msra.mxu1 %v3551_v49  ;;  %p3557_p0 = scmp.ne.s32.totalorder %s2654_s8, %s3556_s6  ;;  %p3562_p2 = scmp.lt.s32.totalorder %s3556_s6, %s3556_s6 }
 0x1a4   :  { %2416 = vmatpush1.bf16.msra.mxu0 %v3491_v35  ;;  %p3563_p3 = por %p3562_p2, %p3561_p1 }
 0x1a5   :  { %2417 = vmatprep.subr.bf16.mxu0 %v3496_v36 }
 0x1a6   :  { %p3564_p4 = pnand %p3563_p3, %p3557_p0 }
 0x1a8   :  { %2418 = vmatpush1.bf16.msra.mxu0 %v3494_v24 }
 0x1a9   :  { %2419 = vmatprep.subr.bf16.mxu0 %v3499_v39 }
 0x1ac   :  { %2420 = vmatpush1.bf16.msra.mxu0 %v3497_v40 }
 0x1ad   :  { %2421 = vmatprep.subr.bf16.mxu0 %v3502_v18 }
 0x1b0   :  { %2422 = vmatpush1.bf16.msra.mxu0 %v3500_v41 }
 0x1b1   :  { %2423 = vmatprep.subr.bf16.mxu0 %v3505_v42 }
 0x1b4   :  { %2424 = vmatpush1.bf16.msra.mxu0 %v3503_v46 }
 0x1b5   :  { %2425 = vmatprep.subr.bf16.mxu0 %v3508_v47 }
 0x1b8   :  { %2426 = vmatpush1.bf16.msra.mxu0 %v3506_v50 }
 0x1b9   :  { %2427 = vmatprep.subr.bf16.mxu0 %v3511_v52 }
 0x1bc   :  { %2428 = vmatpush1.bf16.msra.mxu0 %v3509_v53 }
 0x1bd   :  { %2429 = vmatprep.subr.bf16.mxu0 %v3514_v54 }
 0x1c0   :  { %2430 = vmatpush1.bf16.msra.mxu0 %v3512_v55 }
 0x1c1   :  { %2431 = vmatprep.subr.bf16.mxu0 %v3517_v56 }
 0x1c4   :  { %2432 = vmatpush1.bf16.msra.mxu0 %v3515_v57 }
 0x1c5   :  { %2433 = vmatprep.subr.bf16.mxu0 %v3520_v58 }
 0x1c8   :  { %2434 = vmatpush1.bf16.msra.mxu0 %v3518_v59 }
 0x1c9   :  { %2435 = vmatprep.subr.bf16.mxu0 %v3523_v60 }
 0x1cc   :  { %2436 = vmatpush1.bf16.msra.mxu0 %v3521_v61 }
 0x1cd   :  { %2437 = vmatprep.subr.bf16.mxu0 %v3526_v62 }
 0x1d0   :  { %2438 = vmatpush1.bf16.msra.mxu0 %v3524_v63 }
 0x1d1   :  { %2439 = vmatprep.subr.bf16.mxu0 %v3529_v0 }
 0x1d4   :  { %2440 = vmatpush1.bf16.msra.mxu0 %v3527_v1 }
 0x1d5   :  { %2441 = vmatprep.subr.bf16.mxu0 %v3532_v2 }
 0x1d8   :  { %2442 = vmatpush1.bf16.msra.mxu0 %v3530_v4 }
 0x1d9   :  { %2443 = vmatprep.subr.bf16.mxu0 %v3535_v5 }
 0x1dc   :  { %2444 = vmatpush1.bf16.msra.mxu0 %v3533_v6 }
 0x215   :  { %v1961_v14 = vpop.f32.mrb[4].mxu1 }
 0x216   :  { %v3024_v15 = vadd.f32 %v1961_v14, %v351_v9  ;;  %v1963_v17 = vpop.f32.mrb[5].mxu1 }
 0x217   :  { %v3025_v37 = vadd.f32 %v1963_v17, %v355_v13  ;;  %v1965_v19 = vpop.f32.mrb[6].mxu1 }
 0x218   :  { %v1970_v20 = vmax.f32 %v3024_v15, 0.0  ;;  %v1966_v21 = vpop.f32.mrb[7].mxu1 }
 0x219   :  { %v1971_v22 = vmax.f32 %v3025_v37, 0.0 }
 0x21a   :  { %v1974_v25 = vpack.c.bf16 %v1970_v20, %v1970_v20 }
 0x21b   :  { %v1975_v23 = vpack.c.bf16 %v1971_v22, %v1971_v22 }
 0x21d   :  { %2445 = vmatprep.mubr.bf16.mxu0 %v1975_v23 }
 0x21e   :  { %2446 = vmatmul.mubr.bf16.vlgmr.msra.gmra.mrb[4].mxu0 %v1974_v25 }
 0x2f1   :  { %v2447_v32 = vpop.f32.mrb[4].mxu0 }
 0x2f2   :  { %v3026_v33 = vadd.f32 %v2447_v32, %v2045_v30  ;;  %v2449_v35 = vpop.f32.mrb[5].mxu0 }
 0x2f3   :  { %v3027_v36 = vadd.f32 %v2449_v35, %v2049_v31  ;;  %v2451_v16 = vpop.f32.mrb[6].mxu0 }
 0x2f4   :  { %v2454_v38 = vmax.f32 %v3026_v33, 0.0  ;;  %v2452_v24 = vpop.f32.mrb[7].mxu0 }
 0x2f5   :  { %v2455_v39 = vmax.f32 %v3027_v36, 0.0 }
 0x2f6   :  { %v2456_v34 = vpack.c.bf16 %v2454_v38, %v2454_v38 }
 0x2f7   :  { %v2457_v29 = vpack.c.bf16 %v2455_v39, %v2455_v39 }
 0x2f9   :  { %2625 = vmatprep.mubr.bf16.mxu1 %v2457_v29 }
 0x2fa   :  { %2626 = vmatmul.mubr.bf16.vlgmr.msra.gmra.mrb[8].mxu1 %v2456_v34 }
 0x3cd   :  { %v3014_v40 = vpop.f32.mrb[8].mxu1 }
 0x3ce   :  { %v3015_v18 = vpop.f32.mrb[9].mxu1 }
 0x3cf   :  { %v3016_v43 = vadd.f32 %v3015_v18, %v3014_v40  ;;  %v3017_v12 = vpop.f32.mrb[10].mxu1 }
 0x3d0   :  { %v3018_v3 = vpop.f32.mrb[11].mxu1 }
 0x3d1   :  { %v2628_v51 = vadd.f32 %v3016_v43, %v2981_v10 }
 0x3d3   :  { %v2634_v41 = vsel %vm2633_vm0, %v2628_v51, -inf }
 0x3d4   :  { %2635 = vmax.xlane.f32.xlu0 %v2634_v41 }
 0x461   :  { %v2636_v42 = vpop.xlane.xlu0 %2635 }
 0x462   :  { %v2637_v44 = vsub.f32 %v2628_v51, %v2636_v42 }
 0x464   :  { %v2638_v45 = vmul.f32 1.442695, %v2637_v44 }
 0x466   :  { %3552 = vpow2.f32 %v2638_v45 }
 0x470   :  { %v3553_v46 = vpop.eup %3552 }
 0x471   :  { %v2640_v47 = vsel %vm2633_vm0, %v3553_v46, 0.0 }
 0x472   :  { %2641 = vadd.xlane.f32.xlu0 %v2640_v47 }
 0x4ff   :  { %v2642_v48 = vpop.xlane.xlu0 %2641 }
 0x500   :  { %3554 = vlog2.f32 %v2642_v48 }
 0x50a   :  { %v3555_v50 = vpop.eup %3554 }
 0x50b   :  { %v2644_v52 = vmul.f32 0.6931472, %v3555_v50 }
 0x50d   :  { %v2645_v53 = vsub.f32 %v2637_v44, %v2644_v52 }
 0x50f   :  { %2646 = vst [vmem:[#allocation2] sm:$0x3] %v2645_v53 }
 0x510   :  { %3567 = shalt.err (!%p3564_p4)
}
 0x511   :  { %s3568_s11 = scalar_lea.hbm %s4736_s7, 32 }
 0x512   :  { %p3569_p5 = scmp.ne.s32.totalorder %s4736_s7, %s3568_s11  ;;  %p3572_p6 = scmp.lt.u32.totalorder %s3568_s11, %s4736_s7 }
 0x514   :  { %p3574_p7 = pnand %p3572_p6, %p3569_p5 }
 0x516   :  { %3577 = shalt.err (!%p3574_p7)
}
 0x517   :  { %2656 = dma.vmem_to_hbm [thread:$0]  %s2654_s8, 32, %s4736_s7, [#allocation3]  }
 0x518   :  { %3578 = dma.done.wait [#allocation3], 32  }
 0x519   :  { %3579 = vsyncadd [#allocation3], 4294967264 }
 0x51a   :  { %2660 = vsyncpa [#allocation3], 1 }

</bundles_post_ra>
